<compile_context>
chip_gen: v7x
topology: tpu7x:2x2x1
jax: 0.10.0
libtpu: 0.0.40
codegen_flags: <defaults>
</compile_context>

<pallas_src>
import functools

import jax
import jax.numpy as jnp
from jax.experimental import pallas as pl
from jax.experimental.pallas import tpu as pltpu


def _decoder_kernel(feat_ref, xyza_ref, dpa_ref,
                    wu_ref, bu_ref, w1_ref, b1_ref, w2_ref, b2_ref,
                    out_ref, *, knn_num, idx_bits):
    """One grid step == (one batch element, one tile of detect points)."""
    feat = feat_ref[0]          # (C_in, N_src_pad)  bf16
    xyza = xyza_ref[0]          # (N_src_pad, 4)     f32  = [-2x, -2y, -2z, |xyz|^2] (pads: [0,0,0,BIG])
    dpa = dpa_ref[0]            # (TILE_DST, 4)      f32  = [x, y, z, 1]

    # ---- pairwise squared distances via augmented K=4 matmul (no transpose needed) ----
    # cross = -2 * dp.xyz + |xyz|^2 ; dp_sq = |dp|^2 (last augmented column contributes 1).
    cross = jax.lax.dot_general(dpa, xyza, (((1,), (1,)), ((), ())),
                                preferred_element_type=jnp.float32)     # (TILE_DST, N_src_pad)
    dp_sq = jnp.sum(dpa * dpa, axis=-1, keepdims=True) - 1.0            # (TILE_DST, 1)
    dist2 = jnp.maximum(cross + dp_sq, 0.0)

    # ---- kNN selection: packed (dist, index) int32 key -> single XLU min per neighbor ----
    # Non-negative f32 bit patterns are order-preserving; low idx_bits carry the column index.
    iota = jax.lax.broadcasted_iota(jnp.int32, dist2.shape, 1)
    dist_bits = pltpu.bitcast(dist2, jnp.int32)
    high_mask = jnp.int32(~((1 << idx_bits) - 1))
    keys = jnp.bitwise_or(jnp.bitwise_and(dist_bits, high_mask), iota)  # unique per row
    int_max = jnp.int32(jnp.iinfo(jnp.int32).max)

    sel = jnp.zeros(dist2.shape, jnp.bool_)
    for _ in range(knn_num):                                            # knn_num small & static
        mk = jnp.where(sel, int_max, keys)
        mn = jnp.min(mk, axis=-1, keepdims=True)
        sel = jnp.logical_or(sel, mk == mn)                             # exactly one new pick/row

    # ---- inverse-distance weights (EUP reciprocal), normalized over the k neighbors ----
    inv = pl.reciprocal(dist2 + 1e-8, approx=True)
    w = jnp.where(sel, inv, 0.0)
    w = w * pl.reciprocal(jnp.sum(w, axis=-1, keepdims=True), approx=False)

    # ---- interpolate features onto detect points (bf16 MXU matmul, f32 accumulate) ----
    interp = jax.lax.dot_general(w.astype(jnp.bfloat16), feat,
                                 (((1,), (1,)), ((), ())),
                                 preferred_element_type=jnp.float32)    # (TILE_DST, C_in)

    # ---- upsample layer's point-wise linear (Conv1d 1x1) + ReLU ----
    nf = jnp.maximum(
        jnp.dot(interp, wu_ref[...], preferred_element_type=jnp.float32) + bu_ref[...],
        0.0)                                                            # (TILE_DST, D)

    # ---- cls head: Linear -> ReLU -> Linear -> Tanh, emitted lane-dense as (3, TILE_DST) ----
    h = jnp.maximum(
        jnp.dot(nf, w1_ref[...], preferred_element_type=jnp.float32) + b1_ref[...],
        0.0)                                                            # (TILE_DST, D//2)
    shift_t = jnp.tanh(
        jax.lax.dot_general(w2_ref[...], h, (((0,), (1,)), ((), ())),
                            preferred_element_type=jnp.float32) + b2_ref[...])  # (3, TILE_DST)

    out_ref[0] = shift_t


def decoder_forward(feature5, xyz, detect_point, params, *, knn_num, tile_dst=128):
    B, c_in, n_src = feature5.shape
    n_dst = detect_point.shape[1]
    wu, bu, w1, b1, w2, b2 = params
    assert knn_num <= n_src, "knn_num must not exceed the number of source points"

    n_src_pad = ((n_src + 127) // 128) * 128
    n_dst_pad = ((n_dst + tile_dst - 1) // tile_dst) * tile_dst

    # Augmented source points: [-2x, -2y, -2z, |xyz|^2]; padded rows get a huge squared norm
    # so they are never selected by kNN.  Features padded with zeros (never used: weight = 0).
    xyz_sq = jnp.sum(xyz * xyz, axis=-1, keepdims=True)
    xyz_aug = jnp.concatenate([-2.0 * xyz, xyz_sq], axis=-1).astype(jnp.float32)
    if n_src_pad != n_src:
        pad = jnp.zeros((B, n_src_pad - n_src, 4), jnp.float32).at[:, :, 3].set(1e30)
        xyz_aug = jnp.concatenate([xyz_aug, pad], axis=1)
        feature5 = jnp.pad(feature5, ((0, 0), (0, 0), (0, n_src_pad - n_src)))
    feature5 = feature5.astype(jnp.bfloat16)

    # Augmented detect points: [x, y, z, 1]; pad rows with zeros (results sliced away).
    dp_aug = jnp.concatenate(
        [detect_point, jnp.ones((B, n_dst, 1), detect_point.dtype)], axis=-1).astype(jnp.float32)
    if n_dst_pad != n_dst:
        dp_aug = jnp.pad(dp_aug, ((0, 0), (0, n_dst_pad - n_dst), (0, 0)))

    b2_col = jnp.reshape(b2, (-1, 1))                                   # (3, 1) for (3, N) output

    def _rep(shape):
        zeros = (0,) * len(shape)
        return pl.BlockSpec(shape, lambda b, t, _z=zeros: _z)

    grid_spec = pltpu.PrefetchScalarGridSpec(
        num_scalar_prefetch=0,
        grid=(B, n_dst_pad // tile_dst),
        in_specs=[
            pl.BlockSpec((1, c_in, n_src_pad), lambda b, t: (b, 0, 0)),   # feature5 (bf16)
            pl.BlockSpec((1, n_src_pad, 4), lambda b, t: (b, 0, 0)),      # xyz augmented
            pl.BlockSpec((1, tile_dst, 4), lambda b, t: (b, t, 0)),       # detect_point augmented
            _rep(wu.shape), _rep(bu.shape),
            _rep(w1.shape), _rep(b1.shape),
            _rep(w2.shape), _rep(b2_col.shape),
        ],
        out_specs=pl.BlockSpec((1, 3, tile_dst), lambda b, t: (b, 0, t)),
    )

    idx_bits = max(1, (n_src_pad - 1).bit_length())
    kernel = functools.partial(_decoder_kernel, knn_num=knn_num, idx_bits=idx_bits)

    out_t = pl.pallas_call(
        kernel,
        out_shape=jax.ShapeDtypeStruct((B, 3, n_dst_pad), jnp.float32),
        grid_spec=grid_spec,
        compiler_params=pltpu.CompilerParams(
            dimension_semantics=("parallel", "parallel")),
    )(feature5, xyz_aug, dp_aug, wu, bu, w1, b1, w2, b2_col)

    # Back to the PyTorch layout (B, N_dst, 3); drop detect-point padding.
    return jnp.transpose(out_t, (0, 2, 1))[:, :n_dst, :]


if __name__ == "__main__":
    # Small, module-consistent shapes.
    B = 2
    input_dim = 16          # channels of feature5 (input_dim in the module)
    decoder_dim = 32        # cls head width (dim_scale[2] == 1)
    N_src = 64              # number of source points (xyz / feature5)
    N_dst = 128             # number of detect points
    knn_num = 8             # knn_list[2]

    key = jax.random.PRNGKey(0)
    ks = jax.random.split(key, 9)

    feature5 = jax.random.normal(ks[0], (B, input_dim, N_src), jnp.float32)
    xyz = jax.random.normal(ks[1], (B, N_src, 3), jnp.float32)
    detect_point = jax.random.normal(ks[2], (B, N_dst, 3), jnp.float32)

    # Deterministic parameter init.  Linear weights stored as (in, out) == PyTorch W.T;
    # biases as (1, out).
    wu = 0.1 * jax.random.normal(ks[3], (input_dim, decoder_dim), jnp.float32)
    bu = 0.1 * jax.random.normal(ks[4], (1, decoder_dim), jnp.float32)
    w1 = 0.1 * jax.random.normal(ks[5], (decoder_dim, decoder_dim // 2), jnp.float32)
    b1 = 0.1 * jax.random.normal(ks[6], (1, decoder_dim // 2), jnp.float32)
    w2 = 0.1 * jax.random.normal(ks[7], (decoder_dim // 2, 3), jnp.float32)
    b2 = 0.1 * jax.random.normal(ks[8], (1, 3), jnp.float32)

    shift = decoder_forward(
        feature5, xyz, detect_point, (wu, bu, w1, b1, w2, b2), knn_num=knn_num)
    jax.block_until_ready(shift)

    assert shift.shape == (B, N_dst, 3), shift.shape
    assert bool(jnp.all(jnp.isfinite(shift)))
    assert bool(jnp.all(jnp.abs(shift) <= 1.0))   # tanh range
    print("KERNEL_OK")
</pallas_src>

<mosaic_0001>
module attributes {stable_mosaic.version = 11 : i64} {
  func.func @_decoder_kernel(%arg0: i32, %arg1: i32, %arg2: memref<1x16x128xbf16, #tpu.memory_space<vmem>>, %arg3: memref<1x128x4xf32, #tpu.memory_space<vmem>>, %arg4: memref<1x128x4xf32, #tpu.memory_space<vmem>>, %arg5: memref<16x32xf32, #tpu.memory_space<vmem>>, %arg6: memref<1x32xf32, #tpu.memory_space<vmem>>, %arg7: memref<32x16xf32, #tpu.memory_space<vmem>>, %arg8: memref<1x16xf32, #tpu.memory_space<vmem>>, %arg9: memref<16x3xf32, #tpu.memory_space<vmem>>, %arg10: memref<3x1xf32, #tpu.memory_space<vmem>>, %arg11: memref<1x3x128xf32, #tpu.memory_space<vmem>>) attributes {dimension_semantics = [#tpu.dimension_semantics<parallel>, #tpu.dimension_semantics<parallel>], iteration_bounds = array<i64: 2, 1>, scalar_prefetch = 0 : i64, scratch_operands = 0 : i64, tpu.core_type = #tpu.core_type<tc>, window_params = [{transform_indices = @transform_0, window_bounds = array<i64: 1, 16, 128>}, {transform_indices = @transform_1, window_bounds = array<i64: 1, 128, 4>}, {transform_indices = @transform_2, window_bounds = array<i64: 1, 128, 4>}, {pipeline_mode = #tpu.pipeline_mode<synchronous>, transform_indices = @transform_3, window_bounds = array<i64: 16, 32>}, {pipeline_mode = #tpu.pipeline_mode<synchronous>, transform_indices = @transform_4, window_bounds = array<i64: 1, 32>}, {pipeline_mode = #tpu.pipeline_mode<synchronous>, transform_indices = @transform_5, window_bounds = array<i64: 32, 16>}, {pipeline_mode = #tpu.pipeline_mode<synchronous>, transform_indices = @transform_6, window_bounds = array<i64: 1, 16>}, {pipeline_mode = #tpu.pipeline_mode<synchronous>, transform_indices = @transform_7, window_bounds = array<i64: 16, 3>}, {pipeline_mode = #tpu.pipeline_mode<synchronous>, transform_indices = @transform_8, window_bounds = array<i64: 3, 1>}, {transform_indices = @transform_9, window_bounds = array<i64: 1, 3, 128>}]} {
    %c0 = arith.constant 0 : index
    %c0_0 = arith.constant 0 : index
    %c0_1 = arith.constant 0 : index
    %0 = vector.load %arg2[%c0, %c0_0, %c0_1] : memref<1x16x128xbf16, #tpu.memory_space<vmem>>, vector<1x16x128xbf16>
    %1 = vector.shape_cast %0 : vector<1x16x128xbf16> to vector<16x128xbf16>
    %c0_2 = arith.constant 0 : index
    %c0_3 = arith.constant 0 : index
    %c0_4 = arith.constant 0 : index
    %2 = vector.load %arg3[%c0_2, %c0_3, %c0_4] : memref<1x128x4xf32, #tpu.memory_space<vmem>>, vector<1x128x4xf32>
    %3 = vector.shape_cast %2 : vector<1x128x4xf32> to vector<128x4xf32>
    %c0_5 = arith.constant 0 : index
    %c0_6 = arith.constant 0 : index
    %c0_7 = arith.constant 0 : index
    %4 = vector.load %arg4[%c0_5, %c0_6, %c0_7] : memref<1x128x4xf32, #tpu.memory_space<vmem>>, vector<1x128x4xf32>
    %5 = vector.shape_cast %4 : vector<1x128x4xf32> to vector<128x4xf32>
    %cst = arith.constant dense<0.000000e+00> : vector<128x128xf32>
    %6 = tpu.matmul %5, %3, %cst {dimension_numbers = #tpu.dot_dimension_numbers<[1], [1], [0], [0], [0, 0, 1, 0], [], []>} : vector<128x4xf32>, vector<128x4xf32>, vector<128x128xf32> -> vector<128x128xf32>
    %7 = arith.mulf %5, %5 : vector<128x4xf32>
    %cst_8 = arith.constant dense<0.000000e+00> : vector<128xf32>
    %8 = vector.multi_reduction <add>, %7, %cst_8 [1] : vector<128x4xf32> to vector<128xf32>
    %9 = vector.shape_cast %8 : vector<128xf32> to vector<128x1xf32>
    %cst_9 = arith.constant 1.000000e+00 : f32
    %10 = vector.broadcast %cst_9 : f32 to vector<128x1xf32>
    %11 = arith.subf %9, %10 : vector<128x1xf32>
    %12 = vector.broadcast %11 : vector<128x1xf32> to vector<128x128xf32>
    %13 = arith.addf %6, %12 : vector<128x128xf32>
    %cst_10 = arith.constant 0.000000e+00 : f32
    %14 = vector.broadcast %cst_10 : f32 to vector<128x128xf32>
    %15 = arith.maximumf %13, %14 : vector<128x128xf32>
    %16 = tpu.iota {dimensions = array<i32: 1>} : vector<128x128xi32>
    %17 = tpu.bitcast %15 : vector<128x128xf32> -> vector<128x128xi32>
    %c-128_i32 = arith.constant -128 : i32
    %18 = vector.broadcast %c-128_i32 : i32 to vector<128x128xi32>
    %19 = arith.andi %17, %18 : vector<128x128xi32>
    %20 = arith.ori %19, %16 : vector<128x128xi32>
    %false = arith.constant false
    %21 = vector.broadcast %false : i1 to vector<128x128xi1>
    %c2147483647_i32 = arith.constant 2147483647 : i32
    %22 = vector.broadcast %c2147483647_i32 : i32 to vector<128x128xi32>
    %23 = arith.select %21, %22, %20 : vector<128x128xi1>, vector<128x128xi32>
    %cst_11 = arith.constant dense<2147483647> : vector<128xi32>
    %24 = vector.multi_reduction <minsi>, %23, %cst_11 [1] : vector<128x128xi32> to vector<128xi32>
    %25 = vector.shape_cast %24 : vector<128xi32> to vector<128x1xi32>
    %26 = vector.broadcast %25 : vector<128x1xi32> to vector<128x128xi32>
    %27 = arith.cmpi eq, %23, %26 : vector<128x128xi32>
    %28 = arith.ori %21, %27 : vector<128x128xi1>
    %c2147483647_i32_12 = arith.constant 2147483647 : i32
    %29 = vector.broadcast %c2147483647_i32_12 : i32 to vector<128x128xi32>
    %30 = arith.select %28, %29, %20 : vector<128x128xi1>, vector<128x128xi32>
    %cst_13 = arith.constant dense<2147483647> : vector<128xi32>
    %31 = vector.multi_reduction <minsi>, %30, %cst_13 [1] : vector<128x128xi32> to vector<128xi32>
    %32 = vector.shape_cast %31 : vector<128xi32> to vector<128x1xi32>
    %33 = vector.broadcast %32 : vector<128x1xi32> to vector<128x128xi32>
    %34 = arith.cmpi eq, %30, %33 : vector<128x128xi32>
    %35 = arith.ori %28, %34 : vector<128x128xi1>
    %c2147483647_i32_14 = arith.constant 2147483647 : i32
    %36 = vector.broadcast %c2147483647_i32_14 : i32 to vector<128x128xi32>
    %37 = arith.select %35, %36, %20 : vector<128x128xi1>, vector<128x128xi32>
    %cst_15 = arith.constant dense<2147483647> : vector<128xi32>
    %38 = vector.multi_reduction <minsi>, %37, %cst_15 [1] : vector<128x128xi32> to vector<128xi32>
    %39 = vector.shape_cast %38 : vector<128xi32> to vector<128x1xi32>
    %40 = vector.broadcast %39 : vector<128x1xi32> to vector<128x128xi32>
    %41 = arith.cmpi eq, %37, %40 : vector<128x128xi32>
    %42 = arith.ori %35, %41 : vector<128x128xi1>
    %c2147483647_i32_16 = arith.constant 2147483647 : i32
    %43 = vector.broadcast %c2147483647_i32_16 : i32 to vector<128x128xi32>
    %44 = arith.select %42, %43, %20 : vector<128x128xi1>, vector<128x128xi32>
    %cst_17 = arith.constant dense<2147483647> : vector<128xi32>
    %45 = vector.multi_reduction <minsi>, %44, %cst_17 [1] : vector<128x128xi32> to vector<128xi32>
    %46 = vector.shape_cast %45 : vector<128xi32> to vector<128x1xi32>
    %47 = vector.broadcast %46 : vector<128x1xi32> to vector<128x128xi32>
    %48 = arith.cmpi eq, %44, %47 : vector<128x128xi32>
    %49 = arith.ori %42, %48 : vector<128x128xi1>
    %c2147483647_i32_18 = arith.constant 2147483647 : i32
    %50 = vector.broadcast %c2147483647_i32_18 : i32 to vector<128x128xi32>
    %51 = arith.select %49, %50, %20 : vector<128x128xi1>, vector<128x128xi32>
    %cst_19 = arith.constant dense<2147483647> : vector<128xi32>
    %52 = vector.multi_reduction <minsi>, %51, %cst_19 [1] : vector<128x128xi32> to vector<128xi32>
    %53 = vector.shape_cast %52 : vector<128xi32> to vector<128x1xi32>
    %54 = vector.broadcast %53 : vector<128x1xi32> to vector<128x128xi32>
    %55 = arith.cmpi eq, %51, %54 : vector<128x128xi32>
    %56 = arith.ori %49, %55 : vector<128x128xi1>
    %c2147483647_i32_20 = arith.constant 2147483647 : i32
    %57 = vector.broadcast %c2147483647_i32_20 : i32 to vector<128x128xi32>
    %58 = arith.select %56, %57, %20 : vector<128x128xi1>, vector<128x128xi32>
    %cst_21 = arith.constant dense<2147483647> : vector<128xi32>
    %59 = vector.multi_reduction <minsi>, %58, %cst_21 [1] : vector<128x128xi32> to vector<128xi32>
    %60 = vector.shape_cast %59 : vector<128xi32> to vector<128x1xi32>
    %61 = vector.broadcast %60 : vector<128x1xi32> to vector<128x128xi32>
    %62 = arith.cmpi eq, %58, %61 : vector<128x128xi32>
    %63 = arith.ori %56, %62 : vector<128x128xi1>
    %c2147483647_i32_22 = arith.constant 2147483647 : i32
    %64 = vector.broadcast %c2147483647_i32_22 : i32 to vector<128x128xi32>
    %65 = arith.select %63, %64, %20 : vector<128x128xi1>, vector<128x128xi32>
    %cst_23 = arith.constant dense<2147483647> : vector<128xi32>
    %66 = vector.multi_reduction <minsi>, %65, %cst_23 [1] : vector<128x128xi32> to vector<128xi32>
    %67 = vector.shape_cast %66 : vector<128xi32> to vector<128x1xi32>
    %68 = vector.broadcast %67 : vector<128x1xi32> to vector<128x128xi32>
    %69 = arith.cmpi eq, %65, %68 : vector<128x128xi32>
    %70 = arith.ori %63, %69 : vector<128x128xi1>
    %c2147483647_i32_24 = arith.constant 2147483647 : i32
    %71 = vector.broadcast %c2147483647_i32_24 : i32 to vector<128x128xi32>
    %72 = arith.select %70, %71, %20 : vector<128x128xi1>, vector<128x128xi32>
    %cst_25 = arith.constant dense<2147483647> : vector<128xi32>
    %73 = vector.multi_reduction <minsi>, %72, %cst_25 [1] : vector<128x128xi32> to vector<128xi32>
    %74 = vector.shape_cast %73 : vector<128xi32> to vector<128x1xi32>
    %75 = vector.broadcast %74 : vector<128x1xi32> to vector<128x128xi32>
    %76 = arith.cmpi eq, %72, %75 : vector<128x128xi32>
    %77 = arith.ori %70, %76 : vector<128x128xi1>
    %cst_26 = arith.constant 9.99999993E-9 : f32
    %78 = vector.broadcast %cst_26 : f32 to vector<128x128xf32>
    %79 = arith.addf %15, %78 : vector<128x128xf32>
    %80 = tpu.reciprocal %79 {approx = true} : vector<128x128xf32> -> vector<128x128xf32>
    %cst_27 = arith.constant 0.000000e+00 : f32
    %81 = vector.broadcast %cst_27 : f32 to vector<128x128xf32>
    %82 = arith.select %77, %80, %81 : vector<128x128xi1>, vector<128x128xf32>
    %cst_28 = arith.constant dense<0.000000e+00> : vector<128xf32>
    %83 = vector.multi_reduction <add>, %82, %cst_28 [1] : vector<128x128xf32> to vector<128xf32>
    %84 = vector.shape_cast %83 : vector<128xf32> to vector<128x1xf32>
    %85 = tpu.reciprocal %84 : vector<128x1xf32> -> vector<128x1xf32>
    %86 = vector.broadcast %85 : vector<128x1xf32> to vector<128x128xf32>
    %87 = arith.mulf %82, %86 : vector<128x128xf32>
    %88 = arith.truncf %87 : vector<128x128xf32> to vector<128x128xbf16>
    %cst_29 = arith.constant dense<0.000000e+00> : vector<128x16xf32>
    %89 = tpu.matmul %88, %1, %cst_29 {dimension_numbers = #tpu.dot_dimension_numbers<[1], [1], [0], [0], [0, 0, 1, 0], [], []>} : vector<128x128xbf16>, vector<16x128xbf16>, vector<128x16xf32> -> vector<128x16xf32>
    %c0_30 = arith.constant 0 : index
    %c0_31 = arith.constant 0 : index
    %90 = vector.load %arg5[%c0_30, %c0_31] : memref<16x32xf32, #tpu.memory_space<vmem>>, vector<16x32xf32>
    %cst_32 = arith.constant dense<0.000000e+00> : vector<128x32xf32>
    %91 = tpu.matmul %89, %90, %cst_32 {dimension_numbers = #tpu.dot_dimension_numbers<[1], [0], [0], [1], [0, 0, 1, 1], [], []>} : vector<128x16xf32>, vector<16x32xf32>, vector<128x32xf32> -> vector<128x32xf32>
    %c0_33 = arith.constant 0 : index
    %c0_34 = arith.constant 0 : index
    %92 = vector.load %arg6[%c0_33, %c0_34] : memref<1x32xf32, #tpu.memory_space<vmem>>, vector<1x32xf32>
    %93 = vector.broadcast %92 : vector<1x32xf32> to vector<128x32xf32>
    %94 = arith.addf %91, %93 : vector<128x32xf32>
    %cst_35 = arith.constant 0.000000e+00 : f32
    %95 = vector.broadcast %cst_35 : f32 to vector<128x32xf32>
    %96 = arith.maximumf %94, %95 : vector<128x32xf32>
    %c0_36 = arith.constant 0 : index
    %c0_37 = arith.constant 0 : index
    %97 = vector.load %arg7[%c0_36, %c0_37] : memref<32x16xf32, #tpu.memory_space<vmem>>, vector<32x16xf32>
    %cst_38 = arith.constant dense<0.000000e+00> : vector<128x16xf32>
    %98 = tpu.matmul %96, %97, %cst_38 {dimension_numbers = #tpu.dot_dimension_numbers<[1], [0], [0], [1], [0, 0, 1, 1], [], []>} : vector<128x32xf32>, vector<32x16xf32>, vector<128x16xf32> -> vector<128x16xf32>
    %c0_39 = arith.constant 0 : index
    %c0_40 = arith.constant 0 : index
    %99 = vector.load %arg8[%c0_39, %c0_40] : memref<1x16xf32, #tpu.memory_space<vmem>>, vector<1x16xf32>
    %100 = vector.broadcast %99 : vector<1x16xf32> to vector<128x16xf32>
    %101 = arith.addf %98, %100 : vector<128x16xf32>
    %cst_41 = arith.constant 0.000000e+00 : f32
    %102 = vector.broadcast %cst_41 : f32 to vector<128x16xf32>
    %103 = arith.maximumf %101, %102 : vector<128x16xf32>
    %c0_42 = arith.constant 0 : index
    %c0_43 = arith.constant 0 : index
    %104 = vector.load %arg9[%c0_42, %c0_43] : memref<16x3xf32, #tpu.memory_space<vmem>>, vector<16x3xf32>
    %cst_44 = arith.constant dense<0.000000e+00> : vector<3x128xf32>
    %105 = tpu.matmul %104, %103, %cst_44 {dimension_numbers = #tpu.dot_dimension_numbers<[0], [1], [1], [0], [0, 1, 1, 0], [], []>} : vector<16x3xf32>, vector<128x16xf32>, vector<3x128xf32> -> vector<3x128xf32>
    %c0_45 = arith.constant 0 : index
    %c0_46 = arith.constant 0 : index
    %106 = vector.load %arg10[%c0_45, %c0_46] : memref<3x1xf32, #tpu.memory_space<vmem>>, vector<3x1xf32>
    %107 = vector.broadcast %106 : vector<3x1xf32> to vector<3x128xf32>
    %108 = arith.addf %105, %107 : vector<3x128xf32>
    %109 = math.tanh %108 : vector<3x128xf32>
    %c0_47 = arith.constant 0 : index
    %c0_48 = arith.constant 0 : index
    %c0_49 = arith.constant 0 : index
    %110 = vector.load %arg11[%c0_47, %c0_48, %c0_49] : memref<1x3x128xf32, #tpu.memory_space<vmem>>, vector<1x3x128xf32>
    %111 = vector.shape_cast %110 : vector<1x3x128xf32> to vector<3x128xf32>
    %112 = vector.shape_cast %109 : vector<3x128xf32> to vector<1x3x128xf32>
    tpu.vector_store %arg11[%c0_47, %c0_48, %c0_49], %112 {strides = array<i32>} : memref<1x3x128xf32, #tpu.memory_space<vmem>>, vector<1x3x128xf32>,
    return
  }
  func.func @transform_0(%arg0: i32, %arg1: i32) -> (i32, i32, i32) {
    %c0_i32 = arith.constant 0 : i32
    %c0_i32_0 = arith.constant 0 : i32
    %c0_i32_1 = arith.constant 0 : i32
    return %arg0, %c0_i32, %c0_i32_0 : i32, i32, i32
  }
  func.func @transform_1(%arg0: i32, %arg1: i32) -> (i32, i32, i32) {
    %c0_i32 = arith.constant 0 : i32
    %c0_i32_0 = arith.constant 0 : i32
    %c0_i32_1 = arith.constant 0 : i32
    return %arg0, %c0_i32, %c0_i32_0 : i32, i32, i32
  }
  func.func @transform_2(%arg0: i32, %arg1: i32) -> (i32, i32, i32) {
    %c0_i32 = arith.constant 0 : i32
    %c0_i32_0 = arith.constant 0 : i32
    return %arg0, %arg1, %c0_i32 : i32, i32, i32
  }
  func.func @transform_3(%arg0: i32, %arg1: i32) -> (i32, i32) {
    %c0_i32 = arith.constant 0 : i32
    %c0_i32_0 = arith.constant 0 : i32
    %c0_i32_1 = arith.constant 0 : i32
    return %c0_i32, %c0_i32_0 : i32, i32
  }
  func.func @transform_4(%arg0: i32, %arg1: i32) -> (i32, i32) {
    %c0_i32 = arith.constant 0 : i32
    %c0_i32_0 = arith.constant 0 : i32
    %c0_i32_1 = arith.constant 0 : i32
    return %c0_i32, %c0_i32_0 : i32, i32
  }
  func.func @transform_5(%arg0: i32, %arg1: i32) -> (i32, i32) {
    %c0_i32 = arith.constant 0 : i32
    %c0_i32_0 = arith.constant 0 : i32
    %c0_i32_1 = arith.constant 0 : i32
    return %c0_i32, %c0_i32_0 : i32, i32
  }
  func.func @transform_6(%arg0: i32, %arg1: i32) -> (i32, i32) {
    %c0_i32 = arith.constant 0 : i32
    %c0_i32_0 = arith.constant 0 : i32
    %c0_i32_1 = arith.constant 0 : i32
    return %c0_i32, %c0_i32_0 : i32, i32
  }
  func.func @transform_7(%arg0: i32, %arg1: i32) -> (i32, i32) {
    %c0_i32 = arith.constant 0 : i32
    %c0_i32_0 = arith.constant 0 : i32
    %c0_i32_1 = arith.constant 0 : i32
    return %c0_i32, %c0_i32_0 : i32, i32
  }
  func.func @transform_8(%arg0: i32, %arg1: i32) -> (i32, i32) {
    %c0_i32 = arith.constant 0 : i32
    %c0_i32_0 = arith.constant 0 : i32
    %c0_i32_1 = arith.constant 0 : i32
    return %c0_i32, %c0_i32_0 : i32, i32
  }
  func.func @transform_9(%arg0: i32, %arg1: i32) -> (i32, i32, i32) {
    %c0_i32 = arith.constant 0 : i32
    %c0_i32_0 = arith.constant 0 : i32
    return %arg0, %c0_i32, %arg1 : i32, i32, i32
  }
}

</mosaic_0001>

<bundles_post_ra>
// kernel: tpu_custom_call.1
= control target key start
LH: loop header
LB: loop body
LE: loop exit
PB: predicated region body
PF: predicated region fallthrough
CT: control target
= control target key end

     0   :  { %s4550_s30 = smov 0   ;;  %s4552_s10 = smov 0   ;;  %s7723_s0 = inlined_call_operand.vmem [shape: bf16[2,16,128], index: 0, kind: input, shape index: {}]   ;;  %s7724_s1 = inlined_call_operand.vmem [shape: f32[2,128,4], index: 1, kind: input, shape index: {}]   ;;  %s7725_s2 = inlined_call_operand.vmem [shape: f32[2,128,4], index: 2, kind: input, shape index: {}]   ;;  %s7726_s3 = inlined_call_operand.vmem [shape: f32[16,32], index: 3, kind: input, shape index: {}]   ;;  %s7727_s4 = inlined_call_operand.vmem [shape: f32[1,32], index: 4, kind: input, shape index: {}]   ;;  %s7728_s5 = inlined_call_operand.vmem [shape: f32[32,16], index: 5, kind: input, shape index: {}]   ;;  %s7729_s6 = inlined_call_operand.vmem [shape: f32[1,16], index: 6, kind: input, shape index: {}]   ;;  %s7730_s7 = inlined_call_operand.vmem [shape: f32[16,3], index: 7, kind: input, shape index: {}]   ;;  %s7731_s8 = inlined_call_operand.vmem [shape: f32[3,1], index: 8, kind: input, shape index: {}]   ;;  %s7732_s9 = inlined_call_operand.vmem [shape: f32[2,3,128], index: 9, kind: output, shape index: {}]  }
   0x1   :  { %s4554_s11 = smov 0  }
   0x2 LB: > { %s31_s12 = sadd.s32 1, %s4490_s10  ;;  %p3905_p0 = scmp.ge.s32.totalorder %s4494_s11, 1  ;;  %s4494_s11 = sphi %s4554_s11, %s19_s11   ;;  %s4490_s10 = sphi %s4552_s10, %s8315_s10   ;;  %s4486_s30 = sphi %s4550_s30, %s8314_s30  }
   0x3   : > { %p33_p1 = scmp.ge.s32.totalorder %s31_s12, 2  ;;  %p328_p2 = scmp.lt.s32.totalorder %s4494_s11, 3 }
   0x5   : > { %s8317_s12 = smov (%p33_p1, %s31_s12), 0  ;;  %p329_p3 = pnand %p3905_p0, %p328_p2 }
   0x7   : > { %332 = sbr.rel (%p329_p3) target bundleno = 3785 (0xec9), region = 56 }
   0xe   : > { %p380_p4 = scmp.lt.s32.totalorder %s4486_s30, 1  ;;  %vm458_vm0 = vcmask 31744  }
   0xf   : > { %vm4578_vm1 = vmpackc.low %vm458_vm0, %vm458_vm0 }
  0x10   : > { %s8319_s30 = smov (!%p380_p4, %s4486_s30), 1 }
  0x11   : > { %s4016_s13 = sshll.u32 %s8319_s30, 7  ;;  %s4015_s20 = sshll.u32 %s8319_s30, 3 }
  0x12   : > { %s4574_s16 = scalar_lea.vmem %s7724_s1, %s4016_s13  ;;  %s4589_s19 = scalar_lea.vmem %s7725_s2, %s4016_s13 }
  0x13   : > { %v410_v1 = vld [vmem:[%s4574_s16] sm:$0xff]  ;;  %v411_v2 = vld [vmem:[%s4574_s16 + $0x8] sm:$0xff]  ;;  %v412_v3 = vld [vmem:[%s4574_s16 + $0x10] sm:$0xff]  ;;  %s384_s23 = scalar_lea.vmem %s7723_s0, %s4015_s20  ;;  %s3912_s29 = sshll.u32 %s8319_s30, 2 }
  0x14   : > { %v4283_v4 = vpack.c.bf16 %v411_v2, %v410_v1  ;;  %v413_v5 = vld [vmem:[%s4574_s16 + $0x18] sm:$0xff]  ;;  %v414_v7 = vld [vmem:[%s4574_s16 + $0x20] sm:$0xff]  ;;  %v4600_v9 = vld [vmem:[%s4589_s19 + $0x8] sm:$0xff]  ;;  %s406_s15 = scalar_lea.vmem %s7732_s9, %s3912_s29 }
  0x15   : > { %v4289_v6 = vpack.c.bf16 %v413_v5, %v412_v3  ;;  %v426_v8 = vld [vmem:[%s4589_s19] sm:$0xff]  ;;  %v415_v10 = vld [vmem:[%s4574_s16 + $0x28] sm:$0xff]  ;;  %v4605_v12 = vld [vmem:[%s4589_s19 + $0x10] sm:$0xff]  ;;  %v443_v14 = vmul.f32 %v4600_v9, %v4600_v9 }
  0x16   : > { %4285 = vmatprep.subr.msk.bf16.mxu0 %vm4578_vm1, %v4283_v4  ;;  %v442_v11 = vmul.f32 %v426_v8, %v426_v8  ;;  %4146 = vmatprep.mubr.msk.f32.mxu0 %vm458_vm0, %v426_v8  ;;  %v4608_v13 = vld [vmem:[%s4589_s19 + $0x18] sm:$0xff]  ;;  %v444_v15 = vmul.f32 %v4605_v12, %v4605_v12  ;;  %v4295_v18 = vpack.c.bf16 %v415_v10, %v414_v7  ;;  %v4618_v19 = vld [vmem:[%s4589_s19 + $0x20] sm:$0xff]  ;;  %v4622_v21 = vld [vmem:[%s4589_s19 + $0x28] sm:$0xff] }
  0x17   : > { %4288 = vmatpush3.bf16.xpose.msk.msra.mxu0 %vm4578_vm1, %v4283_v4  ;;  %v445_v16 = vmul.f32 %v4608_v13, %v4608_v13  ;;  %v462_v22 = vsel %vm458_vm0, %v443_v14, 0.0  ;;  %v446_v23 = vmul.f32 %v4618_v19, %v4618_v19  ;;  %v447_v25 = vmul.f32 %v4622_v21, %v4622_v21  ;;  %v4635_v26 = vld [vmem:[%s4589_s19 + $0x30] sm:$0xff]  ;;  %v417_v28 = vld [vmem:[%s4574_s16 + $0x38] sm:$0xff]  ;;  %v4649_v35 = vld [vmem:[%s4589_s19 + $0x40] sm:$0xff] }
  0x18   : > { %4291 = vmatprep.subr.msk.bf16.mxu0 %vm4578_vm1, %v4289_v6  ;;  %v459_v17 = vsel %vm458_vm0, %v442_v11, 0.0  ;;  %v465_v20 = vsel %vm458_vm0, %v444_v15, 0.0  ;;  %v416_v27 = vld [vmem:[%s4574_s16 + $0x30] sm:$0xff]  ;;  %v4640_v29 = vld [vmem:[%s4589_s19 + $0x38] sm:$0xff]  ;;  %v448_v31 = vmul.f32 %v4635_v26, %v4635_v26  ;;  %v4652_v36 = vld [vmem:[%s4589_s19 + $0x48] sm:$0xff]  ;;  %v450_v38 = vmul.f32 %v4649_v35, %v4649_v35 }
  0x19   : > { %460 = vadd.xlane.f32.xlu0 %v459_v17  ;;  %466 = vadd.xlane.f32.xlu1 %v465_v20  ;;  %v468_v24 = vsel %vm458_vm0, %v445_v16, 0.0  ;;  %v471_v30 = vsel %vm458_vm0, %v446_v23, 0.0  ;;  %v474_v32 = vsel %vm458_vm0, %v447_v25, 0.0  ;;  %v449_v33 = vmul.f32 %v4640_v29, %v4640_v29  ;;  %v436_v41 = vld [vmem:[%s4589_s19 + $0x50] sm:$0xff]  ;;  %v418_v42 = vld [vmem:[%s4574_s16 + $0x40] sm:$0xff]  ;;  %v419_v43 = vld [vmem:[%s4574_s16 + $0x48] sm:$0xff] }
  0x1a   : > { %v4301_v34 = vpack.c.bf16 %v417_v28, %v416_v27  ;;  %v477_v37 = vsel %vm458_vm0, %v448_v31, 0.0  ;;  %v451_v40 = vmul.f32 %v4652_v36, %v4652_v36  ;;  %v437_v44 = vld [vmem:[%s4589_s19 + $0x58] sm:$0xff]  ;;  %v483_v45 = vsel %vm458_vm0, %v450_v38, 0.0  ;;  %v438_v50 = vld [vmem:[%s4589_s19 + $0x60] sm:$0xff]  ;;  %v439_v51 = vld [vmem:[%s4589_s19 + $0x68] sm:$0xff] }
  0x1b   : > { %v480_v39 = vsel %vm458_vm0, %v449_v33, 0.0  ;;  %v452_v46 = vmul.f32 %v436_v41, %v436_v41  ;;  %v453_v48 = vmul.f32 %v437_v44, %v437_v44  ;;  %v4307_v49 = vpack.c.bf16 %v419_v43, %v418_v42  ;;  %v440_v56 = vld [vmem:[%s4589_s19 + $0x70] sm:$0xff]  ;;  %v421_v58 = vld [vmem:[%s4574_s16 + $0x58] sm:$0xff]  ;;  %v422_v4 = vld [vmem:[%s4574_s16 + $0x60] sm:$0xff] }
  0x1c   : > { %v486_v47 = vsel %vm458_vm0, %v451_v40, 0.0  ;;  %v454_v53 = vmul.f32 %v438_v50, %v438_v50  ;;  %v455_v55 = vmul.f32 %v439_v51, %v439_v51  ;;  %v420_v57 = vld [vmem:[%s4574_s16 + $0x50] sm:$0xff]  ;;  %v441_v59 = vld [vmem:[%s4589_s19 + $0x78] sm:$0xff]  ;;  %v456_v61 = vmul.f32 %v440_v56, %v440_v56  ;;  %v423_v5 = vld [vmem:[%s4574_s16 + $0x68] sm:$0xff] }
  0x1d   : > { %463 = vadd.xlane.f32.xlu0 %v462_v22  ;;  %469 = vadd.xlane.f32.xlu1 %v468_v24  ;;  %v489_v52 = vsel %vm458_vm0, %v452_v46, 0.0  ;;  %v492_v54 = vsel %vm458_vm0, %v453_v48, 0.0  ;;  %v457_v63 = vmul.f32 %v441_v59, %v441_v59  ;;  %v4313_v1 = vpack.c.bf16 %v421_v58, %v420_v57  ;;  %v424_v7 = vld [vmem:[%s4574_s16 + $0x70] sm:$0xff]  ;;  %v425_v8 = vld [vmem:[%s4574_s16 + $0x78] sm:$0xff] }
  0x1e   : > { %v495_v60 = vsel %vm458_vm0, %v454_v53, 0.0  ;;  %v498_v62 = vsel %vm458_vm0, %v455_v55, 0.0  ;;  %v501_v2 = vsel %vm458_vm0, %v456_v61, 0.0  ;;  %v4325_v10 = vpack.c.bf16 %v425_v8, %v424_v7 }
  0x1f   : > { %4294 = vmatpush3.bf16.xpose.msk.msra.mxu0 %vm4578_vm1, %v4289_v6  ;;  %v504_v3 = vsel %vm458_vm0, %v457_v63, 0.0  ;;  %v4319_v6 = vpack.c.bf16 %v423_v5, %v422_v4  ;;  %v780_v17 = vlaneseq }
  0x20   : > { %4297 = vmatprep.subr.msk.bf16.mxu0 %vm4578_vm1, %v4295_v18 }
  0x21   : > { %472 = vadd.xlane.f32.xlu0 %v471_v30  ;;  %475 = vadd.xlane.f32.xlu1 %v474_v32 }
  0x25   : > { %478 = vadd.xlane.f32.xlu0 %v477_v37  ;;  %481 = vadd.xlane.f32.xlu1 %v480_v39 }
  0x27   : > { %4300 = vmatpush3.bf16.xpose.msk.msra.mxu0 %vm4578_vm1, %v4295_v18 }
  0x28   : > { %4303 = vmatprep.subr.msk.bf16.mxu0 %vm4578_vm1, %v4301_v34 }
  0x29   : > { %484 = vadd.xlane.f32.xlu0 %v483_v45  ;;  %487 = vadd.xlane.f32.xlu1 %v486_v47 }
  0x2d   : > { %490 = vadd.xlane.f32.xlu0 %v489_v52  ;;  %493 = vadd.xlane.f32.xlu1 %v492_v54 }
  0x2f   : > { %4306 = vmatpush3.bf16.xpose.msk.msra.mxu0 %vm4578_vm1, %v4301_v34 }
  0x30   : > { %4309 = vmatprep.subr.msk.bf16.mxu0 %vm4578_vm1, %v4307_v49 }
  0x31   : > { %496 = vadd.xlane.f32.xlu0 %v495_v60  ;;  %499 = vadd.xlane.f32.xlu1 %v498_v62 }
  0x35   : > { %502 = vadd.xlane.f32.xlu0 %v501_v2  ;;  %505 = vadd.xlane.f32.xlu1 %v504_v3 }
  0x37   : > { %4312 = vmatpush3.bf16.xpose.msk.msra.mxu0 %vm4578_vm1, %v4307_v49 }
  0x38   : > { %4315 = vmatprep.subr.msk.bf16.mxu0 %vm4578_vm1, %v4313_v1 }
  0x3f   : > { %4318 = vmatpush3.bf16.xpose.msk.msra.mxu0 %vm4578_vm1, %v4313_v1 }
  0x40   : > { %4321 = vmatprep.subr.msk.bf16.mxu0 %vm4578_vm1, %v4319_v6 }
  0x47   : > { %4324 = vmatpush3.bf16.xpose.msk.msra.mxu0 %vm4578_vm1, %v4319_v6 }
  0x48   : > { %4327 = vmatprep.subr.msk.bf16.mxu0 %vm4578_vm1, %v4325_v10 }
  0x4f   : > { %4330 = vmatpush3.bf16.xpose.msk.msra.mxu0 %vm4578_vm1, %v4325_v10 }
  0x56   : > { %4147 = vmatmul.mubr.msk.f32.vlgmr.msra.gmra.mrb[0].mxu0 %vm458_vm0, %v4600_v9 }
  0x57   : > { %4149 = vmatprep.mubr.msk.f32.mxu0 %vm458_vm0, %v4605_v12 }
  0x5a   : > { %4150 = vmatmul.mubr.msk.f32.gmra.mrb[2].mxu0 %vm458_vm0, %v4608_v13 }
  0x5b   : > { %4152 = vmatprep.mubr.msk.f32.mxu0 %vm458_vm0, %v4618_v19 }
  0x5e   : > { %4153 = vmatmul.mubr.msk.f32.gmra.mrb[4].mxu0 %vm458_vm0, %v4622_v21 }
  0x5f   : > { %4155 = vmatprep.mubr.msk.f32.mxu0 %vm458_vm0, %v4635_v26  ;;  %v4733_v26 = vand.u32 127, %v780_v17 }
  0x62   : > { %4156 = vmatmul.mubr.msk.f32.gmra.mrb[6].mxu0 %vm458_vm0, %v4640_v29 }
  0x63   : > { %4158 = vmatprep.mubr.msk.f32.mxu0 %vm458_vm0, %v4649_v35 }
  0x66   : > { %4159 = vmatmul.mubr.msk.f32.gmra.mrb[8].mxu0 %vm458_vm0, %v4652_v36 }
  0x67   : > { %4161 = vmatprep.mubr.msk.f32.mxu0 %vm458_vm0, %v436_v41 }
  0x6a   : > { %4162 = vmatmul.mubr.msk.f32.gmra.mrb[10].mxu0 %vm458_vm0, %v437_v44 }
  0x6b   : > { %4164 = vmatprep.mubr.msk.f32.mxu0 %vm458_vm0, %v438_v50 }
  0x6e   : > { %4165 = vmatmul.mubr.msk.f32.gmra.mrb[12].mxu0 %vm458_vm0, %v439_v51 }
  0x6f   : > { %4167 = vmatprep.mubr.msk.f32.mxu0 %vm458_vm0, %v440_v56 }
  0x72   : > { %4168 = vmatmul.mubr.msk.f32.gmra.mrb[14].mxu0 %vm458_vm0, %v441_v59 }
  0xa6   : > { %v467_v0 = vpop.xlane.xlu1 %466  ;;  %v461_v9 = vpop.xlane.xlu0 %460 }
  0xa7   : > { %v3913_v19 = vadd.f32 -1.0, %v461_v9  ;;  %v3915_v27 = vadd.f32 -1.0, %v467_v0 }
  0xaa   : > { %v470_v11 = vpop.xlane.xlu1 %469  ;;  %v464_v12 = vpop.xlane.xlu0 %463 }
  0xab   : > { %v3914_v15 = vadd.f32 -1.0, %v464_v12  ;;  %v3916_v23 = vadd.f32 -1.0, %v470_v11 }
  0xae   : > { %v476_v13 = vpop.xlane.xlu1 %475  ;;  %v473_v14 = vpop.xlane.xlu0 %472 }
  0xaf   : > { %v3918_v34 = vadd.f32 -1.0, %v476_v13  ;;  %v3917_v38 = vadd.f32 -1.0, %v473_v14 }
  0xb2   : > { %v482_v16 = vpop.xlane.xlu1 %481  ;;  %v479_v18 = vpop.xlane.xlu0 %478 }
  0xb3   : > { %v3920_v47 = vadd.f32 -1.0, %v482_v16  ;;  %v3919_v51 = vadd.f32 -1.0, %v479_v18 }
  0xb6   : > { %v488_v30 = vpop.xlane.xlu1 %487  ;;  %v485_v35 = vpop.xlane.xlu0 %484 }
  0xb7   : > { %v3922_v2 = vadd.f32 -1.0, %v488_v30  ;;  %v3921_v6 = vadd.f32 -1.0, %v485_v35 }
  0xba   : > { %v494_v53 = vpop.xlane.xlu1 %493  ;;  %v491_v57 = vpop.xlane.xlu0 %490 }
  0xbb   : > { %v3924_v18 = vadd.f32 -1.0, %v494_v53 }
  0xbe   : > { %v500_v14 = vpop.xlane.xlu1 %499 }
  0xc2   : > { %v506_v53 = vpop.xlane.xlu1 %505 }
 0x129   : > { %v4148_v20 = vpop.f32.mrb[0].mxu0 }
 0x12a   : > { %v4728_v21 = vadd.f32 %v4148_v20, %v3914_v15  ;;  %v685_v22 = vpop.f32.mrb[1].mxu0  ;;  %v497_v20 = vpop.xlane.xlu0 %496 }
 0x12b   : > { %v4730_v24 = vadd.f32 %v3913_v19, %v685_v22 }
 0x12c   : > { %7876 = vst [vmem:[#allocation2_spill] sm:$0xff] %v4728_v21  ;;  %v7748_v25 = vmax.f32 %v4728_v21, 0.0 }
 0x12d   : > { %7877 = vst [vmem:[#allocation3_spill] sm:$0xff] %v4730_v24  ;;  %v7747_v28 = vmax.f32 %v4730_v24, 0.0  ;;  %v4151_v29 = vpop.f32.mrb[2].mxu0 }
 0x12e   : > { %v799_v31 = vand.u32 4294967168, %v7748_v25  ;;  %v4738_v32 = vadd.f32 %v4151_v29, %v3916_v23  ;;  %v695_v33 = vpop.f32.mrb[3].mxu0 }
 0x12f   : > { %v798_v36 = vand.u32 4294967168, %v7747_v28  ;;  %v4742_v37 = vadd.f32 %v3915_v27, %v695_v33  ;;  %v3923_v27 = vadd.f32 -1.0, %v491_v57 }
 0x130   : > { %7878 = vst [vmem:[#allocation4_spill] sm:$0xff] %v4738_v32  ;;  %v4745_v39 = vor.u32 %v799_v31, %v4733_v26  ;;  %v7746_v40 = vmax.f32 %v4738_v32, 0.0 }
 0x131   : > { %7879 = vst [vmem:[#allocation5_spill] sm:$0xff] %v4742_v37  ;;  %v4749_v41 = vor.u32 %v798_v36, %v4733_v26  ;;  %v7745_v42 = vmax.f32 %v4742_v37, 0.0  ;;  %v4154_v43 = vpop.f32.mrb[4].mxu0 }
 0x132   : > { %v801_v44 = vand.u32 4294967168, %v7746_v40  ;;  %v4754_v45 = vadd.f32 %v4154_v43, %v3918_v34  ;;  %v705_v46 = vpop.f32.mrb[5].mxu0  ;;  %v845_v48 = vshra.s32 %v4745_v39, 16 }
 0x133   : > { %v800_v49 = vand.u32 4294967168, %v7745_v42  ;;  %v4759_v50 = vadd.f32 %v3917_v38, %v705_v46  ;;  %v831_v52 = vshra.s32 %v4749_v41, 16 }
 0x134   : > { %7880 = vst [vmem:[#allocation6_spill] sm:$0xff] %v4754_v45  ;;  %v4763_v54 = vor.u32 %v801_v44, %v4733_v26  ;;  %v7744_v55 = vmax.f32 %v4754_v45, 0.0  ;;  %v4766_v56 = vcvt.s32.f32 %v845_v48 }
 0x135   : > { %7881 = vst [vmem:[#allocation7_spill] sm:$0xff] %v4759_v50  ;;  %v4769_v58 = vor.u32 %v800_v49, %v4733_v26  ;;  %v7743_v59 = vmax.f32 %v4759_v50, 0.0  ;;  %v4157_v60 = vpop.f32.mrb[6].mxu0  ;;  %v4772_v61 = vcvt.s32.f32 %v831_v52  ;;  %v3925_v52 = vadd.f32 -1.0, %v497_v20 }
 0x136   : > { %v803_v62 = vand.u32 4294967168, %v7744_v55  ;;  %v4776_v63 = vadd.f32 %v4157_v60, %v3920_v47  ;;  %848 = vmin.xlane.f32.xlu1 %v4766_v56  ;;  %v715_v1 = vpop.f32.mrb[7].mxu0  ;;  %v873_v3 = vshra.s32 %v4763_v54, 16  ;;  %v3926_v47 = vadd.f32 -1.0, %v500_v14 }
 0x137   : > { %v802_v4 = vand.u32 4294967168, %v7743_v59  ;;  %v4782_v5 = vadd.f32 %v3919_v51, %v715_v1  ;;  %834 = vmin.xlane.f32.xlu0 %v4772_v61  ;;  %v859_v7 = vshra.s32 %v4769_v58, 16 }
 0x138   : > { %7882 = vst [vmem:[#allocation8_spill] sm:$0xff] %v4776_v63  ;;  %v4787_v8 = vor.u32 %v803_v62, %v4733_v26  ;;  %v7742_v10 = vmax.f32 %v4776_v63, 0.0  ;;  %v4790_v0 = vcvt.s32.f32 %v873_v3 }
 0x139   : > { %7883 = vst [vmem:[#allocation9_spill] sm:$0xff] %v4782_v5  ;;  %v4793_v9 = vor.u32 %v802_v4, %v4733_v26  ;;  %v7741_v11 = vmax.f32 %v4782_v5, 0.0  ;;  %v4160_v12 = vpop.f32.mrb[8].mxu0  ;;  %v4796_v13 = vcvt.s32.f32 %v859_v7 }
 0x13a   : > { %v805_v15 = vand.u32 4294967168, %v7742_v10  ;;  %v4800_v16 = vadd.f32 %v4160_v12, %v3922_v2  ;;  %876 = vmin.xlane.f32.xlu1 %v4790_v0  ;;  %v725_v17 = vpop.f32.mrb[9].mxu0  ;;  %v901_v19 = vshra.s32 %v4787_v8, 16  ;;  %v503_v2 = vpop.xlane.xlu0 %502  ;;  %v900_v55 = vand.u32 65535, %v4787_v8 }
 0x13b   : > { %v804_v22 = vand.u32 4294967168, %v7741_v11  ;;  %v4806_v23 = vadd.f32 %v3921_v6, %v725_v17  ;;  %862 = vmin.xlane.f32.xlu0 %v4796_v13  ;;  %v887_v29 = vshra.s32 %v4793_v9, 16  ;;  %v3928_v17 = vadd.f32 -1.0, %v506_v53 }
 0x13c   : > { %7884 = vst [vmem:[#allocation10_spill] sm:$0xff] %v4800_v16  ;;  %v4811_v30 = vor.u32 %v805_v15, %v4733_v26  ;;  %v7740_v31 = vmax.f32 %v4800_v16, 0.0  ;;  %v4814_v33 = vcvt.s32.f32 %v901_v19 }
 0x13d   : > { %7885 = vst [vmem:[#allocation11_spill] sm:$0xff] %v4806_v23  ;;  %v4817_v34 = vor.u32 %v804_v22, %v4733_v26  ;;  %v7739_v35 = vmax.f32 %v4806_v23, 0.0  ;;  %v4163_v36 = vpop.f32.mrb[10].mxu0  ;;  %v4820_v38 = vcvt.s32.f32 %v887_v29  ;;  %v3927_v22 = vadd.f32 -1.0, %v503_v2 }
 0x13e   : > { %v807_v43 = vand.u32 4294967168, %v7740_v31  ;;  %v4824_v44 = vadd.f32 %v4163_v36, %v3924_v18  ;;  %904 = vmin.xlane.f32.xlu1 %v4814_v33  ;;  %v735_v46 = vpop.f32.mrb[11].mxu0  ;;  %v929_v48 = vshra.s32 %v4811_v30, 16 }
 0x13f   : > { %v806_v49 = vand.u32 4294967168, %v7739_v35  ;;  %v4830_v51 = vadd.f32 %v3923_v27, %v735_v46  ;;  %890 = vmin.xlane.f32.xlu0 %v4820_v38  ;;  %v915_v57 = vshra.s32 %v4817_v34, 16 }
 0x140   : > { %7886 = vst [vmem:[#allocation12_spill] sm:$0xff] %v4824_v44  ;;  %v4835_v60 = vor.u32 %v807_v43, %v4733_v26  ;;  %v7738_v62 = vmax.f32 %v4824_v44, 0.0  ;;  %v4838_v1 = vcvt.s32.f32 %v929_v48 }
 0x141   : > { %7887 = vst [vmem:[#allocation13_spill] sm:$0xff] %v4830_v51  ;;  %v4841_v3 = vor.u32 %v806_v49, %v4733_v26  ;;  %v7736_v4 = vmax.f32 %v4830_v51, 0.0  ;;  %v4166_v6 = vpop.f32.mrb[12].mxu0  ;;  %v4844_v7 = vcvt.s32.f32 %v915_v57 }
 0x142   : > { %v809_v12 = vand.u32 4294967168, %v7738_v62  ;;  %v4848_v14 = vadd.f32 %v4166_v6, %v3926_v47  ;;  %932 = vmin.xlane.f32.xlu1 %v4838_v1  ;;  %v745_v15 = vpop.f32.mrb[13].mxu0  ;;  %v957_v18 = vshra.s32 %v4835_v60, 16 }
 0x143   : > { %7888 = vst [vmem:[#allocation14_spill] sm:$0xff] %v4841_v3  ;;  %v808_v19 = vand.u32 4294967168, %v7736_v4  ;;  %v4854_v20 = vadd.f32 %v3925_v52, %v745_v15  ;;  %918 = vmin.xlane.f32.xlu0 %v4844_v7  ;;  %v943_v27 = vshra.s32 %v4841_v3, 16 }
 0x144   : > { %7889 = vst [vmem:[#allocation15_spill] sm:$0xff] %v4848_v14  ;;  %v4859_v29 = vor.u32 %v809_v12, %v4733_v26  ;;  %v7733_v36 = vmax.f32 %v4848_v14, 0.0  ;;  %v4862_v43 = vcvt.s32.f32 %v957_v18 }
 0x145   : > { %7890 = vst [vmem:[#allocation16_spill] sm:$0xff] %v4854_v20  ;;  %v4865_v46 = vor.u32 %v808_v19, %v4733_v26  ;;  %v7734_v47 = vmax.f32 %v4854_v20, 0.0  ;;  %v4169_v48 = vpop.f32.mrb[14].mxu0  ;;  %v4868_v49 = vcvt.s32.f32 %v943_v27 }
 0x146   : > { %7891 = vst [vmem:[#allocation17_spill] sm:$0xff] %v4859_v29  ;;  %v811_v52 = vand.u32 4294967168, %v7733_v36  ;;  %v4872_v53 = vadd.f32 %v4169_v48, %v3928_v17  ;;  %960 = vmin.xlane.f32.xlu1 %v4862_v43  ;;  %v755_v57 = vpop.f32.mrb[15].mxu0  ;;  %v985_v2 = vshra.s32 %v4859_v29, 16 }
 0x147   : > { %7892 = vst [vmem:[#allocation18_spill] sm:$0xff] %v4865_v46  ;;  %v810_v6 = vand.u32 4294967168, %v7734_v47  ;;  %v4878_v12 = vadd.f32 %v3927_v22, %v755_v57  ;;  %946 = vmin.xlane.f32.xlu0 %v4868_v49  ;;  %v971_v15 = vshra.s32 %v4865_v46, 16 }
 0x148   : > { %7893 = vst [vmem:[#allocation19_spill] sm:$0xff] %v4872_v53  ;;  %v4883_v18 = vor.u32 %v811_v52, %v4733_v26  ;;  %v7735_v17 = vmax.f32 %v4872_v53, 0.0  ;;  %v4886_v19 = vcvt.s32.f32 %v985_v2 }
 0x149   : > { %7894 = vst [vmem:[#allocation20_spill] sm:$0xff] %v4878_v12  ;;  %v4889_v27 = vor.u32 %v810_v6, %v4733_v26  ;;  %v7737_v48 = vmax.f32 %v4878_v12, 0.0  ;;  %v4892_v36 = vcvt.s32.f32 %v971_v15 }
 0x14a   : > { %7895 = vst [vmem:[#allocation21_spill] sm:$0xff] %v4883_v18  ;;  %v813_v22 = vand.u32 4294967168, %v7735_v17  ;;  %988 = vmin.xlane.f32.xlu1 %v4886_v19  ;;  %v1013_v57 = vshra.s32 %v4883_v18, 16 }
 0x14b   : > { %7896 = vst [vmem:[#allocation22_spill] sm:$0xff] %v4889_v27  ;;  %v812_v52 = vand.u32 4294967168, %v7737_v48  ;;  %974 = vmin.xlane.f32.xlu0 %v4892_v36  ;;  %v999_v2 = vshra.s32 %v4889_v27, 16 }
 0x14c   : > { %v4903_v6 = vor.u32 %v813_v22, %v4733_v26  ;;  %v4905_v47 = vcvt.s32.f32 %v1013_v57  ;;  %v830_v22 = vand.u32 65535, %v4749_v41 }
 0x14d   : > { %v4908_v15 = vor.u32 %v812_v52, %v4733_v26  ;;  %v4910_v17 = vcvt.s32.f32 %v999_v2  ;;  %v844_v26 = vand.u32 65535, %v4745_v39  ;;  %v872_v2 = vand.u32 65535, %v4763_v54 }
 0x14e   : > { %7897 = vst [vmem:[#allocation23_spill] sm:$0xff] %v4903_v6  ;;  %1016 = vmin.xlane.f32.xlu1 %v4905_v47  ;;  %v1041_v4 = vshra.s32 %v4903_v6, 16 }
 0x14f   : > { %7898 = vst [vmem:[#allocation24_spill] sm:$0xff] %v4908_v15  ;;  %1002 = vmin.xlane.f32.xlu0 %v4910_v17  ;;  %v1027_v48 = vshra.s32 %v4908_v15, 16  ;;  %v846_v52 = vcvt.s32.f32 %v844_v26  ;;  %v874_v26 = vcvt.s32.f32 %v872_v2  ;;  %v928_v2 = vand.u32 65535, %v4811_v30 }
 0x150   : > { %v4916_v62 = vcvt.s32.f32 %v1041_v4  ;;  %v832_v4 = vcvt.s32.f32 %v830_v22  ;;  %v886_v22 = vand.u32 65535, %v4793_v9 }
 0x151   : > { %v4918_v35 = vcvt.s32.f32 %v1027_v48  ;;  %v858_v48 = vand.u32 65535, %v4769_v58 }
 0x152   : > { %1044 = vmin.xlane.f32.xlu1 %v4916_v62 }
 0x153   : > { %1030 = vmin.xlane.f32.xlu0 %v4918_v35 }
 0x1c3   : > { %v4924_v57 = vpop.xlane.xlu1 %848 }
 0x1c4   : > { %v4927_v31 = vpop.xlane.xlu0 %834  ;;  %vm850_vm2 = vcmp.eq.f32.partialorder %v4766_v56, %v4924_v57  ;;  %v860_v56 = vcvt.s32.f32 %v858_v48  ;;  %v914_v48 = vand.u32 65535, %v4817_v34 }
 0x1c5   : > { %v851_v11 = vsel %vm850_vm2, %v846_v52, inf  ;;  %vm836_vm3 = vcmp.eq.f32.partialorder %v4772_v61, %v4927_v31 }
 0x1c6   : > { %852 = vmin.xlane.f32.xlu1 %v851_v11  ;;  %v837_v10 = vsel %vm836_vm3, %v832_v4, inf }
 0x1c7   : > { %v4934_v59 = vpop.xlane.xlu1 %876  ;;  %838 = vmin.xlane.f32.xlu0 %v837_v10  ;;  %v902_v10 = vcvt.s32.f32 %v900_v55  ;;  %v930_v55 = vcvt.s32.f32 %v928_v2 }
 0x1c8   : > { %v4937_v42 = vpop.xlane.xlu0 %862  ;;  %vm878_vm4 = vcmp.eq.f32.partialorder %v4790_v0, %v4934_v59  ;;  %v888_v0 = vcvt.s32.f32 %v886_v22  ;;  %v942_v22 = vand.u32 65535, %v4841_v3 }
 0x1c9   : > { %v879_v52 = vsel %vm878_vm4, %v874_v26, inf  ;;  %vm864_vm5 = vcmp.eq.f32.partialorder %v4796_v13, %v4937_v42 }
 0x1ca   : > { %880 = vmin.xlane.f32.xlu1 %v879_v52  ;;  %v865_v61 = vsel %vm864_vm5, %v860_v56, inf  ;;  %v956_v52 = vand.u32 65535, %v4835_v60 }
 0x1cb   : > { %v4944_v11 = vpop.xlane.xlu1 %904  ;;  %866 = vmin.xlane.f32.xlu0 %v865_v61 }
 0x1cc   : > { %v4947_v4 = vpop.xlane.xlu0 %890  ;;  %vm906_vm6 = vcmp.eq.f32.partialorder %v4814_v33, %v4944_v11  ;;  %v916_v33 = vcvt.s32.f32 %v914_v48  ;;  %v958_v2 = vcvt.s32.f32 %v956_v52  ;;  %v970_v48 = vand.u32 65535, %v4865_v46 }
 0x1cd   : > { %v907_v26 = vsel %vm906_vm6, %v902_v10, inf  ;;  %vm892_vm7 = vcmp.eq.f32.partialorder %v4820_v38, %v4947_v4 }
 0x1ce   : > { %908 = vmin.xlane.f32.xlu1 %v907_v26  ;;  %v893_v13 = vsel %vm892_vm7, %v888_v0, inf  ;;  %v984_v26 = vand.u32 65535, %v4859_v29 }
 0x1cf   : > { %v4954_v56 = vpop.xlane.xlu1 %932  ;;  %894 = vmin.xlane.f32.xlu0 %v893_v13 }
 0x1d0   : > { %v4957_v61 = vpop.xlane.xlu0 %918  ;;  %vm934_vm8 = vcmp.eq.f32.partialorder %v4838_v1, %v4954_v56  ;;  %v944_v1 = vcvt.s32.f32 %v942_v22  ;;  %v986_v52 = vcvt.s32.f32 %v984_v26  ;;  %v998_v22 = vand.u32 65535, %v4889_v27 }
 0x1d1   : > { %v935_v10 = vsel %vm934_vm8, %v930_v55, inf  ;;  %vm920_vm9 = vcmp.eq.f32.partialorder %v4844_v7, %v4957_v61 }
 0x1d2   : > { %936 = vmin.xlane.f32.xlu1 %v935_v10  ;;  %v921_v38 = vsel %vm920_vm9, %v916_v33, inf  ;;  %v1012_v10 = vand.u32 65535, %v4883_v18 }
 0x1d3   : > { %v4964_v0 = vpop.xlane.xlu1 %960  ;;  %922 = vmin.xlane.f32.xlu0 %v921_v38 }
 0x1d4   : > { %v4967_v13 = vpop.xlane.xlu0 %946  ;;  %vm962_vm10 = vcmp.eq.f32.partialorder %v4862_v43, %v4964_v0  ;;  %v972_v43 = vcvt.s32.f32 %v970_v48  ;;  %v1014_v26 = vcvt.s32.f32 %v1012_v10  ;;  %v1026_v48 = vand.u32 65535, %v4908_v15 }
 0x1d5   : > { %v963_v55 = vsel %vm962_vm10, %v958_v2, inf  ;;  %vm948_vm11 = vcmp.eq.f32.partialorder %v4868_v49, %v4967_v13 }
 0x1d6   : > { %964 = vmin.xlane.f32.xlu1 %v963_v55  ;;  %v949_v7 = vsel %vm948_vm11, %v944_v1, inf  ;;  %v1040_v55 = vand.u32 65535, %v4903_v6 }
 0x1d7   : > { %v4974_v33 = vpop.xlane.xlu1 %988  ;;  %950 = vmin.xlane.f32.xlu0 %v949_v7 }
 0x1d8   : > { %v4977_v38 = vpop.xlane.xlu0 %974  ;;  %vm990_vm12 = vcmp.eq.f32.partialorder %v4886_v19, %v4974_v33  ;;  %v1000_v19 = vcvt.s32.f32 %v998_v22  ;;  %v1042_v10 = vcvt.s32.f32 %v1040_v55  ;;  %v883_v55 = vcvt.f32.s32 %v4934_v59 }
 0x1d9   : > { %v991_v2 = vsel %vm990_vm12, %v986_v52, inf  ;;  %vm976_vm13 = vcmp.eq.f32.partialorder %v4892_v36, %v4977_v38 }
 0x1da   : > { %992 = vmin.xlane.f32.xlu1 %v991_v2  ;;  %v977_v49 = vsel %vm976_vm13, %v972_v43, inf }
 0x1db   : > { %v4984_v1 = vpop.xlane.xlu1 %1016  ;;  %978 = vmin.xlane.f32.xlu0 %v977_v49  ;;  %v1028_v49 = vcvt.s32.f32 %v1026_v48 }
 0x1dc   : > { %v4987_v7 = vpop.xlane.xlu0 %1002  ;;  %vm1018_vm14 = vcmp.eq.f32.partialorder %v4905_v47, %v4984_v1 }
 0x1dd   : > { %v1019_v52 = vsel %vm1018_vm14, %v1014_v26, inf  ;;  %vm1004_vm15 = vcmp.eq.f32.partialorder %v4910_v17, %v4987_v7  ;;  %v855_v17 = vcvt.f32.s32 %v4924_v57  ;;  %v841_v26 = vcvt.f32.s32 %v4927_v31 }
 0x1de   : > { %1020 = vmin.xlane.f32.xlu1 %v1019_v52  ;;  %v1005_v36 = vsel %vm1004_vm15, %v1000_v19, inf  ;;  %v884_v31 = vshll.u32 %v883_v55, 16 }
 0x1df   : > { %v4994_v43 = vpop.xlane.xlu1 %1044  ;;  %1006 = vmin.xlane.f32.xlu0 %v1005_v36  ;;  %v856_v52 = vshll.u32 %v855_v17, 16  ;;  %v842_v28 = vshll.u32 %v841_v26, 16 }
 0x1e0   : > { %v4996_v2 = vpop.xlane.xlu0 %1030  ;;  %vm1046_vm0 = vcmp.eq.f32.partialorder %v4916_v62, %v4994_v43  ;;  %v869_v62 = vcvt.f32.s32 %v4937_v42 }
 0x1e1   : > { %v1047_v47 = vsel %vm1046_vm0, %v1042_v10, inf  ;;  %vm1032_vm1 = vcmp.eq.f32.partialorder %v4918_v35, %v4996_v2  ;;  %v911_v10 = vcvt.f32.s32 %v4944_v11 }
 0x1e2   : > { %1048 = vmin.xlane.f32.xlu1 %v1047_v47  ;;  %v1033_v22 = vsel %vm1032_vm1, %v1028_v49, inf  ;;  %v897_v49 = vcvt.f32.s32 %v4947_v4  ;;  %v870_v59 = vshll.u32 %v869_v62, 16 }
 0x1e3   : > { %1034 = vmin.xlane.f32.xlu0 %v1033_v22 }
 0x253   : > { %v853_v19 = vpop.xlane.xlu1 %852 }
 0x254   : > { %v854_v36 = vcvt.f32.s32 %v853_v19  ;;  %v839_v40 = vpop.xlane.xlu0 %838  ;;  %v898_v19 = vshll.u32 %v897_v49, 16 }
 0x255   : > { %v840_v48 = vcvt.f32.s32 %v839_v40 }
 0x256   : > { %v5007_v35 = vadd.s32 %v856_v52, %v854_v36  ;;  %v939_v52 = vcvt.f32.s32 %v4954_v56 }
 0x257   : > { %v5010_v47 = vadd.s32 %v842_v28, %v840_v48  ;;  %v881_v57 = vpop.xlane.xlu1 %880  ;;  %v912_v28 = vshll.u32 %v911_v10, 16  ;;  %v925_v48 = vcvt.f32.s32 %v4957_v61  ;;  %v967_v61 = vcvt.f32.s32 %v4964_v0 }
 0x258   : > { %v882_v22 = vcvt.f32.s32 %v881_v57  ;;  %v867_v17 = vpop.xlane.xlu0 %866  ;;  %vm1055_vm2 = vcmp.eq.s32.totalorder %v4745_v39, %v5007_v35 }
 0x259   : > { %v868_v26 = vcvt.f32.s32 %v867_v17  ;;  %v5018_v40 = vsel %vm1055_vm2, 2147483647, %v4745_v39  ;;  %vm1054_vm3 = vcmp.eq.s32.totalorder %v4749_v41, %v5010_v47 }
 0x25a   : > { %v5022_v42 = vadd.s32 %v884_v31, %v882_v22  ;;  %v1101_v11 = vshra.s32 %v5018_v40, 16  ;;  %v5029_v4 = vsel %vm1054_vm3, 2147483647, %v4749_v41 }
 0x25b   : > { %v5032_v55 = vadd.s32 %v870_v59, %v868_v26  ;;  %v909_v36 = vpop.xlane.xlu1 %908  ;;  %v1087_v62 = vshra.s32 %v5029_v4, 16 }
 0x25c   : > { %v910_v10 = vcvt.f32.s32 %v909_v36  ;;  %v895_v57 = vpop.xlane.xlu0 %894  ;;  %v5036_v31 = vcvt.s32.f32 %v1101_v11  ;;  %vm1057_vm4 = vcmp.eq.s32.totalorder %v4763_v54, %v5022_v42  ;;  %v940_v11 = vshll.u32 %v939_v52, 16 }
 0x25d   : > { %v896_v22 = vcvt.f32.s32 %v895_v57  ;;  %v5040_v17 = vcvt.s32.f32 %v1087_v62  ;;  %v5046_v56 = vsel %vm1057_vm4, 2147483647, %v4763_v54  ;;  %vm1056_vm5 = vcmp.eq.s32.totalorder %v4769_v58, %v5032_v55 }
 0x25e   : > { %v5051_v49 = vadd.s32 %v912_v28, %v910_v10  ;;  %1104 = vmin.xlane.f32.xlu1 %v5036_v31  ;;  %v1129_v59 = vshra.s32 %v5046_v56, 16  ;;  %v5059_v26 = vsel %vm1056_vm5, 2147483647, %v4769_v58  ;;  %v953_v36 = vcvt.f32.s32 %v4967_v13 }
 0x25f   : > { %v5062_v62 = vadd.s32 %v898_v19, %v896_v22  ;;  %v937_v57 = vpop.xlane.xlu1 %936  ;;  %1090 = vmin.xlane.f32.xlu0 %v5040_v17  ;;  %v1115_v0 = vshra.s32 %v5059_v26, 16  ;;  %v926_v28 = vshll.u32 %v925_v48, 16  ;;  %v968_v19 = vshll.u32 %v967_v61, 16 }
 0x260   : > { %v938_v10 = vcvt.f32.s32 %v937_v57  ;;  %v923_v25 = vpop.xlane.xlu0 %922  ;;  %v5066_v12 = vcvt.s32.f32 %v1129_v59  ;;  %vm1059_vm6 = vcmp.eq.s32.totalorder %v4787_v8, %v5051_v49  ;;  %v954_v22 = vshll.u32 %v953_v36, 16 }
 0x261   : > { %v924_v53 = vcvt.f32.s32 %v923_v25  ;;  %v5070_v20 = vcvt.s32.f32 %v1115_v0  ;;  %v5076_v13 = vsel %vm1059_vm6, 2147483647, %v4787_v8  ;;  %vm1058_vm7 = vcmp.eq.s32.totalorder %v4793_v9, %v5062_v62 }
 0x262   : > { %v5080_v52 = vadd.s32 %v940_v11, %v938_v10  ;;  %1132 = vmin.xlane.f32.xlu1 %v5066_v12  ;;  %v1157_v48 = vshra.s32 %v5076_v13, 16  ;;  %v5088_v25 = vsel %vm1058_vm7, 2147483647, %v4793_v9  ;;  %v995_v59 = vcvt.f32.s32 %v4974_v33 }
 0x263   : > { %v5091_v57 = vadd.s32 %v926_v28, %v924_v53  ;;  %v965_v0 = vpop.xlane.xlu1 %964  ;;  %1118 = vmin.xlane.f32.xlu0 %v5070_v20  ;;  %v1143_v61 = vshra.s32 %v5088_v25, 16  ;;  %v981_v11 = vcvt.f32.s32 %v4977_v38  ;;  %v1023_v33 = vcvt.f32.s32 %v4984_v1 }
 0x264   : > { %v966_v10 = vcvt.f32.s32 %v965_v0  ;;  %v951_v14 = vpop.xlane.xlu0 %950  ;;  %v5096_v51 = vcvt.s32.f32 %v1157_v48  ;;  %vm1061_vm8 = vcmp.eq.s32.totalorder %v4811_v30, %v5080_v52  ;;  %v996_v48 = vshll.u32 %v995_v59, 16 }
 0x265   : > { %v952_v44 = vcvt.f32.s32 %v951_v14  ;;  %v5100_v36 = vcvt.s32.f32 %v1143_v61  ;;  %v5106_v53 = vsel %vm1061_vm8, 2147483647, %v4811_v30  ;;  %vm1060_vm9 = vcmp.eq.s32.totalorder %v4817_v34, %v5091_v57 }
 0x266   : > { %v5111_v38 = vadd.s32 %v968_v19, %v966_v10  ;;  %1160 = vmin.xlane.f32.xlu1 %v5096_v51  ;;  %v1185_v28 = vshra.s32 %v5106_v53, 16  ;;  %v5119_v14 = vsel %vm1060_vm9, 2147483647, %v4817_v34  ;;  %v1009_v0 = vcvt.f32.s32 %v4987_v7 }
 0x267   : > { %v5122_v61 = vadd.s32 %v954_v22, %v952_v44  ;;  %v993_v23 = vpop.xlane.xlu1 %992  ;;  %1146 = vmin.xlane.f32.xlu0 %v5100_v36  ;;  %v1171_v1 = vshra.s32 %v5119_v14, 16  ;;  %v982_v19 = vshll.u32 %v981_v11, 16  ;;  %v1024_v7 = vshll.u32 %v1023_v33, 16 }
 0x268   : > { %v994_v10 = vcvt.f32.s32 %v993_v23  ;;  %v979_v16 = vpop.xlane.xlu0 %978  ;;  %v5126_v5 = vcvt.s32.f32 %v1185_v28  ;;  %vm1063_vm10 = vcmp.eq.s32.totalorder %v4835_v60, %v5111_v38  ;;  %v1010_v59 = vshll.u32 %v1009_v0, 16 }
 0x269   : > { %7899 = vst [vmem:[#allocation25_spill] sm:$0xff] %v5122_v61  ;;  %v980_v63 = vcvt.f32.s32 %v979_v16  ;;  %v5130_v50 = vcvt.s32.f32 %v1171_v1  ;;  %v5136_v44 = vsel %vm1063_vm10, 2147483647, %v4835_v60  ;;  %vm1062_vm11 = vcmp.eq.s32.totalorder %v4841_v3, %v5122_v61 }
 0x26a   : > { %v5140_v23 = vadd.s32 %v996_v48, %v994_v10  ;;  %1188 = vmin.xlane.f32.xlu1 %v5126_v5  ;;  %v1213_v22 = vshra.s32 %v5136_v44, 16  ;;  %v5148_v16 = vsel %vm1062_vm11, 2147483647, %v4841_v3  ;;  %v1051_v11 = vcvt.f32.s32 %v4994_v43 }
 0x26b   : > { %v5151_v28 = vadd.s32 %v982_v19, %v980_v63  ;;  %v1021_v1 = vpop.xlane.xlu1 %1020  ;;  %1174 = vmin.xlane.f32.xlu0 %v5130_v50  ;;  %v1199_v33 = vshra.s32 %v5148_v16, 16  ;;  %v1037_v48 = vcvt.f32.s32 %v4996_v2 }
 0x26c   : > { %7900 = vst [vmem:[#allocation26_spill] sm:$0xff] %v5140_v23  ;;  %v1022_v10 = vcvt.f32.s32 %v1021_v1  ;;  %v1007_v45 = vpop.xlane.xlu0 %1006  ;;  %v5156_v37 = vcvt.s32.f32 %v1213_v22  ;;  %vm1065_vm12 = vcmp.eq.s32.totalorder %v4859_v29, %v5140_v23  ;;  %v1052_v19 = vshll.u32 %v1051_v11, 16 }
 0x26d   : > { %7901 = vst [vmem:[#allocation27_spill] sm:$0xff] %v5151_v28  ;;  %v1008_v32 = vcvt.f32.s32 %v1007_v45  ;;  %v5160_v0 = vcvt.s32.f32 %v1199_v33  ;;  %v5166_v63 = vsel %vm1065_vm12, 2147483647, %v4859_v29  ;;  %vm1064_vm13 = vcmp.eq.s32.totalorder %v4865_v46, %v5151_v28 }
 0x26e   : > { %v5170_v43 = vadd.s32 %v1024_v7, %v1022_v10  ;;  %1216 = vmin.xlane.f32.xlu1 %v5156_v37  ;;  %v1241_v2 = vshra.s32 %v5166_v63, 16  ;;  %v5178_v45 = vsel %vm1064_vm13, 2147483647, %v4865_v46  ;;  %v1038_v7 = vshll.u32 %v1037_v48, 16 }
 0x26f   : > { %v5180_v22 = vadd.s32 %v1010_v59, %v1008_v32  ;;  %v1049_v1 = vpop.xlane.xlu1 %1048  ;;  %1202 = vmin.xlane.f32.xlu0 %v5160_v0  ;;  %v1227_v33 = vshra.s32 %v5178_v45, 16  ;;  %v1156_v29 = vand.u32 65535, %v5076_v13 }
 0x270   : > { %7902 = vst [vmem:[#allocation28_spill] sm:$0xff] %v5170_v43  ;;  %v1050_v10 = vcvt.f32.s32 %v1049_v1  ;;  %v1035_v24 = vpop.xlane.xlu0 %1034  ;;  %v5184_v21 = vcvt.s32.f32 %v1241_v2  ;;  %vm7787_vm14 = vcmp.eq.s32.totalorder %v4883_v18, %v5170_v43 }
 0x271   : > { %7903 = vst [vmem:[#allocation29_spill] sm:$0xff] %v5180_v22  ;;  %v1036_v23 = vcvt.f32.s32 %v1035_v24  ;;  %v5188_v28 = vcvt.s32.f32 %v1227_v33  ;;  %v5194_v32 = vsel %vm7787_vm14, 2147483647, %v4883_v18  ;;  %vm7786_vm15 = vcmp.eq.s32.totalorder %v4889_v27, %v5180_v22 }
 0x272   : > { %v5198_v59 = vadd.s32 %v1052_v19, %v1050_v10  ;;  %1244 = vmin.xlane.f32.xlu1 %v5184_v21  ;;  %v1269_v11 = vshra.s32 %v5194_v32, 16  ;;  %v5206_v24 = vsel %vm7786_vm15, 2147483647, %v4889_v27 }
 0x273   : > { %7905 = vst [vmem:[#allocation31_spill] sm:$0xff] %v5206_v24  ;;  %v5208_v48 = vadd.s32 %v1038_v7, %v1036_v23  ;;  %1230 = vmin.xlane.f32.xlu0 %v5188_v28  ;;  %v1255_v2 = vshra.s32 %v5206_v24, 16 }
 0x274   : > { %7904 = vst [vmem:[#allocation30_spill] sm:$0xff] %v5198_v59  ;;  %v5212_v1 = vcvt.s32.f32 %v1269_v11  ;;  %vm7778_vm0 = vcmp.eq.s32.totalorder %v4903_v6, %v5198_v59  ;;  %v1100_v59 = vand.u32 65535, %v5018_v40 }
 0x275   : > { %7906 = vst [vmem:[#allocation32_spill] sm:$0xff] %v5208_v48  ;;  %v5216_v19 = vcvt.s32.f32 %v1255_v2  ;;  %v5222_v33 = vsel %vm7778_vm0, 2147483647, %v4903_v6  ;;  %vm7776_vm1 = vcmp.eq.s32.totalorder %v4908_v15, %v5208_v48  ;;  %v1086_v6 = vand.u32 65535, %v5029_v4 }
 0x276   : > { %7907 = vst [vmem:[#allocation33_spill] sm:$0xff] %v5222_v33  ;;  %1272 = vmin.xlane.f32.xlu1 %v5212_v1  ;;  %v1297_v23 = vshra.s32 %v5222_v33, 16  ;;  %v5232_v7 = vsel %vm7776_vm1, 2147483647, %v4908_v15  ;;  %v1102_v48 = vcvt.s32.f32 %v1100_v59  ;;  %v1128_v15 = vand.u32 65535, %v5046_v56 }
 0x277   : > { %7908 = vst [vmem:[#allocation34_spill] sm:$0xff] %v5232_v7  ;;  %1258 = vmin.xlane.f32.xlu0 %v5216_v19  ;;  %v1283_v10 = vshra.s32 %v5232_v7, 16 }
 0x278   : > { %v5236_v11 = vcvt.s32.f32 %v1297_v23  ;;  %v1088_v23 = vcvt.s32.f32 %v1086_v6  ;;  %v1130_v59 = vcvt.s32.f32 %v1128_v15  ;;  %v1184_v15 = vand.u32 65535, %v5106_v53 }
 0x279   : > { %v5238_v2 = vcvt.s32.f32 %v1283_v10  ;;  %v1114_v10 = vand.u32 65535, %v5059_v26 }
 0x27a   : > { %1300 = vmin.xlane.f32.xlu1 %v5236_v11 }
 0x27b   : > { %1286 = vmin.xlane.f32.xlu0 %v5238_v2  ;;  %v1116_v6 = vcvt.s32.f32 %v1114_v10  ;;  %v1170_v10 = vand.u32 65535, %v5119_v14 }
 0x2eb   : > { %v5244_v22 = vpop.xlane.xlu1 %1104 }
 0x2ec   : > { %v5247_v27 = vpop.xlane.xlu0 %1090  ;;  %vm1106_vm1 = vcmp.eq.f32.partialorder %v5036_v31, %v5244_v22  ;;  %v1142_v31 = vand.u32 65535, %v5088_v25 }
 0x2ed   : > { %v1107_v43 = vsel %vm1106_vm1, %v1102_v48, inf  ;;  %vm1092_vm0 = vcmp.eq.f32.partialorder %v5040_v17, %v5247_v27 }
 0x2ee   : > { %1108 = vmin.xlane.f32.xlu1 %v1107_v43  ;;  %v1093_v18 = vsel %vm1092_vm0, %v1088_v23, inf }
 0x2ef   : > { %v5254_v46 = vpop.xlane.xlu1 %1132  ;;  %1094 = vmin.xlane.f32.xlu0 %v1093_v18  ;;  %v1158_v18 = vcvt.s32.f32 %v1156_v29  ;;  %v1186_v29 = vcvt.s32.f32 %v1184_v15 }
 0x2f0   : > { %v5257_v61 = vpop.xlane.xlu0 %1118  ;;  %vm1134_vm15 = vcmp.eq.f32.partialorder %v5066_v12, %v5254_v46  ;;  %v1144_v12 = vcvt.s32.f32 %v1142_v31  ;;  %v1198_v31 = vand.u32 65535, %v5148_v16 }
 0x2f1   : > { %v1135_v48 = vsel %vm1134_vm15, %v1130_v59, inf  ;;  %vm1120_vm1 = vcmp.eq.f32.partialorder %v5070_v20, %v5257_v61 }
 0x2f2   : > { %1136 = vmin.xlane.f32.xlu1 %v1135_v48  ;;  %v1121_v17 = vsel %vm1120_vm1, %v1116_v6, inf  ;;  %v1212_v48 = vand.u32 65535, %v5136_v44 }
 0x2f3   : > { %v5264_v43 = vpop.xlane.xlu1 %1160  ;;  %1122 = vmin.xlane.f32.xlu0 %v1121_v17 }
 0x2f4   : > { %v5267_v23 = vpop.xlane.xlu0 %1146  ;;  %vm1162_vm0 = vcmp.eq.f32.partialorder %v5096_v51, %v5264_v43  ;;  %v1172_v51 = vcvt.s32.f32 %v1170_v10  ;;  %v1214_v15 = vcvt.s32.f32 %v1212_v48  ;;  %v1226_v10 = vand.u32 65535, %v5178_v45 }
 0x2f5   : > { %v1163_v59 = vsel %vm1162_vm0, %v1158_v18, inf  ;;  %vm1148_vm15 = vcmp.eq.f32.partialorder %v5100_v36, %v5267_v23 }
 0x2f6   : > { %1164 = vmin.xlane.f32.xlu1 %v1163_v59  ;;  %v1149_v20 = vsel %vm1148_vm15, %v1144_v12, inf  ;;  %v1240_v59 = vand.u32 65535, %v5166_v63 }
 0x2f7   : > { %v5274_v6 = vpop.xlane.xlu1 %1188  ;;  %1150 = vmin.xlane.f32.xlu0 %v1149_v20 }
 0x2f8   : > { %v5277_v17 = vpop.xlane.xlu0 %1174  ;;  %vm1190_vm1 = vcmp.eq.f32.partialorder %v5126_v5, %v5274_v6  ;;  %v1200_v5 = vcvt.s32.f32 %v1198_v31  ;;  %v1242_v48 = vcvt.s32.f32 %v1240_v59  ;;  %v1254_v31 = vand.u32 65535, %v5206_v24 }
 0x2f9   : > { %v1191_v18 = vsel %vm1190_vm1, %v1186_v29, inf  ;;  %vm1176_vm0 = vcmp.eq.f32.partialorder %v5130_v50, %v5277_v17 }
 0x2fa   : > { %1192 = vmin.xlane.f32.xlu1 %v1191_v18  ;;  %v1177_v36 = vsel %vm1176_vm0, %v1172_v51, inf  ;;  %v1268_v18 = vand.u32 65535, %v5194_v32 }
 0x2fb   : > { %v5284_v12 = vpop.xlane.xlu1 %1216  ;;  %1178 = vmin.xlane.f32.xlu0 %v1177_v36 }
 0x2fc   : > { %v5287_v20 = vpop.xlane.xlu0 %1202  ;;  %vm1218_vm15 = vcmp.eq.f32.partialorder %v5156_v37, %v5284_v12  ;;  %v1228_v37 = vcvt.s32.f32 %v1226_v10  ;;  %v1270_v59 = vcvt.s32.f32 %v1268_v18  ;;  %v1282_v10 = vand.u32 65535, %v5232_v7 }
 0x2fd   : > { %v1219_v29 = vsel %vm1218_vm15, %v1214_v15, inf  ;;  %vm1204_vm1 = vcmp.eq.f32.partialorder %v5160_v0, %v5287_v20  ;;  %v1209_v42 = vcvt.f32.s32 %v5287_v20 }
 0x2fe   : > { %1220 = vmin.xlane.f32.xlu1 %v1219_v29  ;;  %v1205_v50 = vsel %vm1204_vm1, %v1200_v5, inf  ;;  %v1296_v29 = vand.u32 65535, %v5222_v33 }
 0x2ff   : > { %v5294_v51 = vpop.xlane.xlu1 %1244  ;;  %1206 = vmin.xlane.f32.xlu0 %v1205_v50  ;;  %v1210_v49 = vshll.u32 %v1209_v42, 16 }
 0x300   : > { %v5297_v36 = vpop.xlane.xlu0 %1230  ;;  %vm1246_vm0 = vcmp.eq.f32.partialorder %v5184_v21, %v5294_v51  ;;  %v1256_v21 = vcvt.s32.f32 %v1254_v31  ;;  %v1298_v18 = vcvt.s32.f32 %v1296_v29  ;;  %v1139_v29 = vcvt.f32.s32 %v5254_v46 }
 0x301   : > { %v1247_v15 = vsel %vm1246_vm0, %v1242_v48, inf  ;;  %vm1232_vm15 = vcmp.eq.f32.partialorder %v5188_v28, %v5297_v36 }
 0x302   : > { %1248 = vmin.xlane.f32.xlu1 %v1247_v15  ;;  %v1233_v0 = vsel %vm1232_vm15, %v1228_v37, inf }
 0x303   : > { %v5304_v5 = vpop.xlane.xlu1 %1272  ;;  %1234 = vmin.xlane.f32.xlu0 %v1233_v0  ;;  %v1284_v0 = vcvt.s32.f32 %v1282_v10 }
 0x304   : > { %v5307_v50 = vpop.xlane.xlu0 %1258  ;;  %vm1274_vm1 = vcmp.eq.f32.partialorder %v5212_v1, %v5304_v5 }
 0x305   : > { %v1275_v48 = vsel %vm1274_vm1, %v1270_v59, inf  ;;  %vm1260_vm0 = vcmp.eq.f32.partialorder %v5216_v19, %v5307_v50  ;;  %v1111_v19 = vcvt.f32.s32 %v5244_v22  ;;  %v1097_v59 = vcvt.f32.s32 %v5247_v27 }
 0x306   : > { %1276 = vmin.xlane.f32.xlu1 %v1275_v48  ;;  %v1261_v28 = vsel %vm1260_vm0, %v1256_v21, inf  ;;  %v1140_v22 = vshll.u32 %v1139_v29, 16  ;;  %v1265_v52 = vcvt.f32.s32 %v5307_v50 }
 0x307   : > { %v5314_v37 = vpop.xlane.xlu1 %1300  ;;  %1262 = vmin.xlane.f32.xlu0 %v1261_v28  ;;  %v1112_v48 = vshll.u32 %v1111_v19, 16  ;;  %v1098_v33 = vshll.u32 %v1097_v59, 16 }
 0x308   : > { %v5316_v15 = vpop.xlane.xlu0 %1286  ;;  %vm1302_vm15 = vcmp.eq.f32.partialorder %v5236_v11, %v5314_v37  ;;  %v1125_v11 = vcvt.f32.s32 %v5257_v61  ;;  %v1266_v38 = vshll.u32 %v1265_v52, 16 }
 0x309   : > { %v1303_v1 = vsel %vm1302_vm15, %v1298_v18, inf  ;;  %vm1288_vm14 = vcmp.eq.f32.partialorder %v5238_v2, %v5316_v15  ;;  %v1167_v18 = vcvt.f32.s32 %v5264_v43  ;;  %v1293_v52 = vcvt.f32.s32 %v5316_v15  ;;  %v7935_v15 = vld [vmem:[#allocation18_spill] sm:$0xff] }
 0x30a   : > { %1304 = vmin.xlane.f32.xlu1 %v1303_v1  ;;  %v1289_v31 = vsel %vm1288_vm14, %v1284_v0, inf  ;;  %v1153_v0 = vcvt.f32.s32 %v5267_v23  ;;  %v1126_v24 = vshll.u32 %v1125_v11, 16  ;;  %v1181_v11 = vcvt.f32.s32 %v5277_v17 }
 0x30b   : > { %1290 = vmin.xlane.f32.xlu0 %v1289_v31 }
 0x37b   : > { %v1109_v21 = vpop.xlane.xlu1 %1108 }
 0x37c   : > { %v1110_v28 = vcvt.f32.s32 %v1109_v21  ;;  %v1095_v7 = vpop.xlane.xlu0 %1094 }
 0x37d   : > { %v1096_v10 = vcvt.f32.s32 %v1095_v7  ;;  %v1168_v7 = vshll.u32 %v1167_v18, 16 }
 0x37e   : > { %v1113_v2 = vadd.s32 %v1112_v48, %v1110_v28  ;;  %v1195_v48 = vcvt.f32.s32 %v5274_v6 }
 0x37f   : > { %v1099_v1 = vadd.s32 %v1098_v33, %v1096_v10  ;;  %v1137_v31 = vpop.xlane.xlu1 %1136 }
 0x380   : > { %vm1311_vm14 = vcmp.eq.s32.totalorder %v5018_v40, %v1113_v2  ;;  %v1138_v27 = vcvt.f32.s32 %v1137_v31  ;;  %v1123_v19 = vpop.xlane.xlu0 %1122 }
 0x381   : > { %vm1310_vm1 = vcmp.eq.s32.totalorder %v5029_v4, %v1099_v1  ;;  %v1124_v46 = vcvt.f32.s32 %v1123_v19  ;;  %vm5333_vm0 = vmor %vm1055_vm2, %vm1311_vm14  ;;  %v1154_v4 = vshll.u32 %v1153_v0, 16  ;;  %v1182_v19 = vshll.u32 %v1181_v11, 16 }
 0x382   : > { %v1141_v43 = vadd.s32 %v1140_v22, %v1138_v27  ;;  %v5340_v33 = vsel %vm5333_vm0, 2147483647, %v4745_v39  ;;  %vm5345_vm15 = vmor %vm1054_vm3, %vm1310_vm1  ;;  %v1196_v22 = vshll.u32 %v1195_v48, 16 }
 0x383   : > { %v1127_v35 = vadd.s32 %v1126_v24, %v1124_v46  ;;  %v1165_v23 = vpop.xlane.xlu1 %1164  ;;  %v1373_v59 = vshra.s32 %v5340_v33, 16  ;;  %v5353_v21 = vsel %vm5345_vm15, 2147483647, %v4749_v41 }
 0x384   : > { %vm1313_vm2 = vcmp.eq.s32.totalorder %v5046_v56, %v1141_v43  ;;  %v1166_v29 = vcvt.f32.s32 %v1165_v23  ;;  %v1151_v47 = vpop.xlane.xlu0 %1150  ;;  %v1359_v28 = vshra.s32 %v5353_v21, 16  ;;  %v1223_v56 = vcvt.f32.s32 %v5284_v12 }
 0x385   : > { %vm1312_vm3 = vcmp.eq.s32.totalorder %v5059_v26, %v1127_v35  ;;  %v1152_v24 = vcvt.f32.s32 %v1151_v47  ;;  %v5360_v10 = vcvt.s32.f32 %v1373_v59  ;;  %vm5365_vm14 = vmor %vm1057_vm4, %vm1313_vm2 }
 0x386   : > { %v1169_v6 = vadd.s32 %v1168_v7, %v1166_v29  ;;  %v5370_v2 = vcvt.s32.f32 %v1359_v28  ;;  %v5375_v17 = vsel %vm5365_vm14, 2147483647, %v4763_v54  ;;  %vm5380_vm1 = vmor %vm1056_vm5, %vm1312_vm3  ;;  %v1251_v28 = vcvt.f32.s32 %v5294_v51 }
 0x387   : > { %v1155_v0 = vadd.s32 %v1154_v4, %v1152_v24  ;;  %1376 = vmin.xlane.f32.xlu1 %v5360_v10  ;;  %v1193_v12 = vpop.xlane.xlu1 %1192  ;;  %v1401_v1 = vshra.s32 %v5375_v17, 16  ;;  %v5390_v31 = vsel %vm5380_vm1, 2147483647, %v4769_v58 }
 0x388   : > { %vm1315_vm4 = vcmp.eq.s32.totalorder %v5076_v13, %v1169_v6  ;;  %v1194_v55 = vcvt.f32.s32 %v1193_v12  ;;  %1362 = vmin.xlane.f32.xlu0 %v5370_v2  ;;  %v1179_v27 = vpop.xlane.xlu0 %1178  ;;  %v1387_v20 = vshra.s32 %v5390_v31, 16  ;;  %v1224_v13 = vshll.u32 %v1223_v56, 16 }
 0x389   : > { %vm1314_vm5 = vcmp.eq.s32.totalorder %v5088_v25, %v1155_v0  ;;  %v1180_v46 = vcvt.f32.s32 %v1179_v27  ;;  %v5396_v7 = vcvt.s32.f32 %v1401_v1  ;;  %vm5401_vm2 = vmor %vm1059_vm6, %vm1315_vm4  ;;  %v1237_v56 = vcvt.f32.s32 %v5297_v36 }
 0x38a   : > { %v1197_v4 = vadd.s32 %v1196_v22, %v1194_v55  ;;  %v5405_v35 = vcvt.s32.f32 %v1387_v20  ;;  %v5410_v23 = vsel %vm5401_vm2, 2147483647, %v4787_v8  ;;  %vm5415_vm3 = vmor %vm1058_vm7, %vm1314_vm5  ;;  %v1252_v27 = vshll.u32 %v1251_v28, 16 }
 0x38b   : > { %v1183_v59 = vadd.s32 %v1182_v19, %v1180_v46  ;;  %1404 = vmin.xlane.f32.xlu1 %v5396_v7  ;;  %v1221_v48 = vpop.xlane.xlu1 %1220  ;;  %v1429_v29 = vshra.s32 %v5410_v23, 16  ;;  %v5424_v47 = vsel %vm5415_vm3, 2147483647, %v4793_v9  ;;  %v1238_v19 = vshll.u32 %v1237_v56, 16 }
 0x38c   : > { %vm1317_vm6 = vcmp.eq.s32.totalorder %v5106_v53, %v1197_v4  ;;  %v1222_v62 = vcvt.f32.s32 %v1221_v48  ;;  %1390 = vmin.xlane.f32.xlu0 %v5405_v35  ;;  %v1207_v11 = vpop.xlane.xlu0 %1206  ;;  %v1415_v24 = vshra.s32 %v5424_v47, 16  ;;  %v1279_v53 = vcvt.f32.s32 %v5304_v5 }
 0x38d   : > { %vm1316_vm7 = vcmp.eq.s32.totalorder %v5119_v14, %v1183_v59  ;;  %v1208_v6 = vcvt.f32.s32 %v1207_v11  ;;  %v5432_v42 = vcvt.s32.f32 %v1429_v29  ;;  %vm5437_vm4 = vmor %vm1061_vm8, %vm1317_vm6  ;;  %v1307_v56 = vcvt.f32.s32 %v5314_v37  ;;  %v7990_v29 = vld [vmem:[#allocation14_spill] sm:$0xff] }
 0x38e   : > { %v1225_v0 = vadd.s32 %v1224_v13, %v1222_v62  ;;  %v5442_v12 = vcvt.s32.f32 %v1415_v24  ;;  %v5447_v36 = vsel %vm5437_vm4, 2147483647, %v4811_v30  ;;  %vm5452_vm5 = vmor %vm1060_vm9, %vm1316_vm7  ;;  %v7932_v37 = vmov 0 }
 0x38f   : > { %v1211_v1 = vadd.s32 %v1210_v49, %v1208_v6  ;;  %1432 = vmin.xlane.f32.xlu1 %v5432_v42  ;;  %v1249_v5 = vpop.xlane.xlu1 %1248  ;;  %v1457_v22 = vshra.s32 %v5447_v36, 16  ;;  %v5462_v55 = vsel %vm5452_vm5, 2147483647, %v4817_v34 }
 0x390   : > { %vm1319_vm8 = vcmp.eq.s32.totalorder %v5136_v44, %v1225_v0  ;;  %v1250_v57 = vcvt.f32.s32 %v1249_v5  ;;  %1418 = vmin.xlane.f32.xlu0 %v5442_v12  ;;  %v1235_v20 = vpop.xlane.xlu0 %1234  ;;  %v1443_v50 = vshra.s32 %v5462_v55, 16  ;;  %v1280_v44 = vshll.u32 %v1279_v53, 16 }
 0x391   : > { %vm1318_vm9 = vcmp.eq.s32.totalorder %v5148_v16, %v1211_v1  ;;  %v1236_v46 = vcvt.f32.s32 %v1235_v20  ;;  %v5468_v13 = vcvt.s32.f32 %v1457_v22  ;;  %vm5473_vm6 = vmor %vm1063_vm10, %vm1319_vm8  ;;  %v7930_v22 = vld [vmem:[#allocation17_spill] sm:$0xff]  ;;  %v1308_v16 = vshll.u32 %v1307_v56, 16 }
 0x392   : > { %v1253_v49 = vadd.s32 %v1252_v27, %v1250_v57  ;;  %v5477_v59 = vcvt.s32.f32 %v1443_v50  ;;  %v5482_v48 = vsel %vm5473_vm6, 2147483647, %v4835_v60  ;;  %vm5487_vm7 = vmor %vm1062_vm11, %vm1318_vm9  ;;  %v7937_v50 = vmov 0  ;;  %v7942_v27 = vld [vmem:[#allocation28_spill] sm:$0xff] }
 0x393   : > { %v1239_v28 = vadd.s32 %v1238_v19, %v1236_v46  ;;  %1460 = vmin.xlane.f32.xlu1 %v5468_v13  ;;  %v1277_v62 = vpop.xlane.xlu1 %1276  ;;  %v1485_v11 = vshra.s32 %v5482_v48, 16  ;;  %v5496_v24 = vsel %vm5487_vm7, 2147483647, %v4841_v3 }
 0x394   : > { %vm1321_vm10 = vcmp.eq.s32.totalorder %v5166_v63, %v1253_v49  ;;  %v1278_v6 = vcvt.f32.s32 %v1277_v62  ;;  %1446 = vmin.xlane.f32.xlu0 %v5477_v59  ;;  %v1263_v53 = vpop.xlane.xlu0 %1262  ;;  %v1471_v0 = vshra.s32 %v5496_v24, 16 }
 0x395   : > { %vm1320_vm11 = vcmp.eq.s32.totalorder %v5178_v45, %v1239_v28  ;;  %v1264_v1 = vcvt.f32.s32 %v1263_v53  ;;  %v5504_v5 = vcvt.s32.f32 %v1485_v11  ;;  %vm5509_vm8 = vmor %vm1065_vm12, %vm1321_vm10  ;;  %v7944_v45 = vmov 0 }
 0x396   : > { %v7933_v37 = vsel %vm5509_vm8, 4294967295, %v7932_v37  ;;  %v1281_v63 = vadd.s32 %v1280_v44, %v1278_v6  ;;  %v5513_v57 = vcvt.s32.f32 %v1471_v0  ;;  %v5518_v20 = vsel %vm5509_vm8, 2147483647, %v7930_v22  ;;  %vm5523_vm9 = vmor %vm1064_vm13, %vm1320_vm11  ;;  %v7940_v6 = vld [vmem:[#allocation31_spill] sm:$0xff] }
 0x397   : > { %7934 = vst [vmem:[#allocation25_spill] sm:$0xff] %v7933_v37  ;;  %v7938_v50 = vsel %vm5523_vm9, 4294967295, %v7937_v50  ;;  %v1267_v19 = vadd.s32 %v1266_v38, %v1264_v1  ;;  %1488 = vmin.xlane.f32.xlu1 %v5504_v5  ;;  %v1305_v46 = vpop.xlane.xlu1 %1304  ;;  %v1513_v44 = vshra.s32 %v5518_v20, 16  ;;  %v5532_v49 = vsel %vm5523_vm9, 2147483647, %v7935_v15  ;;  %v7941_v1 = vld [vmem:[#allocation21_spill] sm:$0xff] }
 0x398   : > { %7939 = vst [vmem:[#allocation26_spill] sm:$0xff] %v7938_v50  ;;  %vm1323_vm12 = vcmp.eq.s32.totalorder %v5194_v32, %v1281_v63  ;;  %v1306_v28 = vcvt.f32.s32 %v1305_v46  ;;  %1474 = vmin.xlane.f32.xlu0 %v5513_v57  ;;  %v1291_v62 = vpop.xlane.xlu0 %1290  ;;  %v1499_v11 = vshra.s32 %v5532_v49, 16  ;;  %v1294_v38 = vshll.u32 %v1293_v52, 16  ;;  %v7947_v52 = vld [vmem:[#allocation22_spill] sm:$0xff] }
 0x399   : > { %vm1322_vm13 = vcmp.eq.s32.totalorder %v7940_v6, %v1267_v19  ;;  %v1292_v53 = vcvt.f32.s32 %v1291_v62  ;;  %v5538_v0 = vcvt.s32.f32 %v1513_v44  ;;  %vm7943_vm10 = vcmp.eq.s32.totalorder %v7941_v1, %v7942_v27  ;;  %v7948_v19 = vld [vmem:[#allocation29_spill] sm:$0xff]  ;;  %v7955_v6 = vld [vmem:[#allocation34_spill] sm:$0xff] }
 0x39a   : > { %vm5543_vm11 = vmor %vm7943_vm10, %vm1323_vm12  ;;  %v1309_v32 = vadd.s32 %v1308_v16, %v1306_v28  ;;  %v5547_v56 = vcvt.s32.f32 %v1499_v11  ;;  %vm7949_vm9 = vcmp.eq.s32.totalorder %v7947_v52, %v7948_v19  ;;  %v7950_v46 = vmov 0  ;;  %v7954_v28 = vld [vmem:[#allocation33_spill] sm:$0xff] }
 0x39b   : > { %v7945_v45 = vsel %vm5543_vm11, 4294967295, %v7944_v45  ;;  %v5552_v63 = vsel %vm5543_vm11, 2147483647, %v7941_v1  ;;  %vm5557_vm8 = vmor %vm7949_vm9, %vm1322_vm13  ;;  %v1295_v44 = vadd.s32 %v1294_v38, %v1292_v53  ;;  %1516 = vmin.xlane.f32.xlu1 %v5538_v0  ;;  %v7956_v38 = vld [vmem:[#allocation23_spill] sm:$0xff]  ;;  %v7957_v53 = vld [vmem:[#allocation30_spill] sm:$0xff]  ;;  %v7959_v19 = vmov 0 }
 0x39c   : > { %7946 = vst [vmem:[#allocation27_spill] sm:$0xff] %v7945_v45  ;;  %v7951_v46 = vsel %vm5557_vm8, 4294967295, %v7950_v46  ;;  %v1541_v62 = vshra.s32 %v5552_v63, 16  ;;  %v5566_v16 = vsel %vm5557_vm8, 2147483647, %v7947_v52  ;;  %vm1325_vm12 = vcmp.eq.s32.totalorder %v7954_v28, %v1309_v32  ;;  %1502 = vmin.xlane.f32.xlu0 %v5547_v56  ;;  %v7963_v28 = vld [vmem:[#allocation24_spill] sm:$0xff] }
 0x39d   : > { %7952 = vst [vmem:[#allocation31_spill] sm:$0xff] %v7951_v46  ;;  %7953 = vst [vmem:[#allocation28_spill] sm:$0xff] %v5566_v16  ;;  %v1527_v11 = vshra.s32 %v5566_v16, 16  ;;  %vm1324_vm9 = vcmp.eq.s32.totalorder %v7955_v6, %v1295_v44  ;;  %vm7958_vm13 = vcmp.eq.s32.totalorder %v7956_v38, %v7957_v53  ;;  %v7964_v52 = vld [vmem:[#allocation32_spill] sm:$0xff]  ;;  %v7966_v44 = vmov 0 }
 0x39e   : > { %v5572_v27 = vcvt.s32.f32 %v1541_v62  ;;  %vm5577_vm10 = vmor %vm7958_vm13, %vm1325_vm12  ;;  %vm7965_vm8 = vcmp.eq.s32.totalorder %v7963_v28, %v7964_v52  ;;  %v1428_v37 = vand.u32 65535, %v5410_v23 }
 0x39f   : > { %v7960_v19 = vsel %vm5577_vm10, 4294967295, %v7959_v19  ;;  %v5581_v1 = vcvt.s32.f32 %v1527_v11  ;;  %v5586_v32 = vsel %vm5577_vm10, 2147483647, %v7956_v38  ;;  %vm5591_vm11 = vmor %vm7965_vm8, %vm1324_vm9  ;;  %v1372_v38 = vand.u32 65535, %v5340_v33 }
 0x3a0   : > { %7961 = vst [vmem:[#allocation29_spill] sm:$0xff] %v7960_v19  ;;  %7962 = vst [vmem:[#allocation33_spill] sm:$0xff] %v5586_v32  ;;  %v7967_v44 = vsel %vm5591_vm11, 4294967295, %v7966_v44  ;;  %1544 = vmin.xlane.f32.xlu1 %v5572_v27  ;;  %v1569_v62 = vshra.s32 %v5586_v32, 16  ;;  %v5600_v11 = vsel %vm5591_vm11, 2147483647, %v7963_v28 }
 0x3a1   : > { %7968 = vst [vmem:[#allocation34_spill] sm:$0xff] %v7967_v44  ;;  %7969 = vst [vmem:[#allocation30_spill] sm:$0xff] %v5600_v11  ;;  %1530 = vmin.xlane.f32.xlu0 %v5581_v1  ;;  %v1555_v6 = vshra.s32 %v5600_v11, 16  ;;  %v1358_v19 = vand.u32 65535, %v5353_v21  ;;  %v1374_v28 = vcvt.s32.f32 %v1372_v38  ;;  %v1400_v44 = vand.u32 65535, %v5375_v17 }
 0x3a2   : > { %v5604_v53 = vcvt.s32.f32 %v1569_v62 }
 0x3a3   : > { %v5606_v52 = vcvt.s32.f32 %v1555_v6  ;;  %v1360_v62 = vcvt.s32.f32 %v1358_v19  ;;  %v1386_v6 = vand.u32 65535, %v5390_v31  ;;  %v1402_v38 = vcvt.s32.f32 %v1400_v44 }
 0x3a4   : > { %1572 = vmin.xlane.f32.xlu1 %v5604_v53  ;;  %v1414_v19 = vand.u32 65535, %v5424_v47  ;;  %v1456_v44 = vand.u32 65535, %v5447_v36 }
 0x3a5   : > { %1558 = vmin.xlane.f32.xlu0 %v5606_v52 }
 0x414   : > { %v5612_v46 = vpop.xlane.xlu1 %1376 }
 0x415   : > { %v5615_v45 = vpop.xlane.xlu0 %1362  ;;  %vm1378_vm8 = vcmp.eq.f32.partialorder %v5360_v10, %v5612_v46  ;;  %v1388_v10 = vcvt.s32.f32 %v1386_v6  ;;  %v1442_v6 = vand.u32 65535, %v5462_v55 }
 0x416   : > { %v1379_v15 = vsel %vm1378_vm8, %v1374_v28, inf  ;;  %vm1364_vm12 = vcmp.eq.f32.partialorder %v5370_v2, %v5615_v45 }
 0x417   : > { %1380 = vmin.xlane.f32.xlu1 %v1379_v15  ;;  %v1365_v22 = vsel %vm1364_vm12, %v1360_v62, inf }
 0x418   : > { %v5622_v50 = vpop.xlane.xlu1 %1404  ;;  %1366 = vmin.xlane.f32.xlu0 %v1365_v22  ;;  %v1430_v22 = vcvt.s32.f32 %v1428_v37  ;;  %v1458_v37 = vcvt.s32.f32 %v1456_v44 }
 0x419   : > { %v5625_v3 = vpop.xlane.xlu0 %1390  ;;  %vm1406_vm9 = vcmp.eq.f32.partialorder %v5396_v7, %v5622_v50  ;;  %v1416_v7 = vcvt.s32.f32 %v1414_v19  ;;  %v1470_v19 = vand.u32 65535, %v5496_v24 }
 0x41a   : > { %v1407_v28 = vsel %vm1406_vm9, %v1402_v38, inf  ;;  %vm1392_vm13 = vcmp.eq.f32.partialorder %v5405_v35, %v5625_v3 }
 0x41b   : > { %1408 = vmin.xlane.f32.xlu1 %v1407_v28  ;;  %v1393_v2 = vsel %vm1392_vm13, %v1388_v10, inf  ;;  %v1484_v28 = vand.u32 65535, %v5482_v48 }
 0x41c   : > { %v5632_v15 = vpop.xlane.xlu1 %1432  ;;  %1394 = vmin.xlane.f32.xlu0 %v1393_v2 }
 0x41d   : > { %v5635_v62 = vpop.xlane.xlu0 %1418  ;;  %vm1434_vm8 = vcmp.eq.f32.partialorder %v5432_v42, %v5632_v15  ;;  %v1444_v42 = vcvt.s32.f32 %v1442_v6  ;;  %v1486_v44 = vcvt.s32.f32 %v1484_v28  ;;  %v1498_v6 = vand.u32 65535, %v5532_v49 }
 0x41e   : > { %v1435_v38 = vsel %vm1434_vm8, %v1430_v22, inf  ;;  %vm1420_vm12 = vcmp.eq.f32.partialorder %v5442_v12, %v5635_v62 }
 0x41f   : > { %1436 = vmin.xlane.f32.xlu1 %v1435_v38  ;;  %v1421_v35 = vsel %vm1420_vm12, %v1416_v7, inf  ;;  %v1512_v38 = vand.u32 65535, %v5518_v20 }
 0x420   : > { %v5642_v10 = vpop.xlane.xlu1 %1460  ;;  %1422 = vmin.xlane.f32.xlu0 %v1421_v35 }
 0x421   : > { %v5645_v2 = vpop.xlane.xlu0 %1446  ;;  %vm1462_vm9 = vcmp.eq.f32.partialorder %v5468_v13, %v5642_v10  ;;  %v1472_v13 = vcvt.s32.f32 %v1470_v19  ;;  %v1514_v28 = vcvt.s32.f32 %v1512_v38  ;;  %v1526_v19 = vand.u32 65535, %v5566_v16 }
 0x422   : > { %v1463_v22 = vsel %vm1462_vm9, %v1458_v37, inf  ;;  %vm1448_vm13 = vcmp.eq.f32.partialorder %v5477_v59, %v5645_v2  ;;  %v1467_v40 = vcvt.f32.s32 %v5642_v10 }
 0x423   : > { %1464 = vmin.xlane.f32.xlu1 %v1463_v22  ;;  %v1449_v12 = vsel %vm1448_vm13, %v1444_v42, inf  ;;  %v1540_v22 = vand.u32 65535, %v5552_v63 }
 0x424   : > { %v5652_v7 = vpop.xlane.xlu1 %1488  ;;  %1450 = vmin.xlane.f32.xlu0 %v1449_v12 }
 0x425   : > { %v5655_v35 = vpop.xlane.xlu0 %1474  ;;  %vm1490_vm8 = vcmp.eq.f32.partialorder %v5504_v5, %v5652_v7  ;;  %v1500_v5 = vcvt.s32.f32 %v1498_v6  ;;  %v1542_v38 = vcvt.s32.f32 %v1540_v22  ;;  %v1554_v6 = vand.u32 65535, %v5600_v11 }
 0x426   : > { %v1491_v37 = vsel %vm1490_vm8, %v1486_v44, inf  ;;  %vm1476_vm12 = vcmp.eq.f32.partialorder %v5513_v57, %v5655_v35  ;;  %v1495_v10 = vcvt.f32.s32 %v5652_v7 }
 0x427   : > { %1492 = vmin.xlane.f32.xlu1 %v1491_v37  ;;  %v1477_v59 = vsel %vm1476_vm12, %v1472_v13, inf  ;;  %v1568_v37 = vand.u32 65535, %v5586_v32 }
 0x428   : > { %v5662_v42 = vpop.xlane.xlu1 %1516  ;;  %1478 = vmin.xlane.f32.xlu0 %v1477_v59 }
 0x429   : > { %v5665_v12 = vpop.xlane.xlu0 %1502  ;;  %vm1518_vm9 = vcmp.eq.f32.partialorder %v5538_v0, %v5662_v42  ;;  %v1528_v0 = vcvt.s32.f32 %v1526_v19  ;;  %v1570_v22 = vcvt.s32.f32 %v1568_v37  ;;  %v1411_v37 = vcvt.f32.s32 %v5622_v50 }
 0x42a   : > { %v1519_v44 = vsel %vm1518_vm9, %v1514_v28, inf  ;;  %vm1504_vm13 = vcmp.eq.f32.partialorder %v5547_v56, %v5665_v12 }
 0x42b   : > { %1520 = vmin.xlane.f32.xlu1 %v1519_v44  ;;  %v1505_v57 = vsel %vm1504_vm13, %v1500_v5, inf }
 0x42c   : > { %1506 = vmin.xlane.f32.xlu0 %v1505_v57  ;;  %v1556_v57 = vcvt.s32.f32 %v1554_v6 }
 0x42d   : > { %v5672_v13 = vpop.xlane.xlu1 %1544 }
 0x42e   : > { %v5675_v59 = vpop.xlane.xlu0 %1530  ;;  %vm1546_vm8 = vcmp.eq.f32.partialorder %v5572_v27, %v5672_v13 }
 0x42f   : > { %v1547_v28 = vsel %vm1546_vm8, %v1542_v38, inf  ;;  %vm1532_vm12 = vcmp.eq.f32.partialorder %v5581_v1, %v5675_v59  ;;  %v1383_v1 = vcvt.f32.s32 %v5612_v46  ;;  %v1369_v38 = vcvt.f32.s32 %v5615_v45 }
 0x430   : > { %1548 = vmin.xlane.f32.xlu1 %v1547_v28  ;;  %v1533_v56 = vsel %vm1532_vm12, %v1528_v0, inf  ;;  %v1412_v46 = vshll.u32 %v1411_v37, 16 }
 0x431   : > { %v5682_v5 = vpop.xlane.xlu1 %1572  ;;  %1534 = vmin.xlane.f32.xlu0 %v1533_v56  ;;  %v1384_v28 = vshll.u32 %v1383_v1, 16  ;;  %v1370_v32 = vshll.u32 %v1369_v38, 16 }
 0x432   : > { %v5684_v44 = vpop.xlane.xlu0 %1558  ;;  %vm1574_vm9 = vcmp.eq.f32.partialorder %v5604_v53, %v5682_v5  ;;  %v1397_v53 = vcvt.f32.s32 %v5625_v3 }
 0x433   : > { %v1575_v27 = vsel %vm1574_vm9, %v1570_v22, inf  ;;  %vm1560_vm13 = vcmp.eq.f32.partialorder %v5606_v52, %v5684_v44  ;;  %v1439_v22 = vcvt.f32.s32 %v5632_v15 }
 0x434   : > { %1576 = vmin.xlane.f32.xlu1 %v1575_v27  ;;  %v1561_v19 = vsel %vm1560_vm13, %v1556_v57, inf  ;;  %v1425_v57 = vcvt.f32.s32 %v5635_v62  ;;  %v1398_v16 = vshll.u32 %v1397_v53, 16  ;;  %v1453_v53 = vcvt.f32.s32 %v5645_v2 }
 0x435   : > { %1562 = vmin.xlane.f32.xlu0 %v1561_v19 }
 0x436   : > { %v1426_v61 = vshll.u32 %v1425_v57, 16 }
 0x4a4   : > { %v1381_v0 = vpop.xlane.xlu1 %1380 }
 0x4a5   : > { %v1382_v56 = vcvt.f32.s32 %v1381_v0  ;;  %v1367_v11 = vpop.xlane.xlu0 %1366 }
 0x4a6   : > { %v1368_v6 = vcvt.f32.s32 %v1367_v11  ;;  %v1440_v11 = vshll.u32 %v1439_v22, 16 }
 0x4a7   : > { %v1385_v52 = vadd.s32 %v1384_v28, %v1382_v56 }
 0x4a8   : > { %v1371_v27 = vadd.s32 %v1370_v32, %v1368_v6  ;;  %v1409_v19 = vpop.xlane.xlu1 %1408 }
 0x4a9   : > { %vm1583_vm8 = vcmp.eq.s32.totalorder %v5340_v33, %v1385_v52  ;;  %v1410_v45 = vcvt.f32.s32 %v1409_v19  ;;  %v1395_v1 = vpop.xlane.xlu0 %1394  ;;  %v1468_v19 = vshll.u32 %v1467_v40, 16 }
 0x4aa   : > { %vm5699_vm12 = vmor %vm5333_vm0, %vm1583_vm8  ;;  %vm1582_vm9 = vcmp.eq.s32.totalorder %v5353_v21, %v1371_v27  ;;  %v1396_v3 = vcvt.f32.s32 %v1395_v1  ;;  %v1454_v1 = vshll.u32 %v1453_v53, 16 }
 0x4ab   : > { %vm5706_vm13 = vmor %vm5345_vm15, %vm1582_vm9  ;;  %v1413_v33 = vadd.s32 %v1412_v46, %v1410_v45  ;;  %v5713_v15 = vsel %vm5699_vm12, 2147483647, %v4745_v39 }
 0x4ac   : > { %v1399_v62 = vadd.s32 %v1398_v16, %v1396_v3  ;;  %v1437_v38 = vpop.xlane.xlu1 %1436  ;;  %v1645_v0 = vshra.s32 %v5713_v15, 16  ;;  %v5719_v21 = vsel %vm5706_vm13, 2147483647, %v4749_v41 }
 0x4ad   : > { %vm1585_vm0 = vcmp.eq.s32.totalorder %v5375_v17, %v1413_v33  ;;  %v1438_v28 = vcvt.f32.s32 %v1437_v38  ;;  %v1423_v37 = vpop.xlane.xlu0 %1422  ;;  %v1631_v56 = vshra.s32 %v5719_v21, 16 }
 0x4ae   : > { %vm5727_vm15 = vmor %vm5365_vm14, %vm1585_vm0  ;;  %vm1584_vm8 = vcmp.eq.s32.totalorder %v5390_v31, %v1399_v62  ;;  %v1424_v6 = vcvt.f32.s32 %v1423_v37  ;;  %v5732_v22 = vcvt.s32.f32 %v1645_v0  ;;  %v1481_v31 = vcvt.f32.s32 %v5655_v35 }
 0x4af   : > { %vm5737_vm9 = vmor %vm5380_vm1, %vm1584_vm8  ;;  %v1441_v2 = vadd.s32 %v1440_v11, %v1438_v28  ;;  %v5741_v52 = vcvt.s32.f32 %v1631_v56  ;;  %v5746_v18 = vsel %vm5727_vm15, 2147483647, %v4763_v54  ;;  %v1523_v37 = vcvt.f32.s32 %v5662_v42 }
 0x4b0   : > { %v1427_v57 = vadd.s32 %v1426_v61, %v1424_v6  ;;  %1648 = vmin.xlane.f32.xlu1 %v5732_v22  ;;  %v1465_v7 = vpop.xlane.xlu1 %1464  ;;  %v1673_v26 = vshra.s32 %v5746_v18, 16  ;;  %v5754_v27 = vsel %vm5737_vm9, 2147483647, %v4769_v58  ;;  %v1496_v61 = vshll.u32 %v1495_v10, 16 }
 0x4b1   : > { %vm1587_vm14 = vcmp.eq.s32.totalorder %v5410_v23, %v1441_v2  ;;  %v1466_v46 = vcvt.f32.s32 %v1465_v7  ;;  %1634 = vmin.xlane.f32.xlu0 %v5741_v52  ;;  %v1451_v45 = vpop.xlane.xlu0 %1450  ;;  %v1659_v35 = vshra.s32 %v5754_v27, 16  ;;  %v1482_v0 = vshll.u32 %v1481_v31, 16 }
 0x4b2   : > { %vm5761_vm1 = vmor %vm5401_vm2, %vm1587_vm14  ;;  %vm1586_vm0 = vcmp.eq.s32.totalorder %v5424_v47, %v1427_v57  ;;  %v1452_v11 = vcvt.f32.s32 %v1451_v45  ;;  %v5766_v33 = vcvt.s32.f32 %v1673_v26  ;;  %v1509_v10 = vcvt.f32.s32 %v5665_v12 }
 0x4b3   : > { %vm5770_vm8 = vmor %vm5415_vm3, %vm1586_vm0  ;;  %v1469_v62 = vadd.s32 %v1468_v19, %v1466_v46  ;;  %v5774_v38 = vcvt.s32.f32 %v1659_v35  ;;  %v5779_v43 = vsel %vm5761_vm1, 2147483647, %v4787_v8  ;;  %v1524_v46 = vshll.u32 %v1523_v37, 16 }
 0x4b4   : > { %v1455_v47 = vadd.s32 %v1454_v1, %v1452_v11  ;;  %1676 = vmin.xlane.f32.xlu1 %v5766_v33  ;;  %v1493_v40 = vpop.xlane.xlu1 %1492  ;;  %v1701_v28 = vshra.s32 %v5779_v43, 16  ;;  %v5786_v25 = vsel %vm5770_vm8, 2147483647, %v4793_v9  ;;  %v1510_v1 = vshll.u32 %v1509_v10, 16 }
 0x4b5   : > { %vm1589_vm2 = vcmp.eq.s32.totalorder %v5447_v36, %v1469_v62  ;;  %v1494_v56 = vcvt.f32.s32 %v1493_v40  ;;  %1662 = vmin.xlane.f32.xlu0 %v5774_v38  ;;  %v1479_v53 = vpop.xlane.xlu0 %1478  ;;  %v1687_v6 = vshra.s32 %v5786_v25, 16  ;;  %v1551_v36 = vcvt.f32.s32 %v5672_v13 }
 0x4b6   : > { %vm5795_vm3 = vmor %vm5437_vm4, %vm1589_vm2  ;;  %vm1588_vm14 = vcmp.eq.s32.totalorder %v5462_v55, %v1455_v47  ;;  %v1480_v31 = vcvt.f32.s32 %v1479_v53  ;;  %v5800_v42 = vcvt.s32.f32 %v1701_v28  ;;  %v1537_v55 = vcvt.f32.s32 %v5675_v59 }
 0x4b7   : > { %vm5805_vm0 = vmor %vm5452_vm5, %vm1588_vm14  ;;  %v1497_v12 = vadd.s32 %v1496_v61, %v1494_v56  ;;  %v5809_v7 = vcvt.s32.f32 %v1687_v6  ;;  %v5814_v51 = vsel %vm5795_vm3, 2147483647, %v4811_v30  ;;  %v7986_v11 = vmov 0 }
 0x4b8   : > { %v1483_v26 = vadd.s32 %v1482_v0, %v1480_v31  ;;  %1704 = vmin.xlane.f32.xlu1 %v5800_v42  ;;  %v1521_v13 = vpop.xlane.xlu1 %1520  ;;  %v1729_v14 = vshra.s32 %v5814_v51, 16  ;;  %v5822_v19 = vsel %vm5805_vm0, 2147483647, %v4817_v34  ;;  %v1552_v0 = vshll.u32 %v1551_v36, 16 }
 0x4b9   : > { %vm1591_vm4 = vcmp.eq.s32.totalorder %v5482_v48, %v1497_v12  ;;  %v1522_v45 = vcvt.f32.s32 %v1521_v13  ;;  %1690 = vmin.xlane.f32.xlu0 %v5809_v7  ;;  %v1507_v35 = vpop.xlane.xlu0 %1506  ;;  %v1715_v59 = vshra.s32 %v5822_v19, 16  ;;  %v7988_v48 = vmov 0 }
 0x4ba   : > { %vm5829_vm5 = vmor %vm5473_vm6, %vm1591_vm4  ;;  %vm1590_vm2 = vcmp.eq.s32.totalorder %v5496_v24, %v1483_v26  ;;  %v1508_v61 = vcvt.f32.s32 %v1507_v35  ;;  %v5834_v62 = vcvt.s32.f32 %v1729_v14  ;;  %v1538_v28 = vshll.u32 %v1537_v55, 16  ;;  %v7991_v55 = vld [vmem:[#allocation25_spill] sm:$0xff] }
 0x4bb   : > { %v7987_v11 = vsel %vm5829_vm5, 4294967295, %v7986_v11  ;;  %vm5838_vm14 = vmor %vm5487_vm7, %vm1590_vm2  ;;  %v1525_v47 = vadd.s32 %v1524_v46, %v1522_v45  ;;  %v5842_v40 = vcvt.s32.f32 %v1715_v59  ;;  %v5847_v4 = vsel %vm5829_vm5, 2147483647, %v4835_v60 }
 0x4bc   : > { %v7989_v48 = vsel %vm5838_vm14, 4294967295, %v7988_v48  ;;  %v1511_v24 = vadd.s32 %v1510_v1, %v1508_v61  ;;  %1732 = vmin.xlane.f32.xlu1 %v5834_v62  ;;  %v1757_v56 = vshra.s32 %v5847_v4, 16  ;;  %v5854_v53 = vsel %vm5838_vm14, 2147483647, %v7990_v29  ;;  %v8002_v61 = vld [vmem:[#allocation18_spill] sm:$0xff] }
 0x4bd   : > { %v1549_v37 = vpop.xlane.xlu1 %1548  ;;  %v1579_v6 = vcvt.f32.s32 %v5682_v5  ;;  %vm1593_vm6 = vcmp.eq.s32.totalorder %v5518_v20, %v1525_v47  ;;  %1718 = vmin.xlane.f32.xlu0 %v5842_v40  ;;  %v1743_v36 = vshra.s32 %v5854_v53, 16  ;;  %v1565_v12 = vcvt.f32.s32 %v5684_v44  ;;  %v7996_v20 = vld [vmem:[#allocation26_spill] sm:$0xff]  ;;  %v8001_v44 = vld [vmem:[#allocation17_spill] sm:$0xff] }
 0x4be   : > { %v1550_v10 = vcvt.f32.s32 %v1549_v37  ;;  %v1535_v31 = vpop.xlane.xlu0 %1534  ;;  %vm7992_vm7 = vnez %v7991_v55  ;;  %v7993_v26 = vmov 0  ;;  %vm1592_vm2 = vcmp.eq.s32.totalorder %v5532_v49, %v1511_v24 }
 0x4bf   : > { %vm5863_vm4 = vmor %vm7992_vm7, %vm1593_vm6  ;;  %v1536_v13 = vcvt.f32.s32 %v1535_v31  ;;  %v5868_v5 = vcvt.s32.f32 %v1757_v56  ;;  %vm7997_vm14 = vnez %v7996_v20  ;;  %v7998_v14 = vmov 0 }
 0x4c0   : > { %v7994_v26 = vsel %vm5863_vm4, 4294967295, %v7993_v26  ;;  %vm5872_vm5 = vmor %vm7997_vm14, %vm1592_vm2  ;;  %v1553_v46 = vadd.s32 %v1552_v0, %v1550_v10  ;;  %v5876_v45 = vcvt.s32.f32 %v1743_v36  ;;  %v5881_v35 = vsel %vm5863_vm4, 2147483647, %v8001_v44  ;;  %v8003_v10 = vld [vmem:[#allocation27_spill] sm:$0xff]  ;;  %v8008_v36 = vld [vmem:[#allocation28_spill] sm:$0xff] }
 0x4c1   : > { %7995 = vst [vmem:[#allocation32_spill] sm:$0xff] %v7994_v26  ;;  %v7999_v14 = vsel %vm5872_vm5, 4294967295, %v7998_v14  ;;  %v1539_v59 = vadd.s32 %v1538_v28, %v1536_v13  ;;  %1760 = vmin.xlane.f32.xlu1 %v5868_v5  ;;  %v1577_v49 = vpop.xlane.xlu1 %1576  ;;  %v1785_v1 = vshra.s32 %v5881_v35, 16  ;;  %v5888_v47 = vsel %vm5872_vm5, 2147483647, %v8002_v61 }
 0x4c2   : > { %8000 = vst [vmem:[#allocation25_spill] sm:$0xff] %v7999_v14  ;;  %v1580_v24 = vshll.u32 %v1579_v6, 16  ;;  %vm1595_vm14 = vcmp.eq.s32.totalorder %v5552_v63, %v1553_v46  ;;  %v1578_v0 = vcvt.f32.s32 %v1577_v49  ;;  %1746 = vmin.xlane.f32.xlu0 %v5876_v45  ;;  %v1563_v37 = vpop.xlane.xlu0 %1562  ;;  %v1771_v56 = vshra.s32 %v5888_v47, 16  ;;  %v8009_v6 = vld [vmem:[#allocation31_spill] sm:$0xff] }
 0x4c3   : > { %v1566_v28 = vshll.u32 %v1565_v12, 16  ;;  %vm8004_vm6 = vnez %v8003_v10  ;;  %v8005_v31 = vmov 0  ;;  %vm1594_vm2 = vcmp.eq.s32.totalorder %v8008_v36, %v1539_v59  ;;  %v8014_v12 = vld [vmem:[#allocation21_spill] sm:$0xff] }
 0x4c4   : > { %vm5895_vm7 = vmor %vm8004_vm6, %vm1595_vm14  ;;  %v1564_v55 = vcvt.f32.s32 %v1563_v37  ;;  %v5900_v13 = vcvt.s32.f32 %v1785_v1  ;;  %vm8010_vm5 = vnez %v8009_v6  ;;  %v8011_v63 = vmov 0  ;;  %v8015_v1 = vld [vmem:[#allocation22_spill] sm:$0xff]  ;;  %v8017_v36 = vld [vmem:[#allocation33_spill] sm:$0xff] }
 0x4c5   : > { %v8006_v31 = vsel %vm5895_vm7, 4294967295, %v8005_v31  ;;  %vm5904_vm4 = vmor %vm8010_vm5, %vm1594_vm2  ;;  %v1581_v20 = vadd.s32 %v1580_v24, %v1578_v0  ;;  %v5908_v46 = vcvt.s32.f32 %v1771_v56  ;;  %v5913_v49 = vsel %vm5895_vm7, 2147483647, %v8014_v12 }
 0x4c6   : > { %8007 = vst [vmem:[#allocation26_spill] sm:$0xff] %v8006_v31  ;;  %v8012_v63 = vsel %vm5904_vm4, 4294967295, %v8011_v63  ;;  %v1567_v10 = vadd.s32 %v1566_v28, %v1564_v55  ;;  %1788 = vmin.xlane.f32.xlu1 %v5900_v13  ;;  %v1813_v59 = vshra.s32 %v5913_v49, 16  ;;  %v5920_v37 = vsel %vm5904_vm4, 2147483647, %v8015_v1  ;;  %v8022_v28 = vld [vmem:[#allocation30_spill] sm:$0xff] }
 0x4c7   : > { %8013 = vst [vmem:[#allocation27_spill] sm:$0xff] %v8012_v63  ;;  %8016 = vst [vmem:[#allocation28_spill] sm:$0xff] %v5920_v37  ;;  %vm1597_vm5 = vcmp.eq.s32.totalorder %v8017_v36, %v1581_v20  ;;  %1774 = vmin.xlane.f32.xlu0 %v5908_v46  ;;  %v1799_v24 = vshra.s32 %v5920_v37, 16  ;;  %v8019_v56 = vmov 0  ;;  %v8024_v1 = vmov 0  ;;  %v8027_v36 = vld [vmem:[#allocation23_spill] sm:$0xff] }
 0x4c8   : > { %vm5927_vm14 = vmor %vm5577_vm10, %vm1597_vm5  ;;  %vm1596_vm6 = vcmp.eq.s32.totalorder %v8022_v28, %v1567_v10  ;;  %v5932_v55 = vcvt.s32.f32 %v1813_v59  ;;  %v8029_v10 = vld [vmem:[#allocation24_spill] sm:$0xff]  ;;  %v1700_v26 = vand.u32 65535, %v5779_v43 }
 0x4c9   : > { %v8020_v56 = vsel %vm5927_vm14, 4294967295, %v8019_v56  ;;  %vm5936_vm2 = vmor %vm5591_vm11, %vm1596_vm6  ;;  %v5940_v20 = vcvt.s32.f32 %v1799_v24  ;;  %v5945_v0 = vsel %vm5927_vm14, 2147483647, %v8027_v36  ;;  %v1644_v36 = vand.u32 65535, %v5713_v15 }
 0x4ca   : > { %8021 = vst [vmem:[#allocation31_spill] sm:$0xff] %v8020_v56  ;;  %v8025_v1 = vsel %vm5936_vm2, 4294967295, %v8024_v1  ;;  %8028 = vst [vmem:[#allocation29_spill] sm:$0xff] %v5945_v0  ;;  %1816 = vmin.xlane.f32.xlu1 %v5932_v55  ;;  %v1841_v12 = vshra.s32 %v5945_v0, 16  ;;  %v5952_v59 = vsel %vm5936_vm2, 2147483647, %v8029_v10 }
 0x4cb   : > { %8026 = vst [vmem:[#allocation33_spill] sm:$0xff] %v8025_v1  ;;  %8030 = vst [vmem:[#allocation30_spill] sm:$0xff] %v5952_v59  ;;  %1802 = vmin.xlane.f32.xlu0 %v5940_v20  ;;  %v1827_v28 = vshra.s32 %v5952_v59, 16  ;;  %v1630_v56 = vand.u32 65535, %v5719_v21  ;;  %v1646_v10 = vcvt.s32.f32 %v1644_v36  ;;  %v1672_v1 = vand.u32 65535, %v5746_v18 }
 0x4cc   : > { %v5956_v24 = vcvt.s32.f32 %v1841_v12 }
 0x4cd   : > { %v5958_v6 = vcvt.s32.f32 %v1827_v28  ;;  %v1632_v12 = vcvt.s32.f32 %v1630_v56  ;;  %v1658_v28 = vand.u32 65535, %v5754_v27  ;;  %v1674_v36 = vcvt.s32.f32 %v1672_v1 }
 0x4ce   : > { %1844 = vmin.xlane.f32.xlu1 %v5956_v24  ;;  %v1686_v56 = vand.u32 65535, %v5786_v25  ;;  %v1728_v1 = vand.u32 65535, %v5814_v51 }
 0x4cf   : > { %1830 = vmin.xlane.f32.xlu0 %v5958_v6 }
 0x53d   : > { %v5964_v63 = vpop.xlane.xlu1 %1648 }
 0x53e   : > { %v5967_v31 = vpop.xlane.xlu0 %1634  ;;  %vm1650_vm11 = vcmp.eq.f32.partialorder %v5732_v22, %v5964_v63  ;;  %v1660_v22 = vcvt.s32.f32 %v1658_v28  ;;  %v1714_v28 = vand.u32 65535, %v5822_v19 }
 0x53f   : > { %v1651_v61 = vsel %vm1650_vm11, %v1646_v10, inf  ;;  %vm1636_vm10 = vcmp.eq.f32.partialorder %v5741_v52, %v5967_v31 }
 0x540   : > { %1652 = vmin.xlane.f32.xlu1 %v1651_v61  ;;  %v1637_v44 = vsel %vm1636_vm10, %v1632_v12, inf }
 0x541   : > { %v5974_v14 = vpop.xlane.xlu1 %1676  ;;  %1638 = vmin.xlane.f32.xlu0 %v1637_v44  ;;  %v1702_v44 = vcvt.s32.f32 %v1700_v26  ;;  %v1730_v26 = vcvt.s32.f32 %v1728_v1 }
 0x542   : > { %v5977_v29 = vpop.xlane.xlu0 %1662  ;;  %vm1678_vm5 = vcmp.eq.f32.partialorder %v5766_v33, %v5974_v14  ;;  %v1688_v33 = vcvt.s32.f32 %v1686_v56  ;;  %v1742_v56 = vand.u32 65535, %v5854_v53 }
 0x543   : > { %v1679_v10 = vsel %vm1678_vm5, %v1674_v36, inf  ;;  %vm1664_vm6 = vcmp.eq.f32.partialorder %v5774_v38, %v5977_v29 }
 0x544   : > { %1680 = vmin.xlane.f32.xlu1 %v1679_v10  ;;  %v1665_v52 = vsel %vm1664_vm6, %v1660_v22, inf  ;;  %v1756_v10 = vand.u32 65535, %v5847_v4 }
 0x545   : > { %v5984_v61 = vpop.xlane.xlu1 %1704  ;;  %1666 = vmin.xlane.f32.xlu0 %v1665_v52 }
 0x546   : > { %v5987_v12 = vpop.xlane.xlu0 %1690  ;;  %vm1706_vm11 = vcmp.eq.f32.partialorder %v5800_v42, %v5984_v61  ;;  %v1716_v42 = vcvt.s32.f32 %v1714_v28  ;;  %v1758_v1 = vcvt.s32.f32 %v1756_v10  ;;  %v1770_v28 = vand.u32 65535, %v5888_v47 }
 0x547   : > { %v1707_v36 = vsel %vm1706_vm11, %v1702_v44, inf  ;;  %vm1692_vm10 = vcmp.eq.f32.partialorder %v5809_v7, %v5987_v12 }
 0x548   : > { %1708 = vmin.xlane.f32.xlu1 %v1707_v36  ;;  %v1693_v38 = vsel %vm1692_vm10, %v1688_v33, inf  ;;  %v1784_v36 = vand.u32 65535, %v5881_v35 }
 0x549   : > { %v5994_v22 = vpop.xlane.xlu1 %1732  ;;  %1694 = vmin.xlane.f32.xlu0 %v1693_v38 }
 0x54a   : > { %v5997_v52 = vpop.xlane.xlu0 %1718  ;;  %vm1734_vm5 = vcmp.eq.f32.partialorder %v5834_v62, %v5994_v22  ;;  %v1744_v62 = vcvt.s32.f32 %v1742_v56  ;;  %v1786_v10 = vcvt.s32.f32 %v1784_v36  ;;  %v1798_v56 = vand.u32 65535, %v5920_v37 }
 0x54b   : > { %v1735_v44 = vsel %vm1734_vm5, %v1730_v26, inf  ;;  %vm1720_vm6 = vcmp.eq.f32.partialorder %v5842_v40, %v5997_v52  ;;  %v1739_v32 = vcvt.f32.s32 %v5994_v22 }
 0x54c   : > { %1736 = vmin.xlane.f32.xlu1 %v1735_v44  ;;  %v1721_v7 = vsel %vm1720_vm6, %v1716_v42, inf  ;;  %v1812_v44 = vand.u32 65535, %v5913_v49 }
 0x54d   : > { %1722 = vmin.xlane.f32.xlu0 %v1721_v7 }
 0x54e   : > { %v6004_v33 = vpop.xlane.xlu1 %1760  ;;  %v1814_v36 = vcvt.s32.f32 %v1812_v44 }
 0x54f   : > { %v6007_v38 = vpop.xlane.xlu0 %1746  ;;  %vm1762_vm11 = vcmp.eq.f32.partialorder %v5868_v5, %v6004_v33  ;;  %v1772_v5 = vcvt.s32.f32 %v1770_v28  ;;  %v1826_v28 = vand.u32 65535, %v5952_v59  ;;  %v1767_v22 = vcvt.f32.s32 %v6004_v33 }
 0x550   : > { %v1763_v26 = vsel %vm1762_vm11, %v1758_v1, inf  ;;  %vm1748_vm10 = vcmp.eq.f32.partialorder %v5876_v45, %v6007_v38 }
 0x551   : > { %1764 = vmin.xlane.f32.xlu1 %v1763_v26  ;;  %v1749_v40 = vsel %vm1748_vm10, %v1744_v62, inf  ;;  %v1840_v26 = vand.u32 65535, %v5945_v0 }
 0x552   : > { %1750 = vmin.xlane.f32.xlu0 %v1749_v40 }
 0x553   : > { %v6014_v42 = vpop.xlane.xlu1 %1788  ;;  %v1842_v44 = vcvt.s32.f32 %v1840_v26  ;;  %v1683_v26 = vcvt.f32.s32 %v5974_v14 }
 0x554   : > { %v6017_v7 = vpop.xlane.xlu0 %1774  ;;  %vm1790_vm5 = vcmp.eq.f32.partialorder %v5900_v13, %v6014_v42  ;;  %v1800_v13 = vcvt.s32.f32 %v1798_v56 }
 0x555   : > { %v1791_v1 = vsel %vm1790_vm5, %v1786_v10, inf  ;;  %vm1776_vm6 = vcmp.eq.f32.partialorder %v5908_v46, %v6017_v7 }
 0x556   : > { %1792 = vmin.xlane.f32.xlu1 %v1791_v1  ;;  %v1777_v45 = vsel %vm1776_vm6, %v1772_v5, inf }
 0x557   : > { %v6024_v62 = vpop.xlane.xlu1 %1816  ;;  %1778 = vmin.xlane.f32.xlu0 %v1777_v45  ;;  %v1828_v45 = vcvt.s32.f32 %v1826_v28 }
 0x558   : > { %v6027_v40 = vpop.xlane.xlu0 %1802  ;;  %vm1818_vm11 = vcmp.eq.f32.partialorder %v5932_v55, %v6024_v62 }
 0x559   : > { %v1819_v10 = vsel %vm1818_vm11, %v1814_v36, inf  ;;  %vm1804_vm10 = vcmp.eq.f32.partialorder %v5940_v20, %v6027_v40  ;;  %v1655_v20 = vcvt.f32.s32 %v5964_v63  ;;  %v1641_v36 = vcvt.f32.s32 %v5967_v31 }
 0x55a   : > { %1820 = vmin.xlane.f32.xlu1 %v1819_v10  ;;  %v1805_v46 = vsel %vm1804_vm10, %v1800_v13, inf  ;;  %v1684_v63 = vshll.u32 %v1683_v26, 16 }
 0x55b   : > { %v6034_v5 = vpop.xlane.xlu1 %1844  ;;  %1806 = vmin.xlane.f32.xlu0 %v1805_v46  ;;  %v1656_v10 = vshll.u32 %v1655_v20, 16  ;;  %v1642_v0 = vshll.u32 %v1641_v36, 16 }
 0x55c   : > { %v6036_v1 = vpop.xlane.xlu0 %1830  ;;  %vm1846_vm5 = vcmp.eq.f32.partialorder %v5956_v24, %v6034_v5  ;;  %v1669_v24 = vcvt.f32.s32 %v5977_v29 }
 0x55d   : > { %v1847_v55 = vsel %vm1846_vm5, %v1842_v44, inf  ;;  %vm1832_vm6 = vcmp.eq.f32.partialorder %v5958_v6, %v6036_v1  ;;  %v1711_v44 = vcvt.f32.s32 %v5984_v61 }
 0x55e   : > { %1848 = vmin.xlane.f32.xlu1 %v1847_v55  ;;  %v1833_v56 = vsel %vm1832_vm6, %v1828_v45, inf  ;;  %v1697_v45 = vcvt.f32.s32 %v5987_v12  ;;  %v1670_v37 = vshll.u32 %v1669_v24, 16  ;;  %v1725_v24 = vcvt.f32.s32 %v5997_v52 }
 0x55f   : > { %1834 = vmin.xlane.f32.xlu0 %v1833_v56 }
 0x560   : > { %v1698_v50 = vshll.u32 %v1697_v45, 16 }
 0x5cd   : > { %v1653_v13 = vpop.xlane.xlu1 %1652 }
 0x5ce   : > { %v1654_v46 = vcvt.f32.s32 %v1653_v13  ;;  %v1639_v59 = vpop.xlane.xlu0 %1638 }
 0x5cf   : > { %v1640_v28 = vcvt.f32.s32 %v1639_v59  ;;  %v1712_v59 = vshll.u32 %v1711_v44, 16 }
 0x5d0   : > { %v1657_v6 = vadd.s32 %v1656_v10, %v1654_v46 }
 0x5d1   : > { %v1643_v55 = vadd.s32 %v1642_v0, %v1640_v28  ;;  %v1681_v56 = vpop.xlane.xlu1 %1680 }
 0x5d2   : > { %vm1855_vm11 = vcmp.eq.s32.totalorder %v5713_v15, %v1657_v6  ;;  %v1682_v31 = vcvt.f32.s32 %v1681_v56  ;;  %v1667_v20 = vpop.xlane.xlu0 %1666  ;;  %v1740_v56 = vshll.u32 %v1739_v32, 16 }
 0x5d3   : > { %vm6051_vm10 = vmor %vm5699_vm12, %vm1855_vm11  ;;  %vm1854_vm5 = vcmp.eq.s32.totalorder %v5719_v21, %v1643_v55  ;;  %v1668_v29 = vcvt.f32.s32 %v1667_v20  ;;  %v1726_v20 = vshll.u32 %v1725_v24, 16 }
 0x5d4   : > { %vm6058_vm6 = vmor %vm5706_vm13, %vm1854_vm5  ;;  %v1685_v15 = vadd.s32 %v1684_v63, %v1682_v31  ;;  %v6065_v61 = vsel %vm6051_vm10, 2147483647, %v4745_v39 }
 0x5d5   : > { %v1671_v12 = vadd.s32 %v1670_v37, %v1668_v29  ;;  %v1709_v36 = vpop.xlane.xlu1 %1708  ;;  %v1917_v13 = vshra.s32 %v6065_v61, 16  ;;  %v6071_v21 = vsel %vm6058_vm6, 2147483647, %v4749_v41 }
 0x5d6   : > { %vm1857_vm12 = vcmp.eq.s32.totalorder %v5746_v18, %v1685_v15  ;;  %v1710_v10 = vcvt.f32.s32 %v1709_v36  ;;  %v1695_v26 = vpop.xlane.xlu0 %1694  ;;  %v1903_v46 = vshra.s32 %v6071_v21, 16 }
 0x5d7   : > { %vm6079_vm13 = vmor %vm5727_vm15, %vm1857_vm12  ;;  %vm1856_vm11 = vcmp.eq.s32.totalorder %v5754_v27, %v1671_v12  ;;  %v1696_v28 = vcvt.f32.s32 %v1695_v26  ;;  %v6084_v44 = vcvt.s32.f32 %v1917_v13  ;;  %v1753_v27 = vcvt.f32.s32 %v6007_v38 }
 0x5d8   : > { %vm6089_vm5 = vmor %vm5737_vm9, %vm1856_vm11  ;;  %v1713_v52 = vadd.s32 %v1712_v59, %v1710_v10  ;;  %v6093_v6 = vcvt.s32.f32 %v1903_v46  ;;  %v6098_v16 = vsel %vm6079_vm13, 2147483647, %v4763_v54  ;;  %v1795_v26 = vcvt.f32.s32 %v6014_v42 }
 0x5d9   : > { %v1699_v45 = vadd.s32 %v1698_v50, %v1696_v28  ;;  %1920 = vmin.xlane.f32.xlu1 %v6084_v44  ;;  %v1737_v33 = vpop.xlane.xlu1 %1736  ;;  %v1945_v17 = vshra.s32 %v6098_v16, 16  ;;  %v6106_v55 = vsel %vm6089_vm5, 2147483647, %v4769_v58  ;;  %v1768_v50 = vshll.u32 %v1767_v22, 16 }
 0x5da   : > { %vm1859_vm15 = vcmp.eq.s32.totalorder %v5779_v43, %v1713_v52  ;;  %v1738_v63 = vcvt.f32.s32 %v1737_v33  ;;  %1906 = vmin.xlane.f32.xlu0 %v6093_v6  ;;  %v1723_v31 = vpop.xlane.xlu0 %1722  ;;  %v1931_v38 = vshra.s32 %v6106_v55, 16  ;;  %v1754_v13 = vshll.u32 %v1753_v27, 16 }
 0x5db   : > { %vm6113_vm9 = vmor %vm5761_vm1, %vm1859_vm15  ;;  %vm1858_vm12 = vcmp.eq.s32.totalorder %v5786_v25, %v1699_v45  ;;  %v1724_v59 = vcvt.f32.s32 %v1723_v31  ;;  %v6118_v15 = vcvt.s32.f32 %v1945_v17  ;;  %v1781_v22 = vcvt.f32.s32 %v6017_v7 }
 0x5dc   : > { %vm6122_vm11 = vmor %vm5770_vm8, %vm1858_vm12  ;;  %v1741_v12 = vadd.s32 %v1740_v56, %v1738_v63  ;;  %v6126_v36 = vcvt.s32.f32 %v1931_v38  ;;  %v6131_v3 = vsel %vm6113_vm9, 2147483647, %v4787_v8  ;;  %v8043_v52 = vmov 0 }
 0x5dd   : > { %v1727_v25 = vadd.s32 %v1726_v20, %v1724_v59  ;;  %1948 = vmin.xlane.f32.xlu1 %v6118_v15  ;;  %v1973_v10 = vshra.s32 %v6131_v3, 16  ;;  %v6138_v23 = vsel %vm6122_vm11, 2147483647, %v4793_v9  ;;  %v8045_v45 = vmov 0 }
 0x5de   : > { %v1765_v32 = vpop.xlane.xlu1 %1764  ;;  %vm1861_vm1 = vcmp.eq.s32.totalorder %v5814_v51, %v1741_v12  ;;  %1934 = vmin.xlane.f32.xlu0 %v6126_v36  ;;  %v1959_v28 = vshra.s32 %v6138_v23, 16  ;;  %v1823_v51 = vcvt.f32.s32 %v6024_v62  ;;  %v1796_v63 = vshll.u32 %v1795_v26, 16 }
 0x5df   : > { %v1766_v46 = vcvt.f32.s32 %v1765_v32  ;;  %v1751_v24 = vpop.xlane.xlu0 %1750  ;;  %vm6147_vm8 = vmor %vm5795_vm3, %vm1861_vm1  ;;  %vm1860_vm15 = vcmp.eq.s32.totalorder %v5822_v19, %v1727_v25  ;;  %v6152_v42 = vcvt.s32.f32 %v1973_v10  ;;  %v1809_v19 = vcvt.f32.s32 %v6027_v40 }
 0x5e0   : > { %v8044_v52 = vsel %vm6147_vm8, 4294967295, %v8043_v52  ;;  %v1752_v27 = vcvt.f32.s32 %v1751_v24  ;;  %vm6157_vm12 = vmor %vm5805_vm0, %vm1860_vm15  ;;  %v6161_v33 = vcvt.s32.f32 %v1959_v28  ;;  %v6166_v2 = vsel %vm6147_vm8, 2147483647, %v4811_v30 }
 0x5e1   : > { %v8046_v45 = vsel %vm6157_vm12, 4294967295, %v8045_v45  ;;  %v1769_v7 = vadd.s32 %v1768_v50, %v1766_v46  ;;  %1976 = vmin.xlane.f32.xlu1 %v6152_v42  ;;  %v2001_v57 = vshra.s32 %v6166_v2, 16  ;;  %v6174_v56 = vsel %vm6157_vm12, 2147483647, %v4817_v34 }
 0x5e2   : > { %v1755_v17 = vadd.s32 %v1754_v13, %v1752_v27  ;;  %1962 = vmin.xlane.f32.xlu0 %v6161_v33  ;;  %v1987_v40 = vshra.s32 %v6174_v56, 16  ;;  %v1782_v20 = vshll.u32 %v1781_v22, 16  ;;  %vm8047_vm0 = vnez %v7987_v11 }
 0x5e3   : > { %v1793_v62 = vpop.xlane.xlu1 %1792  ;;  %vm1863_vm3 = vcmp.eq.s32.totalorder %v5847_v4, %v1769_v7  ;;  %v8048_v59 = vmov 0  ;;  %v6186_v12 = vcvt.s32.f32 %v2001_v57  ;;  %v1824_v13 = vshll.u32 %v1823_v51, 16 }
 0x5e4   : > { %v1794_v31 = vcvt.f32.s32 %v1793_v62  ;;  %v1779_v38 = vpop.xlane.xlu0 %1778  ;;  %vm6181_vm1 = vmor %vm8047_vm0, %vm1863_vm3  ;;  %vm1862_vm15 = vcmp.eq.s32.totalorder %v5854_v53, %v1755_v17  ;;  %vm8050_vm12 = vnez %v7989_v48  ;;  %v8051_v4 = vmov 0  ;;  %v8053_v48 = vld [vmem:[#allocation14_spill] sm:$0xff] }
 0x5e5   : > { %v8049_v59 = vsel %vm6181_vm1, 4294967295, %v8048_v59  ;;  %v1780_v50 = vcvt.f32.s32 %v1779_v38  ;;  %vm6190_vm8 = vmor %vm8050_vm12, %vm1862_vm15  ;;  %v6194_v32 = vcvt.s32.f32 %v1987_v40  ;;  %v6199_v11 = vsel %vm6181_vm1, 2147483647, %v4835_v60  ;;  %2004 = vmin.xlane.f32.xlu1 %v6186_v12 }
 0x5e6   : > { %v8052_v4 = vsel %vm6190_vm8, 4294967295, %v8051_v4  ;;  %v1797_v25 = vadd.s32 %v1796_v63, %v1794_v31  ;;  %v1810_v10 = vshll.u32 %v1809_v19, 16  ;;  %v2029_v46 = vshra.s32 %v6199_v11, 16  ;;  %v8054_v19 = vld [vmem:[#allocation32_spill] sm:$0xff] }
 0x5e7   : > { %v1783_v53 = vadd.s32 %v1782_v20, %v1780_v50  ;;  %v1821_v26 = vpop.xlane.xlu1 %1820  ;;  %v6206_v24 = vsel %vm6190_vm8, 2147483647, %v8053_v48  ;;  %v1851_v28 = vcvt.f32.s32 %v6034_v5  ;;  %1990 = vmin.xlane.f32.xlu0 %v6194_v32  ;;  %v1837_v7 = vcvt.f32.s32 %v6036_v1  ;;  %v8064_v1 = vld [vmem:[#allocation17_spill] sm:$0xff]  ;;  %v8065_v50 = vld [vmem:[#allocation18_spill] sm:$0xff] }
 0x5e8   : > { %vm1865_vm12 = vcmp.eq.s32.totalorder %v5881_v35, %v1797_v25  ;;  %v1822_v22 = vcvt.f32.s32 %v1821_v26  ;;  %v1807_v27 = vpop.xlane.xlu0 %1806  ;;  %v2015_v51 = vshra.s32 %v6206_v24, 16  ;;  %vm8055_vm3 = vnez %v8054_v19  ;;  %v8059_v35 = vld [vmem:[#allocation25_spill] sm:$0xff] }
 0x5e9   : > { %vm6215_vm0 = vmor %vm8055_vm3, %vm1865_vm12  ;;  %v8056_v17 = vmov 0  ;;  %vm1864_vm15 = vcmp.eq.s32.totalorder %v5888_v47, %v1783_v53  ;;  %v1808_v62 = vcvt.f32.s32 %v1807_v27  ;;  %v6220_v5 = vcvt.s32.f32 %v2029_v46 }
 0x5ea   : > { %v8057_v17 = vsel %vm6215_vm0, 4294967295, %v8056_v17  ;;  %vm8060_vm8 = vnez %v8059_v35  ;;  %v8061_v57 = vmov 0  ;;  %v1825_v63 = vadd.s32 %v1824_v13, %v1822_v22 }
 0x5eb   : > { %8058 = vst [vmem:[#allocation34_spill] sm:$0xff] %v8057_v17  ;;  %vm6224_vm1 = vmor %vm8060_vm8, %vm1864_vm15  ;;  %v6228_v31 = vcvt.s32.f32 %v2015_v51  ;;  %v6233_v38 = vsel %vm6215_vm0, 2147483647, %v8064_v1  ;;  %v1811_v40 = vadd.s32 %v1810_v10, %v1808_v62  ;;  %2032 = vmin.xlane.f32.xlu1 %v6220_v5  ;;  %v1849_v47 = vpop.xlane.xlu1 %1848  ;;  %v1852_v53 = vshll.u32 %v1851_v28, 16  ;;  %v8070_v51 = vld [vmem:[#allocation28_spill] sm:$0xff] }
 0x5ec   : > { %v8062_v57 = vsel %vm6224_vm1, 4294967295, %v8061_v57  ;;  %v2057_v20 = vshra.s32 %v6233_v38, 16  ;;  %v6240_v25 = vsel %vm6224_vm1, 2147483647, %v8065_v50  ;;  %vm1867_vm8 = vcmp.eq.s32.totalorder %v5913_v49, %v1825_v63  ;;  %v1835_v26 = vpop.xlane.xlu0 %1834 }
 0x5ed   : > { %8063 = vst [vmem:[#allocation32_spill] sm:$0xff] %v8062_v57  ;;  %v1850_v13 = vcvt.f32.s32 %v1849_v47  ;;  %2018 = vmin.xlane.f32.xlu0 %v6228_v31  ;;  %v2043_v46 = vshra.s32 %v6240_v25, 16  ;;  %v1838_v10 = vshll.u32 %v1837_v7, 16  ;;  %vm6247_vm12 = vmor %vm5895_vm7, %vm1867_vm8  ;;  %v8067_v27 = vmov 0  ;;  %v8075_v7 = vld [vmem:[#allocation21_spill] sm:$0xff] }
 0x5ee   : > { %v8068_v27 = vsel %vm6247_vm12, 4294967295, %v8067_v27  ;;  %vm1866_vm3 = vcmp.eq.s32.totalorder %v8070_v51, %v1811_v40  ;;  %v1836_v19 = vcvt.f32.s32 %v1835_v26  ;;  %v6252_v62 = vcvt.s32.f32 %v2057_v20  ;;  %v8076_v20 = vld [vmem:[#allocation22_spill] sm:$0xff]  ;;  %v8078_v51 = vld [vmem:[#allocation29_spill] sm:$0xff] }
 0x5ef   : > { %8069 = vst [vmem:[#allocation25_spill] sm:$0xff] %v8068_v27  ;;  %vm6256_vm15 = vmor %vm5904_vm4, %vm1866_vm3  ;;  %v8072_v49 = vmov 0  ;;  %v1853_v35 = vadd.s32 %v1852_v53, %v1850_v13  ;;  %v6260_v63 = vcvt.s32.f32 %v2043_v46  ;;  %v6265_v47 = vsel %vm6247_vm12, 2147483647, %v8075_v7 }
 0x5f0   : > { %v8073_v49 = vsel %vm6256_vm15, 4294967295, %v8072_v49  ;;  %v1839_v22 = vadd.s32 %v1838_v10, %v1836_v19  ;;  %2060 = vmin.xlane.f32.xlu1 %v6252_v62  ;;  %v2085_v40 = vshra.s32 %v6265_v47, 16  ;;  %v6272_v26 = vsel %vm6256_vm15, 2147483647, %v8076_v20  ;;  %v8083_v10 = vld [vmem:[#allocation30_spill] sm:$0xff] }
 0x5f1   : > { %8074 = vst [vmem:[#allocation26_spill] sm:$0xff] %v8073_v49  ;;  %8077 = vst [vmem:[#allocation28_spill] sm:$0xff] %v6272_v26  ;;  %vm1869_vm4 = vcmp.eq.s32.totalorder %v8078_v51, %v1853_v35  ;;  %2046 = vmin.xlane.f32.xlu0 %v6260_v63  ;;  %v2071_v53 = vshra.s32 %v6272_v26, 16  ;;  %v8080_v46 = vmov 0  ;;  %v8085_v20 = vmov 0  ;;  %v8088_v51 = vld [vmem:[#allocation23_spill] sm:$0xff] }
 0x5f2   : > { %vm6279_vm7 = vmor %vm5927_vm14, %vm1869_vm4  ;;  %vm1868_vm8 = vcmp.eq.s32.totalorder %v8083_v10, %v1839_v22  ;;  %v6284_v19 = vcvt.s32.f32 %v2085_v40  ;;  %v8090_v22 = vld [vmem:[#allocation24_spill] sm:$0xff]  ;;  %v1972_v17 = vand.u32 65535, %v6131_v3 }
 0x5f3   : > { %v8081_v46 = vsel %vm6279_vm7, 4294967295, %v8080_v46  ;;  %vm6288_vm3 = vmor %vm5936_vm2, %vm1868_vm8  ;;  %v6292_v35 = vcvt.s32.f32 %v2071_v53  ;;  %v6297_v13 = vsel %vm6279_vm7, 2147483647, %v8088_v51  ;;  %v1916_v51 = vand.u32 65535, %v6065_v61 }
 0x5f4   : > { %8082 = vst [vmem:[#allocation27_spill] sm:$0xff] %v8081_v46  ;;  %v8086_v20 = vsel %vm6288_vm3, 4294967295, %v8085_v20  ;;  %8089 = vst [vmem:[#allocation31_spill] sm:$0xff] %v6297_v13  ;;  %2088 = vmin.xlane.f32.xlu1 %v6284_v19  ;;  %v2113_v7 = vshra.s32 %v6297_v13, 16  ;;  %v6304_v40 = vsel %vm6288_vm3, 2147483647, %v8090_v22 }
 0x5f5   : > { %8087 = vst [vmem:[#allocation29_spill] sm:$0xff] %v8086_v20  ;;  %8091 = vst [vmem:[#allocation30_spill] sm:$0xff] %v6304_v40  ;;  %2074 = vmin.xlane.f32.xlu0 %v6292_v35  ;;  %v2099_v10 = vshra.s32 %v6304_v40, 16  ;;  %v1902_v46 = vand.u32 65535, %v6071_v21  ;;  %v1918_v22 = vcvt.s32.f32 %v1916_v51  ;;  %v1944_v20 = vand.u32 65535, %v6098_v16 }
 0x5f6   : > { %v6308_v53 = vcvt.s32.f32 %v2113_v7 }
 0x5f7   : > { %v6310_v28 = vcvt.s32.f32 %v2099_v10  ;;  %v1904_v7 = vcvt.s32.f32 %v1902_v46  ;;  %v1930_v10 = vand.u32 65535, %v6106_v55  ;;  %v1946_v51 = vcvt.s32.f32 %v1944_v20 }
 0x5f8   : > { %2116 = vmin.xlane.f32.xlu1 %v6308_v53  ;;  %v1958_v46 = vand.u32 65535, %v6138_v23  ;;  %v2000_v20 = vand.u32 65535, %v6166_v2 }
 0x5f9   : > { %2102 = vmin.xlane.f32.xlu0 %v6310_v28 }
 0x666   : > { %v6316_v49 = vpop.xlane.xlu1 %1920 }
 0x667   : > { %v6319_v27 = vpop.xlane.xlu0 %1906  ;;  %vm1922_vm14 = vcmp.eq.f32.partialorder %v6084_v44, %v6316_v49  ;;  %v1932_v44 = vcvt.s32.f32 %v1930_v10  ;;  %v1986_v10 = vand.u32 65535, %v6174_v56 }
 0x668   : > { %v1923_v50 = vsel %vm1922_vm14, %v1918_v22, inf  ;;  %vm1908_vm2 = vcmp.eq.f32.partialorder %v6093_v6, %v6319_v27 }
 0x669   : > { %1924 = vmin.xlane.f32.xlu1 %v1923_v50  ;;  %v1909_v1 = vsel %vm1908_vm2, %v1904_v7, inf }
 0x66a   : > { %v6326_v57 = vpop.xlane.xlu1 %1948  ;;  %1910 = vmin.xlane.f32.xlu0 %v1909_v1  ;;  %v1974_v1 = vcvt.s32.f32 %v1972_v17  ;;  %v2002_v17 = vcvt.s32.f32 %v2000_v20 }
 0x66b   : > { %v6329_v48 = vpop.xlane.xlu0 %1934  ;;  %vm1950_vm4 = vcmp.eq.f32.partialorder %v6118_v15, %v6326_v57  ;;  %v1960_v15 = vcvt.s32.f32 %v1958_v46  ;;  %v2014_v46 = vand.u32 65535, %v6206_v24 }
 0x66c   : > { %v1951_v22 = vsel %vm1950_vm4, %v1946_v51, inf  ;;  %vm1936_vm8 = vcmp.eq.f32.partialorder %v6126_v36, %v6329_v48 }
 0x66d   : > { %1952 = vmin.xlane.f32.xlu1 %v1951_v22  ;;  %v1937_v6 = vsel %vm1936_vm8, %v1932_v44, inf  ;;  %v2028_v22 = vand.u32 65535, %v6199_v11 }
 0x66e   : > { %v6336_v50 = vpop.xlane.xlu1 %1976  ;;  %1938 = vmin.xlane.f32.xlu0 %v1937_v6 }
 0x66f   : > { %v6339_v7 = vpop.xlane.xlu0 %1962  ;;  %vm1978_vm14 = vcmp.eq.f32.partialorder %v6152_v42, %v6336_v50  ;;  %v1988_v42 = vcvt.s32.f32 %v1986_v10  ;;  %v2030_v20 = vcvt.s32.f32 %v2028_v22  ;;  %v2042_v10 = vand.u32 65535, %v6240_v25 }
 0x670   : > { %v1979_v51 = vsel %vm1978_vm14, %v1974_v1, inf  ;;  %vm1964_vm2 = vcmp.eq.f32.partialorder %v6161_v33, %v6339_v7 }
 0x671   : > { %1980 = vmin.xlane.f32.xlu1 %v1979_v51  ;;  %v1965_v36 = vsel %vm1964_vm2, %v1960_v15, inf  ;;  %v2056_v51 = vand.u32 65535, %v6233_v38 }
 0x672   : > { %v6346_v44 = vpop.xlane.xlu1 %2004  ;;  %1966 = vmin.xlane.f32.xlu0 %v1965_v36 }
 0x673   : > { %vm2006_vm4 = vcmp.eq.f32.partialorder %v6186_v12, %v6346_v44  ;;  %v2016_v12 = vcvt.s32.f32 %v2014_v46  ;;  %v2058_v22 = vcvt.s32.f32 %v2056_v51  ;;  %v2070_v46 = vand.u32 65535, %v6272_v26 }
 0x674   : > { %v6349_v6 = vpop.xlane.xlu0 %1990  ;;  %v2007_v1 = vsel %vm2006_vm4, %v2002_v17, inf  ;;  %v2011_v0 = vcvt.f32.s32 %v6346_v44 }
 0x675   : > { %vm1992_vm8 = vcmp.eq.f32.partialorder %v6194_v32, %v6349_v6  ;;  %2008 = vmin.xlane.f32.xlu1 %v2007_v1  ;;  %v2084_v1 = vand.u32 65535, %v6265_v47 }
 0x676   : > { %v1993_v33 = vsel %vm1992_vm8, %v1988_v42, inf }
 0x677   : > { %1994 = vmin.xlane.f32.xlu0 %v1993_v33  ;;  %v2086_v51 = vcvt.s32.f32 %v2084_v1 }
 0x678   : > { %v6356_v15 = vpop.xlane.xlu1 %2032 }
 0x679   : > { %vm2034_vm14 = vcmp.eq.f32.partialorder %v6220_v5, %v6356_v15  ;;  %v2044_v5 = vcvt.s32.f32 %v2042_v10  ;;  %v2098_v10 = vand.u32 65535, %v6304_v40  ;;  %v2039_v44 = vcvt.f32.s32 %v6356_v15 }
 0x67a   : > { %v6359_v36 = vpop.xlane.xlu0 %2018  ;;  %v2035_v17 = vsel %vm2034_vm14, %v2030_v20, inf }
 0x67b   : > { %vm2020_vm2 = vcmp.eq.f32.partialorder %v6228_v31, %v6359_v36  ;;  %2036 = vmin.xlane.f32.xlu1 %v2035_v17  ;;  %v2112_v17 = vand.u32 65535, %v6297_v13 }
 0x67c   : > { %v2021_v32 = vsel %vm2020_vm2, %v2016_v12, inf }
 0x67d   : > { %v6366_v42 = vpop.xlane.xlu1 %2060  ;;  %2022 = vmin.xlane.f32.xlu0 %v2021_v32  ;;  %v2114_v1 = vcvt.s32.f32 %v2112_v17  ;;  %v1955_v17 = vcvt.f32.s32 %v6326_v57 }
 0x67e   : > { %v6369_v33 = vpop.xlane.xlu0 %2046  ;;  %vm2062_vm4 = vcmp.eq.f32.partialorder %v6252_v62, %v6366_v42  ;;  %v2072_v62 = vcvt.s32.f32 %v2070_v46 }
 0x67f   : > { %v2063_v20 = vsel %vm2062_vm4, %v2058_v22, inf  ;;  %vm2048_vm8 = vcmp.eq.f32.partialorder %v6260_v63, %v6369_v33 }
 0x680   : > { %2064 = vmin.xlane.f32.xlu1 %v2063_v20  ;;  %v2049_v31 = vsel %vm2048_vm8, %v2044_v5, inf }
 0x681   : > { %v6376_v12 = vpop.xlane.xlu1 %2088  ;;  %2050 = vmin.xlane.f32.xlu0 %v2049_v31  ;;  %v2100_v31 = vcvt.s32.f32 %v2098_v10 }
 0x682   : > { %v6379_v32 = vpop.xlane.xlu0 %2074  ;;  %vm2090_vm14 = vcmp.eq.f32.partialorder %v6284_v19, %v6376_v12 }
 0x683   : > { %v2091_v22 = vsel %vm2090_vm14, %v2086_v51, inf  ;;  %vm2076_vm2 = vcmp.eq.f32.partialorder %v6292_v35, %v6379_v32  ;;  %v1927_v35 = vcvt.f32.s32 %v6316_v49  ;;  %v1913_v51 = vcvt.f32.s32 %v6319_v27 }
 0x684   : > { %2092 = vmin.xlane.f32.xlu1 %v2091_v22  ;;  %v2077_v63 = vsel %vm2076_vm2, %v2072_v62, inf  ;;  %v1956_v49 = vshll.u32 %v1955_v17, 16 }
 0x685   : > { %v6386_v5 = vpop.xlane.xlu1 %2116  ;;  %2078 = vmin.xlane.f32.xlu0 %v2077_v63  ;;  %v1928_v22 = vshll.u32 %v1927_v35, 16  ;;  %v1914_v13 = vshll.u32 %v1913_v51, 16 }
 0x686   : > { %v6388_v20 = vpop.xlane.xlu0 %2102  ;;  %vm2118_vm4 = vcmp.eq.f32.partialorder %v6308_v53, %v6386_v5  ;;  %v1941_v53 = vcvt.f32.s32 %v6329_v48 }
 0x687   : > { %v2119_v19 = vsel %vm2118_vm4, %v2114_v1, inf  ;;  %vm2104_vm8 = vcmp.eq.f32.partialorder %v6310_v28, %v6388_v20  ;;  %v1983_v1 = vcvt.f32.s32 %v6336_v50 }
 0x688   : > { %2120 = vmin.xlane.f32.xlu1 %v2119_v19  ;;  %v2105_v46 = vsel %vm2104_vm8, %v2100_v31, inf  ;;  %v1969_v31 = vcvt.f32.s32 %v6339_v7  ;;  %v1942_v26 = vshll.u32 %v1941_v53, 16  ;;  %v1997_v53 = vcvt.f32.s32 %v6349_v6 }
 0x689   : > { %2106 = vmin.xlane.f32.xlu0 %v2105_v46 }
 0x68a   : > { %v1970_v14 = vshll.u32 %v1969_v31, 16 }
 0x6f6   : > { %v1925_v62 = vpop.xlane.xlu1 %1924 }
 0x6f7   : > { %v1926_v63 = vcvt.f32.s32 %v1925_v62  ;;  %v1911_v40 = vpop.xlane.xlu0 %1910 }
 0x6f8   : > { %v1912_v10 = vcvt.f32.s32 %v1911_v40  ;;  %v1984_v40 = vshll.u32 %v1983_v1, 16 }
 0x6f9   : > { %v1929_v28 = vadd.s32 %v1928_v22, %v1926_v63 }
 0x6fa   : > { %v1915_v19 = vadd.s32 %v1914_v13, %v1912_v10  ;;  %v1953_v46 = vpop.xlane.xlu1 %1952 }
 0x6fb   : > { %vm2127_vm14 = vcmp.eq.s32.totalorder %v6065_v61, %v1929_v28  ;;  %v1954_v27 = vcvt.f32.s32 %v1953_v46  ;;  %v1939_v35 = vpop.xlane.xlu0 %1938  ;;  %v2012_v46 = vshll.u32 %v2011_v0, 16 }
 0x6fc   : > { %vm6403_vm2 = vmor %vm6051_vm10, %vm2127_vm14  ;;  %vm2126_vm4 = vcmp.eq.s32.totalorder %v6071_v21, %v1915_v19  ;;  %v1940_v48 = vcvt.f32.s32 %v1939_v35  ;;  %v1998_v35 = vshll.u32 %v1997_v53, 16 }
 0x6fd   : > { %vm6410_vm8 = vmor %vm6058_vm6, %vm2126_vm4  ;;  %v1957_v61 = vadd.s32 %v1956_v49, %v1954_v27  ;;  %v6417_v50 = vsel %vm6403_vm2, 2147483647, %v4745_v39 }
 0x6fe   : > { %v1943_v7 = vadd.s32 %v1942_v26, %v1940_v48  ;;  %v1981_v51 = vpop.xlane.xlu1 %1980  ;;  %v2189_v62 = vshra.s32 %v6417_v50, 16  ;;  %v6423_v21 = vsel %vm6410_vm8, 2147483647, %v4749_v41  ;;  %v8100_v48 = vmov 0 }
 0x6ff   : > { %vm2129_vm10 = vcmp.eq.s32.totalorder %v6098_v16, %v1957_v61  ;;  %v1982_v22 = vcvt.f32.s32 %v1981_v51  ;;  %v1967_v17 = vpop.xlane.xlu0 %1966  ;;  %v2175_v63 = vshra.s32 %v6423_v21, 16  ;;  %v8159_v26 = vmov 0 }
 0x700   : > { %vm6431_vm6 = vmor %vm6079_vm13, %vm2129_vm10  ;;  %vm2128_vm14 = vcmp.eq.s32.totalorder %v6106_v55, %v1943_v7  ;;  %v1968_v10 = vcvt.f32.s32 %v1967_v17  ;;  %v6436_v1 = vcvt.s32.f32 %v2189_v62  ;;  %v2025_v55 = vcvt.f32.s32 %v6359_v36 }
 0x701   : > { %vm6441_vm4 = vmor %vm6089_vm5, %vm2128_vm14  ;;  %v1985_v6 = vadd.s32 %v1984_v40, %v1982_v22  ;;  %v6445_v28 = vcvt.s32.f32 %v2175_v63  ;;  %v6450_v37 = vsel %vm6431_vm6, 2147483647, %v4763_v54  ;;  %v2067_v17 = vcvt.f32.s32 %v6366_v42 }
 0x702   : > { %v1971_v31 = vadd.s32 %v1970_v14, %v1968_v10  ;;  %2192 = vmin.xlane.f32.xlu1 %v6436_v1  ;;  %v2009_v15 = vpop.xlane.xlu1 %2008  ;;  %v2217_v18 = vshra.s32 %v6450_v37, 16  ;;  %v6458_v19 = vsel %vm6441_vm4, 2147483647, %v4769_v58  ;;  %v2040_v14 = vshll.u32 %v2039_v44, 16 }
 0x703   : > { %vm2131_vm13 = vcmp.eq.s32.totalorder %v6131_v3, %v1985_v6  ;;  %v2010_v49 = vcvt.f32.s32 %v2009_v15  ;;  %2178 = vmin.xlane.f32.xlu0 %v6445_v28  ;;  %v2203_v36 = vshra.s32 %v6458_v19, 16  ;;  %v8102_v3 = vmov 0 }
 0x704   : > { %v1995_v27 = vpop.xlane.xlu0 %1994  ;;  %vm6465_vm5 = vmor %vm6113_vm9, %vm2131_vm13  ;;  %vm2130_vm10 = vcmp.eq.s32.totalorder %v6138_v23, %v1971_v31  ;;  %v6470_v61 = vcvt.s32.f32 %v2217_v18  ;;  %v2026_v62 = vshll.u32 %v2025_v55, 16  ;;  %v2053_v44 = vcvt.f32.s32 %v6369_v33 }
 0x705   : > { %v8101_v48 = vsel %vm6465_vm5, 4294967295, %v8100_v48  ;;  %v1996_v40 = vcvt.f32.s32 %v1995_v27  ;;  %vm6474_vm14 = vmor %vm6122_vm11, %vm2130_vm10  ;;  %v2013_v7 = vadd.s32 %v2012_v46, %v2010_v49  ;;  %v6478_v51 = vcvt.s32.f32 %v2203_v36 }
 0x706   : > { %v8103_v3 = vsel %vm6474_vm14, 4294967295, %v8102_v3  ;;  %v6483_v29 = vsel %vm6465_vm5, 2147483647, %v4787_v8  ;;  %2220 = vmin.xlane.f32.xlu1 %v6470_v61  ;;  %v6490_v43 = vsel %vm6474_vm14, 2147483647, %v4793_v9  ;;  %vm8104_vm11 = vnez %v8044_v52 }
 0x707   : > { %v1999_v23 = vadd.s32 %v1998_v35, %v1996_v40  ;;  %v2245_v22 = vshra.s32 %v6483_v29, 16  ;;  %vm2133_vm9 = vcmp.eq.s32.totalorder %v6166_v2, %v2013_v7  ;;  %2206 = vmin.xlane.f32.xlu0 %v6478_v51  ;;  %v2231_v10 = vshra.s32 %v6490_v43, 16 }
 0x708   : > { %v2037_v0 = vpop.xlane.xlu1 %2036  ;;  %vm6499_vm13 = vmor %vm8104_vm11, %vm2133_vm9  ;;  %v8105_v6 = vmov 0  ;;  %v2095_v2 = vcvt.f32.s32 %v6376_v12  ;;  %vm8107_vm14 = vnez %v8046_v45  ;;  %v8108_v31 = vmov 0 }
 0x709   : > { %v2038_v63 = vcvt.f32.s32 %v2037_v0  ;;  %v8106_v6 = vsel %vm6499_vm13, 4294967295, %v8105_v6  ;;  %vm2132_vm10 = vcmp.eq.s32.totalorder %v6174_v56, %v1999_v23  ;;  %v6504_v42 = vcvt.s32.f32 %v2245_v22 }
 0x70a   : > { %v2023_v53 = vpop.xlane.xlu0 %2022  ;;  %vm6509_vm5 = vmor %vm8107_vm14, %vm2132_vm10  ;;  %v6513_v15 = vcvt.s32.f32 %v2231_v10  ;;  %v6518_v52 = vsel %vm6499_vm13, 2147483647, %v4811_v30  ;;  %v2081_v56 = vcvt.f32.s32 %v6379_v32  ;;  %v2068_v49 = vshll.u32 %v2067_v17, 16 }
 0x70b   : > { %v2024_v55 = vcvt.f32.s32 %v2023_v53  ;;  %v8109_v31 = vsel %vm6509_vm5, 4294967295, %v8108_v31  ;;  %v2041_v33 = vadd.s32 %v2040_v14, %v2038_v63  ;;  %2248 = vmin.xlane.f32.xlu1 %v6504_v42  ;;  %v2273_v45 = vshra.s32 %v6518_v52, 16 }
 0x70c   : > { %v6526_v46 = vsel %vm6509_vm5, 2147483647, %v4817_v34  ;;  %2234 = vmin.xlane.f32.xlu0 %v6513_v15  ;;  %v2054_v35 = vshll.u32 %v2053_v44, 16  ;;  %vm8110_vm9 = vnez %v8049_v59  ;;  %vm8113_vm5 = vnez %v8052_v4  ;;  %v8116_v4 = vld [vmem:[#allocation14_spill] sm:$0xff] }
 0x70d   : > { %v2027_v18 = vadd.s32 %v2026_v62, %v2024_v55  ;;  %v2065_v12 = vpop.xlane.xlu1 %2064  ;;  %vm2135_vm14 = vcmp.eq.s32.totalorder %v6199_v11, %v2041_v33  ;;  %v2259_v32 = vshra.s32 %v6526_v46, 16  ;;  %v6538_v7 = vcvt.s32.f32 %v2273_v45 }
 0x70e   : > { %v2066_v27 = vcvt.f32.s32 %v2065_v12  ;;  %v2051_v36 = vpop.xlane.xlu0 %2050  ;;  %vm6533_vm11 = vmor %vm8110_vm9, %vm2135_vm14  ;;  %v2096_v62 = vshll.u32 %v2095_v2, 16  ;;  %v2082_v22 = vshll.u32 %v2081_v56, 16  ;;  %v2123_v10 = vcvt.f32.s32 %v6386_v5 }
 0x70f   : > { %vm2134_vm10 = vcmp.eq.s32.totalorder %v6206_v24, %v2027_v18  ;;  %v2052_v14 = vcvt.f32.s32 %v2051_v36  ;;  %v6546_v0 = vcvt.s32.f32 %v2259_v32  ;;  %v6551_v59 = vsel %vm6533_vm11, 2147483647, %v4835_v60  ;;  %2276 = vmin.xlane.f32.xlu1 %v6538_v7 }
 0x710   : > { %vm6542_vm13 = vmor %vm8113_vm5, %vm2134_vm10  ;;  %v2069_v23 = vadd.s32 %v2068_v49, %v2066_v27  ;;  %v2301_v63 = vshra.s32 %v6551_v59, 16  ;;  %v2109_v33 = vcvt.f32.s32 %v6388_v20  ;;  %v8118_v18 = vmov 0  ;;  %v8125_v20 = vld [vmem:[#allocation17_spill] sm:$0xff] }
 0x711   : > { %v2055_v24 = vadd.s32 %v2054_v35, %v2052_v14  ;;  %v2093_v17 = vpop.xlane.xlu1 %2092  ;;  %v6558_v53 = vsel %vm6542_vm13, 2147483647, %v8116_v4  ;;  %2262 = vmin.xlane.f32.xlu0 %v6546_v0  ;;  %v8122_v45 = vmov 0  ;;  %v8126_v14 = vld [vmem:[#allocation18_spill] sm:$0xff] }
 0x712   : > { %vm2137_vm5 = vcmp.eq.s32.totalorder %v6233_v38, %v2069_v23  ;;  %v2094_v44 = vcvt.f32.s32 %v2093_v17  ;;  %v2079_v55 = vpop.xlane.xlu0 %2078  ;;  %v2287_v2 = vshra.s32 %v6558_v53, 16  ;;  %v6572_v5 = vcvt.s32.f32 %v2301_v63 }
 0x713   : > { %vm6567_vm14 = vmor %vm6215_vm0, %vm2137_vm5  ;;  %vm2136_vm9 = vcmp.eq.s32.totalorder %v6240_v25, %v2055_v24  ;;  %v2080_v12 = vcvt.f32.s32 %v2079_v55  ;;  %v2124_v24 = vshll.u32 %v2123_v10, 16  ;;  %v8128_v55 = vmov 0 }
 0x714   : > { %v8119_v18 = vsel %vm6567_vm14, 4294967295, %v8118_v18  ;;  %vm6576_vm10 = vmor %vm6224_vm1, %vm2136_vm9  ;;  %v2097_v49 = vadd.s32 %v2096_v62, %v2094_v44  ;;  %v6580_v27 = vcvt.s32.f32 %v2287_v2  ;;  %v6585_v36 = vsel %vm6567_vm14, 2147483647, %v8125_v20  ;;  %2304 = vmin.xlane.f32.xlu1 %v6572_v5  ;;  %v8131_v2 = vld [vmem:[#allocation28_spill] sm:$0xff] }
 0x715   : > { %8120 = vst [vmem:[#allocation33_spill] sm:$0xff] %v8119_v18  ;;  %v8123_v45 = vsel %vm6576_vm10, 4294967295, %v8122_v45  ;;  %v2083_v32 = vadd.s32 %v2082_v22, %v2080_v12  ;;  %v2121_v25 = vpop.xlane.xlu1 %2120  ;;  %v2329_v35 = vshra.s32 %v6585_v36, 16  ;;  %v6592_v23 = vsel %vm6576_vm10, 2147483647, %v8126_v14 }
 0x716   : > { %8124 = vst [vmem:[#allocation34_spill] sm:$0xff] %v8123_v45  ;;  %vm2139_vm1 = vcmp.eq.s32.totalorder %v6265_v47, %v2097_v49  ;;  %v2122_v62 = vcvt.f32.s32 %v2121_v25  ;;  %2290 = vmin.xlane.f32.xlu0 %v6580_v27  ;;  %v2107_v17 = vpop.xlane.xlu0 %2106  ;;  %v2315_v63 = vshra.s32 %v6592_v23, 16  ;;  %v2110_v22 = vshll.u32 %v2109_v33, 16  ;;  %v8136_v33 = vld [vmem:[#allocation21_spill] sm:$0xff] }
 0x717   : > { %vm6599_vm0 = vmor %vm6247_vm12, %vm2139_vm1  ;;  %vm2138_vm5 = vcmp.eq.s32.totalorder %v8131_v2, %v2083_v32  ;;  %v2108_v56 = vcvt.f32.s32 %v2107_v17  ;;  %v6604_v12 = vcvt.s32.f32 %v2329_v35  ;;  %v8133_v47 = vmov 0  ;;  %v8137_v35 = vld [vmem:[#allocation22_spill] sm:$0xff]  ;;  %v8139_v2 = vld [vmem:[#allocation31_spill] sm:$0xff] }
 0x718   : > { %v8129_v55 = vsel %vm6599_vm0, 4294967295, %v8128_v55  ;;  %vm6608_vm9 = vmor %vm6256_vm15, %vm2138_vm5  ;;  %v2125_v38 = vadd.s32 %v2124_v24, %v2122_v62  ;;  %v6612_v49 = vcvt.s32.f32 %v2315_v63  ;;  %v6617_v25 = vsel %vm6599_vm0, 2147483647, %v8136_v33 }
 0x719   : > { %8130 = vst [vmem:[#allocation32_spill] sm:$0xff] %v8129_v55  ;;  %v8134_v47 = vsel %vm6608_vm9, 4294967295, %v8133_v47  ;;  %v2111_v44 = vadd.s32 %v2110_v22, %v2108_v56  ;;  %2332 = vmin.xlane.f32.xlu1 %v6604_v12  ;;  %v2357_v32 = vshra.s32 %v6617_v25, 16  ;;  %v6624_v17 = vsel %vm6608_vm9, 2147483647, %v8137_v35  ;;  %v8144_v22 = vld [vmem:[#allocation30_spill] sm:$0xff] }
 0x71a   : > { %8135 = vst [vmem:[#allocation25_spill] sm:$0xff] %v8134_v47  ;;  %8138 = vst [vmem:[#allocation28_spill] sm:$0xff] %v6624_v17  ;;  %vm2141_vm12 = vcmp.eq.s32.totalorder %v8139_v2, %v2125_v38  ;;  %2318 = vmin.xlane.f32.xlu0 %v6612_v49  ;;  %v2343_v24 = vshra.s32 %v6624_v17, 16  ;;  %v8141_v63 = vmov 0  ;;  %v8146_v35 = vmov 0  ;;  %v8149_v2 = vld [vmem:[#allocation23_spill] sm:$0xff] }
 0x71b   : > { %vm6631_vm15 = vmor %vm6279_vm7, %vm2141_vm12  ;;  %vm2140_vm1 = vcmp.eq.s32.totalorder %v8144_v22, %v2111_v44  ;;  %v6636_v56 = vcvt.s32.f32 %v2357_v32  ;;  %v8151_v44 = vld [vmem:[#allocation24_spill] sm:$0xff]  ;;  %v2244_v18 = vand.u32 65535, %v6483_v29 }
 0x71c   : > { %v8142_v63 = vsel %vm6631_vm15, 4294967295, %v8141_v63  ;;  %vm6640_vm5 = vmor %vm6288_vm3, %vm2140_vm1  ;;  %v6644_v38 = vcvt.s32.f32 %v2343_v24  ;;  %v6649_v62 = vsel %vm6631_vm15, 2147483647, %v8149_v2  ;;  %v2188_v2 = vand.u32 65535, %v6417_v50 }
 0x71d   : > { %8143 = vst [vmem:[#allocation26_spill] sm:$0xff] %v8142_v63  ;;  %v8147_v35 = vsel %vm6640_vm5, 4294967295, %v8146_v35  ;;  %8150 = vst [vmem:[#allocation27_spill] sm:$0xff] %v6649_v62  ;;  %2360 = vmin.xlane.f32.xlu1 %v6636_v56  ;;  %v2385_v47 = vshra.s32 %v6649_v62, 16  ;;  %v6656_v32 = vsel %vm6640_vm5, 2147483647, %v8151_v44 }
 0x71e   : > { %8148 = vst [vmem:[#allocation31_spill] sm:$0xff] %v8147_v35  ;;  %8152 = vst [vmem:[#allocation30_spill] sm:$0xff] %v6656_v32  ;;  %2346 = vmin.xlane.f32.xlu0 %v6644_v38  ;;  %v2371_v22 = vshra.s32 %v6656_v32, 16  ;;  %v2174_v63 = vand.u32 65535, %v6423_v21  ;;  %v2190_v44 = vcvt.s32.f32 %v2188_v2  ;;  %v2216_v35 = vand.u32 65535, %v6450_v37 }
 0x71f   : > { %v6660_v24 = vcvt.s32.f32 %v2385_v47 }
 0x720   : > { %v6662_v10 = vcvt.s32.f32 %v2371_v22  ;;  %v2176_v47 = vcvt.s32.f32 %v2174_v63  ;;  %v2202_v22 = vand.u32 65535, %v6458_v19  ;;  %v2218_v2 = vcvt.s32.f32 %v2216_v35 }
 0x721   : > { %2388 = vmin.xlane.f32.xlu1 %v6660_v24  ;;  %v2230_v63 = vand.u32 65535, %v6490_v43  ;;  %v2272_v35 = vand.u32 65535, %v6518_v52 }
 0x722   : > { %2374 = vmin.xlane.f32.xlu0 %v6662_v10 }
 0x78f   : > { %v6668_v33 = vpop.xlane.xlu1 %2192 }
 0x790   : > { %v6671_v55 = vpop.xlane.xlu0 %2178  ;;  %vm2194_vm7 = vcmp.eq.f32.partialorder %v6436_v1, %v6668_v33  ;;  %v2204_v1 = vcvt.s32.f32 %v2202_v22  ;;  %v2258_v22 = vand.u32 65535, %v6526_v46 }
 0x791   : > { %v2195_v14 = vsel %vm2194_vm7, %v2190_v44, inf  ;;  %vm2180_vm3 = vcmp.eq.f32.partialorder %v6445_v28, %v6671_v55 }
 0x792   : > { %2196 = vmin.xlane.f32.xlu1 %v2195_v14  ;;  %v2181_v45 = vsel %vm2180_vm3, %v2176_v47, inf }
 0x793   : > { %v6678_v20 = vpop.xlane.xlu1 %2220  ;;  %2182 = vmin.xlane.f32.xlu0 %v2181_v45  ;;  %v2246_v45 = vcvt.s32.f32 %v2244_v18  ;;  %v2274_v18 = vcvt.s32.f32 %v2272_v35 }
 0x794   : > { %v6681_v4 = vpop.xlane.xlu0 %2206  ;;  %vm2222_vm12 = vcmp.eq.f32.partialorder %v6470_v61, %v6678_v20  ;;  %v2232_v61 = vcvt.s32.f32 %v2230_v63  ;;  %v2286_v63 = vand.u32 65535, %v6558_v53 }
 0x795   : > { %v2223_v44 = vsel %vm2222_vm12, %v2218_v2, inf  ;;  %vm2208_vm1 = vcmp.eq.f32.partialorder %v6478_v51, %v6681_v4 }
 0x796   : > { %2224 = vmin.xlane.f32.xlu1 %v2223_v44  ;;  %v2209_v28 = vsel %vm2208_vm1, %v2204_v1, inf  ;;  %v2300_v44 = vand.u32 65535, %v6551_v59 }
 0x797   : > { %2210 = vmin.xlane.f32.xlu0 %v2209_v28 }
 0x798   : > { %v6688_v14 = vpop.xlane.xlu1 %2248  ;;  %v2302_v35 = vcvt.s32.f32 %v2300_v44 }
 0x799   : > { %v6691_v47 = vpop.xlane.xlu0 %2234  ;;  %vm2250_vm7 = vcmp.eq.f32.partialorder %v6504_v42, %v6688_v14  ;;  %v2260_v42 = vcvt.s32.f32 %v2258_v22  ;;  %v2314_v22 = vand.u32 65535, %v6592_v23 }
 0x79a   : > { %v2251_v2 = vsel %vm2250_vm7, %v2246_v45, inf  ;;  %vm2236_vm3 = vcmp.eq.f32.partialorder %v6513_v15, %v6691_v47 }
 0x79b   : > { %2252 = vmin.xlane.f32.xlu1 %v2251_v2  ;;  %v2237_v51 = vsel %vm2236_vm3, %v2232_v61, inf  ;;  %v2328_v2 = vand.u32 65535, %v6585_v36 }
 0x79c   : > { %v6698_v1 = vpop.xlane.xlu1 %2276  ;;  %2238 = vmin.xlane.f32.xlu0 %v2237_v51 }
 0x79d   : > { %vm2278_vm12 = vcmp.eq.f32.partialorder %v6538_v7, %v6698_v1  ;;  %v2288_v7 = vcvt.s32.f32 %v2286_v63  ;;  %v2330_v44 = vcvt.s32.f32 %v2328_v2  ;;  %v2342_v63 = vand.u32 65535, %v6624_v17 }
 0x79e   : > { %v6701_v28 = vpop.xlane.xlu0 %2262  ;;  %v2279_v45 = vsel %vm2278_vm12, %v2274_v18, inf }
 0x79f   : > { %vm2264_vm1 = vcmp.eq.f32.partialorder %v6546_v0, %v6701_v28  ;;  %2280 = vmin.xlane.f32.xlu1 %v2279_v45  ;;  %v2356_v45 = vand.u32 65535, %v6617_v25 }
 0x7a0   : > { %v2265_v15 = vsel %vm2264_vm1, %v2260_v42, inf }
 0x7a1   : > { %v6708_v61 = vpop.xlane.xlu1 %2304  ;;  %2266 = vmin.xlane.f32.xlu0 %v2265_v15  ;;  %v2358_v2 = vcvt.s32.f32 %v2356_v45 }
 0x7a2   : > { %vm2306_vm7 = vcmp.eq.f32.partialorder %v6572_v5, %v6708_v61  ;;  %v2316_v5 = vcvt.s32.f32 %v2314_v22  ;;  %v2370_v22 = vand.u32 65535, %v6656_v32 }
 0x7a3   : > { %v6711_v51 = vpop.xlane.xlu0 %2290  ;;  %v2307_v18 = vsel %vm2306_vm7, %v2302_v35, inf }
 0x7a4   : > { %vm2292_vm3 = vcmp.eq.f32.partialorder %v6580_v27, %v6711_v51  ;;  %2308 = vmin.xlane.f32.xlu1 %v2307_v18  ;;  %v2384_v18 = vand.u32 65535, %v6649_v62 }
 0x7a5   : > { %v2293_v0 = vsel %vm2292_vm3, %v2288_v7, inf }
 0x7a6   : > { %v6718_v42 = vpop.xlane.xlu1 %2332  ;;  %2294 = vmin.xlane.f32.xlu0 %v2293_v0  ;;  %v2386_v45 = vcvt.s32.f32 %v2384_v18  ;;  %v2227_v18 = vcvt.f32.s32 %v6678_v20 }
 0x7a7   : > { %v6721_v15 = vpop.xlane.xlu0 %2318  ;;  %vm2334_vm12 = vcmp.eq.f32.partialorder %v6604_v12, %v6718_v42  ;;  %v2344_v12 = vcvt.s32.f32 %v2342_v63 }
 0x7a8   : > { %v2335_v35 = vsel %vm2334_vm12, %v2330_v44, inf  ;;  %vm2320_vm1 = vcmp.eq.f32.partialorder %v6612_v49, %v6721_v15 }
 0x7a9   : > { %2336 = vmin.xlane.f32.xlu1 %v2335_v35  ;;  %v2321_v27 = vsel %vm2320_vm1, %v2316_v5, inf }
 0x7aa   : > { %v6728_v7 = vpop.xlane.xlu1 %2360  ;;  %2322 = vmin.xlane.f32.xlu0 %v2321_v27  ;;  %v2372_v27 = vcvt.s32.f32 %v2370_v22 }
 0x7ab   : > { %v6731_v0 = vpop.xlane.xlu0 %2346  ;;  %vm2362_vm7 = vcmp.eq.f32.partialorder %v6636_v56, %v6728_v7 }
 0x7ac   : > { %v2363_v44 = vsel %vm2362_vm7, %v2358_v2, inf  ;;  %vm2348_vm3 = vcmp.eq.f32.partialorder %v6644_v38, %v6731_v0  ;;  %v2199_v38 = vcvt.f32.s32 %v6668_v33  ;;  %v2185_v2 = vcvt.f32.s32 %v6671_v55 }
 0x7ad   : > { %2364 = vmin.xlane.f32.xlu1 %v2363_v44  ;;  %v2349_v49 = vsel %vm2348_vm3, %v2344_v12, inf  ;;  %v2228_v33 = vshll.u32 %v2227_v18, 16 }
 0x7ae   : > { %v6738_v5 = vpop.xlane.xlu1 %2388  ;;  %2350 = vmin.xlane.f32.xlu0 %v2349_v49  ;;  %v2200_v44 = vshll.u32 %v2199_v38, 16  ;;  %v2186_v62 = vshll.u32 %v2185_v2, 16 }
 0x7af   : > { %v6740_v35 = vpop.xlane.xlu0 %2374  ;;  %vm2390_vm12 = vcmp.eq.f32.partialorder %v6660_v24, %v6738_v5  ;;  %v2213_v24 = vcvt.f32.s32 %v6681_v4  ;;  %v2395_v11 = vcvt.f32.s32 %v6738_v5 }
 0x7b0   : > { %v2391_v56 = vsel %vm2390_vm12, %v2386_v45, inf  ;;  %vm2376_vm1 = vcmp.eq.f32.partialorder %v6662_v10, %v6740_v35  ;;  %v2255_v45 = vcvt.f32.s32 %v6688_v14 }
 0x7b1   : > { %2392 = vmin.xlane.f32.xlu1 %v2391_v56  ;;  %v2377_v63 = vsel %vm2376_vm1, %v2372_v27, inf  ;;  %v2241_v27 = vcvt.f32.s32 %v6691_v47  ;;  %v2214_v17 = vshll.u32 %v2213_v24, 16  ;;  %v2269_v24 = vcvt.f32.s32 %v6701_v28 }
 0x7b2   : > { %2378 = vmin.xlane.f32.xlu0 %v2377_v63 }
 0x7b3   : > { %v2242_v14 = vshll.u32 %v2241_v27, 16 }
 0x81f   : > { %v2197_v12 = vpop.xlane.xlu1 %2196 }
 0x820   : > { %v2198_v49 = vcvt.f32.s32 %v2197_v12  ;;  %v2183_v32 = vpop.xlane.xlu0 %2182 }
 0x821   : > { %v2184_v22 = vcvt.f32.s32 %v2183_v32  ;;  %v2256_v32 = vshll.u32 %v2255_v45, 16 }
 0x822   : > { %v2201_v10 = vadd.s32 %v2200_v44, %v2198_v49  ;;  %v2283_v44 = vcvt.f32.s32 %v6698_v1  ;;  %v2311_v1 = vcvt.f32.s32 %v6708_v61 }
 0x823   : > { %v2187_v56 = vadd.s32 %v2186_v62, %v2184_v22  ;;  %v2225_v63 = vpop.xlane.xlu1 %2224  ;;  %v8157_v22 = vmov 0 }
 0x824   : > { %vm2399_vm7 = vcmp.eq.s32.totalorder %v6417_v50, %v2201_v10  ;;  %v2226_v55 = vcvt.f32.s32 %v2225_v63  ;;  %v2211_v38 = vpop.xlane.xlu0 %2210  ;;  %v2284_v63 = vshll.u32 %v2283_v44, 16 }
 0x825   : > { %vm6755_vm3 = vmor %vm6403_vm2, %vm2399_vm7  ;;  %vm2398_vm12 = vcmp.eq.s32.totalorder %v6423_v21, %v2187_v56  ;;  %v2212_v4 = vcvt.f32.s32 %v2211_v38  ;;  %v2270_v38 = vshll.u32 %v2269_v24, 16 }
 0x826   : > { %v6763_v62 = vsel %vm6755_vm3, 2147483647, %v4745_v39  ;;  %vm6767_vm1 = vmor %vm6410_vm8, %vm2398_vm12  ;;  %v2229_v57 = vadd.s32 %v2228_v33, %v2226_v55 }
 0x827   : > { %v6774_v47 = vsel %vm6767_vm1, 2147483647, %v4749_v41  ;;  %v2215_v21 = vadd.s32 %v2214_v17, %v2212_v4  ;;  %v2461_v12 = vshra.s32 %v6763_v62, 16  ;;  %v8162_v4 = vmov 0 }
 0x828   : > { %v2253_v2 = vpop.xlane.xlu1 %2252  ;;  %vm2401_vm2 = vcmp.eq.s32.totalorder %v6450_v37, %v2229_v57  ;;  %v2447_v49 = vshra.s32 %v6774_v47, 16 }
 0x829   : > { %v2254_v13 = vcvt.f32.s32 %v2253_v2  ;;  %v2239_v18 = vpop.xlane.xlu0 %2238  ;;  %vm6783_vm8 = vmor %vm6431_vm6, %vm2401_vm2  ;;  %vm2400_vm7 = vcmp.eq.s32.totalorder %v6458_v19, %v2215_v21  ;;  %v6788_v45 = vcvt.s32.f32 %v2461_v12  ;;  %v2297_v19 = vcvt.f32.s32 %v6711_v51 }
 0x82a   : > { %v8158_v22 = vsel %vm6783_vm8, 4294967295, %v8157_v22  ;;  %v2240_v17 = vcvt.f32.s32 %v2239_v18  ;;  %v6794_v37 = vsel %vm6783_vm8, 2147483647, %v4763_v54  ;;  %vm6798_vm12 = vmor %vm6441_vm4, %vm2400_vm7  ;;  %v6802_v10 = vcvt.s32.f32 %v2447_v49 }
 0x82b   : > { %v8160_v26 = vsel %vm6798_vm12, 4294967295, %v8159_v26  ;;  %v2257_v28 = vadd.s32 %v2256_v32, %v2254_v13  ;;  %v6808_v61 = vsel %vm6798_vm12, 2147483647, %v4769_v58  ;;  %2464 = vmin.xlane.f32.xlu1 %v6788_v45  ;;  %v2489_v16 = vshra.s32 %v6794_v37, 16 }
 0x82c   : > { %v2243_v27 = vadd.s32 %v2242_v14, %v2240_v17  ;;  %v2281_v56 = vpop.xlane.xlu1 %2280  ;;  %2450 = vmin.xlane.f32.xlu0 %v6802_v10  ;;  %v2475_v51 = vshra.s32 %v6808_v61, 16  ;;  %vm8161_vm4 = vnez %v8101_v48  ;;  %v2312_v14 = vshll.u32 %v2311_v1, 16 }
 0x82d   : > { %vm2403_vm6 = vcmp.eq.s32.totalorder %v6483_v29, %v2257_v28  ;;  %v2282_v33 = vcvt.f32.s32 %v2281_v56  ;;  %v6822_v57 = vcvt.s32.f32 %v2489_v16  ;;  %vm8164_vm12 = vnez %v8103_v3 }
 0x82e   : > { %v2267_v55 = vpop.xlane.xlu0 %2266  ;;  %vm6817_vm2 = vmor %vm8161_vm4, %vm2403_vm6  ;;  %vm2402_vm7 = vcmp.eq.s32.totalorder %v6490_v43, %v2243_v27  ;;  %v8165_v21 = vmov 0  ;;  %v6835_v2 = vcvt.s32.f32 %v2475_v51  ;;  %v2298_v12 = vshll.u32 %v2297_v19, 16 }
 0x82f   : > { %v8163_v4 = vsel %vm6817_vm2, 4294967295, %v8162_v4  ;;  %v2268_v32 = vcvt.f32.s32 %v2267_v55  ;;  %v6827_v29 = vsel %vm6817_vm2, 2147483647, %v4787_v8  ;;  %vm6831_vm8 = vmor %vm8164_vm12, %vm2402_vm7  ;;  %v2285_v48 = vadd.s32 %v2284_v63, %v2282_v33  ;;  %2492 = vmin.xlane.f32.xlu1 %v6822_v57 }
 0x830   : > { %v8166_v21 = vsel %vm6831_vm8, 4294967295, %v8165_v21  ;;  %v6840_v43 = vsel %vm6831_vm8, 2147483647, %v4793_v9  ;;  %v2517_v18 = vshra.s32 %v6827_v29, 16  ;;  %v2339_v3 = vcvt.f32.s32 %v6718_v42  ;;  %2478 = vmin.xlane.f32.xlu0 %v6835_v2 }
 0x831   : > { %v2271_v44 = vadd.s32 %v2270_v38, %v2268_v32  ;;  %v2309_v13 = vpop.xlane.xlu1 %2308  ;;  %vm2405_vm12 = vcmp.eq.s32.totalorder %v6518_v52, %v2285_v48  ;;  %v2503_v17 = vshra.s32 %v6840_v43, 16  ;;  %v2325_v1 = vcvt.f32.s32 %v6721_v15 }
 0x832   : > { %v2310_v49 = vcvt.f32.s32 %v2309_v13  ;;  %vm8167_vm6 = vnez %v8106_v6  ;;  %v6856_v42 = vcvt.s32.f32 %v2517_v18  ;;  %v2367_v52 = vcvt.f32.s32 %v6728_v7 }
 0x833   : > { %v2295_v24 = vpop.xlane.xlu0 %2294  ;;  %vm6851_vm4 = vmor %vm8167_vm6, %vm2405_vm12  ;;  %vm2404_vm7 = vcmp.eq.s32.totalorder %v6526_v46, %v2271_v44  ;;  %vm8170_vm8 = vnez %v8109_v31  ;;  %v6870_v56 = vcvt.s32.f32 %v2503_v17  ;;  %v2353_v46 = vcvt.f32.s32 %v6731_v0 }
 0x834   : > { %v2296_v19 = vcvt.f32.s32 %v2295_v24  ;;  %v6862_v27 = vsel %vm6851_vm4, 2147483647, %v4811_v30  ;;  %vm6866_vm2 = vmor %vm8170_vm8, %vm2404_vm7  ;;  %v2313_v15 = vadd.s32 %v2312_v14, %v2310_v49  ;;  %2520 = vmin.xlane.f32.xlu1 %v6856_v42  ;;  %v2340_v33 = vshll.u32 %v2339_v3, 16 }
 0x835   : > { %v6876_v7 = vsel %vm6866_vm2, 2147483647, %v4817_v34  ;;  %v2545_v31 = vshra.s32 %v6862_v27, 16  ;;  %2506 = vmin.xlane.f32.xlu0 %v6870_v56  ;;  %v2326_v38 = vshll.u32 %v2325_v1, 16  ;;  %v2354_v18 = vshll.u32 %v2353_v46, 16 }
 0x836   : > { %v2299_v16 = vadd.s32 %v2298_v12, %v2296_v19  ;;  %v2337_v63 = vpop.xlane.xlu1 %2336  ;;  %vm2407_vm8 = vcmp.eq.s32.totalorder %v6551_v59, %v2313_v15  ;;  %v2531_v0 = vshra.s32 %v6876_v7, 16  ;;  %v2368_v12 = vshll.u32 %v2367_v52, 16 }
 0x837   : > { %v2338_v55 = vcvt.f32.s32 %v2337_v63  ;;  %v2323_v51 = vpop.xlane.xlu0 %2322  ;;  %vm6885_vm12 = vmor %vm6533_vm11, %vm2407_vm8  ;;  %v6890_v48 = vcvt.s32.f32 %v2545_v31  ;;  %v2381_v15 = vcvt.f32.s32 %v6740_v35  ;;  %v8184_v35 = vmov 0 }
 0x838   : > { %vm2406_vm6 = vcmp.eq.s32.totalorder %v6558_v53, %v2299_v16  ;;  %v2324_v14 = vcvt.f32.s32 %v2323_v51  ;;  %v6895_v59 = vsel %vm6885_vm12, 2147483647, %v4835_v60  ;;  %v6903_v13 = vcvt.s32.f32 %v2531_v0  ;;  %v8177_v53 = vld [vmem:[#allocation14_spill] sm:$0xff] }
 0x839   : > { %vm6899_vm7 = vmor %vm6542_vm13, %vm2406_vm6  ;;  %v2341_v40 = vadd.s32 %v2340_v33, %v2338_v55  ;;  %2548 = vmin.xlane.f32.xlu1 %v6890_v48  ;;  %v2573_v17 = vshra.s32 %v6895_v59, 16  ;;  %v8179_v16 = vmov 0  ;;  %v8187_v0 = vld [vmem:[#allocation18_spill] sm:$0xff] }
 0x83a   : > { %v6908_v3 = vsel %vm6899_vm7, 2147483647, %v8177_v53  ;;  %v2327_v49 = vadd.s32 %v2326_v38, %v2324_v14  ;;  %v2365_v24 = vpop.xlane.xlu1 %2364  ;;  %2534 = vmin.xlane.f32.xlu0 %v6903_v13  ;;  %v2502_v53 = vand.u32 65535, %v6840_v43 }
 0x83b   : > { %vm2409_vm13 = vcmp.eq.s32.totalorder %v6585_v36, %v2341_v40  ;;  %v2366_v1 = vcvt.f32.s32 %v2365_v24  ;;  %v2351_v19 = vpop.xlane.xlu0 %2350  ;;  %v2559_v52 = vshra.s32 %v6908_v3, 16  ;;  %v6924_v5 = vcvt.s32.f32 %v2573_v17  ;;  %v8182_v36 = vld [vmem:[#allocation17_spill] sm:$0xff] }
 0x83c   : > { %vm6919_vm11 = vmor %vm6567_vm14, %vm2409_vm13  ;;  %vm2408_vm8 = vcmp.eq.s32.totalorder %v6592_v23, %v2327_v49  ;;  %v2352_v63 = vcvt.f32.s32 %v2351_v19  ;;  %v2396_v49 = vshll.u32 %v2395_v11, 16  ;;  %v8193_v11 = vld [vmem:[#allocation21_spill] sm:$0xff]  ;;  %v8198_v19 = vld [vmem:[#allocation22_spill] sm:$0xff] }
 0x83d   : > { %v8180_v16 = vsel %vm6919_vm11, 4294967295, %v8179_v16  ;;  %v6929_v31 = vsel %vm6919_vm11, 2147483647, %v8182_v36  ;;  %vm6933_vm6 = vmor %vm6576_vm10, %vm2408_vm8  ;;  %v2369_v55 = vadd.s32 %v2368_v12, %v2366_v1  ;;  %v6937_v51 = vcvt.s32.f32 %v2559_v52  ;;  %2576 = vmin.xlane.f32.xlu1 %v6924_v5 }
 0x83e   : > { %8181 = vst [vmem:[#allocation29_spill] sm:$0xff] %v8180_v16  ;;  %v8185_v35 = vsel %vm6933_vm6, 4294967295, %v8184_v35  ;;  %v6942_v23 = vsel %vm6933_vm6, 2147483647, %v8187_v0  ;;  %v2355_v38 = vadd.s32 %v2354_v18, %v2352_v63  ;;  %v2393_v14 = vpop.xlane.xlu1 %2392  ;;  %v2601_v40 = vshra.s32 %v6929_v31, 16  ;;  %v8192_v18 = vld [vmem:[#allocation28_spill] sm:$0xff] }
 0x83f   : > { %8186 = vst [vmem:[#allocation33_spill] sm:$0xff] %v8185_v35  ;;  %vm2411_vm14 = vcmp.eq.s32.totalorder %v6617_v25, %v2369_v55  ;;  %v2394_v24 = vcvt.f32.s32 %v2393_v14  ;;  %2562 = vmin.xlane.f32.xlu0 %v6937_v51  ;;  %v2379_v12 = vpop.xlane.xlu0 %2378  ;;  %v2587_v17 = vshra.s32 %v6942_v23, 16  ;;  %v2382_v1 = vshll.u32 %v2381_v15, 16 }
 0x840   : > { %vm6951_vm10 = vmor %vm6599_vm0, %vm2411_vm14  ;;  %v8189_v52 = vmov 0  ;;  %vm2410_vm13 = vcmp.eq.s32.totalorder %v8192_v18, %v2355_v38  ;;  %v2380_v46 = vcvt.f32.s32 %v2379_v12  ;;  %v6956_v63 = vcvt.s32.f32 %v2601_v40  ;;  %v8200_v18 = vld [vmem:[#allocation27_spill] sm:$0xff] }
 0x841   : > { %v8190_v52 = vsel %vm6951_vm10, 4294967295, %v8189_v52  ;;  %v6961_v25 = vsel %vm6951_vm10, 2147483647, %v8193_v11  ;;  %vm6965_vm8 = vmor %vm6608_vm9, %vm2410_vm13  ;;  %v8195_v15 = vmov 0  ;;  %v2397_v55 = vadd.s32 %v2396_v49, %v2394_v24  ;;  %v8205_v24 = vld [vmem:[#allocation30_spill] sm:$0xff] }
 0x842   : > { %8191 = vst [vmem:[#allocation34_spill] sm:$0xff] %v8190_v52  ;;  %v8196_v15 = vsel %vm6965_vm8, 4294967295, %v8195_v15  ;;  %v6969_v14 = vcvt.s32.f32 %v2587_v17  ;;  %v6974_v38 = vsel %vm6965_vm8, 2147483647, %v8198_v19  ;;  %v2383_v40 = vadd.s32 %v2382_v1, %v2380_v46  ;;  %2604 = vmin.xlane.f32.xlu1 %v6956_v63  ;;  %v8206_v1 = vld [vmem:[#allocation23_spill] sm:$0xff]  ;;  %v8212_v19 = vld [vmem:[#allocation24_spill] sm:$0xff] }
 0x843   : > { %8197 = vst [vmem:[#allocation32_spill] sm:$0xff] %v8196_v15  ;;  %8199 = vst [vmem:[#allocation28_spill] sm:$0xff] %v6974_v38  ;;  %v2629_v12 = vshra.s32 %v6961_v25, 16  ;;  %vm2413_vm0 = vcmp.eq.s32.totalorder %v8200_v18, %v2397_v55  ;;  %v2615_v33 = vshra.s32 %v6974_v38, 16  ;;  %v8202_v49 = vmov 0 }
 0x844   : > { %2590 = vmin.xlane.f32.xlu0 %v6969_v14  ;;  %vm6983_vm9 = vmor %vm6631_vm15, %vm2413_vm0  ;;  %vm2412_vm14 = vcmp.eq.s32.totalorder %v8205_v24, %v2383_v40  ;;  %v8209_v18 = vmov 0  ;;  %v2474_v52 = vand.u32 65535, %v6808_v61  ;;  %v2516_v16 = vand.u32 65535, %v6827_v29 }
 0x845   : > { %v8203_v49 = vsel %vm6983_vm9, 4294967295, %v8202_v49  ;;  %v6988_v17 = vcvt.s32.f32 %v2629_v12  ;;  %v6993_v46 = vsel %vm6983_vm9, 2147483647, %v8206_v1  ;;  %vm6997_vm13 = vmor %vm6640_vm5, %vm2412_vm14  ;;  %v7001_v11 = vcvt.s32.f32 %v2615_v33 }
 0x846   : > { %8204 = vst [vmem:[#allocation25_spill] sm:$0xff] %v8203_v49  ;;  %8207 = vst [vmem:[#allocation27_spill] sm:$0xff] %v6993_v46  ;;  %v8210_v18 = vsel %vm6997_vm13, 4294967295, %v8209_v18  ;;  %v7006_v15 = vsel %vm6997_vm13, 2147483647, %v8212_v19  ;;  %v2657_v40 = vshra.s32 %v6993_v46, 16 }
 0x847   : > { %8211 = vst [vmem:[#allocation26_spill] sm:$0xff] %v8210_v18  ;;  %8213 = vst [vmem:[#allocation30_spill] sm:$0xff] %v7006_v15  ;;  %2632 = vmin.xlane.f32.xlu1 %v6988_v17  ;;  %v2643_v12 = vshra.s32 %v7006_v15, 16  ;;  %v2460_v33 = vand.u32 65535, %v6763_v62  ;;  %v2446_v19 = vand.u32 65535, %v6774_v47  ;;  %v2488_v49 = vand.u32 65535, %v6794_v37 }
 0x848   : > { %2618 = vmin.xlane.f32.xlu0 %v7001_v11  ;;  %v7012_v24 = vcvt.s32.f32 %v2657_v40 }
 0x849   : > { %v7014_v55 = vcvt.s32.f32 %v2643_v12  ;;  %v2462_v1 = vcvt.s32.f32 %v2460_v33  ;;  %v2448_v12 = vcvt.s32.f32 %v2446_v19  ;;  %v2490_v33 = vcvt.s32.f32 %v2488_v49 }
 0x84a   : > { %v2476_v19 = vcvt.s32.f32 %v2474_v52  ;;  %v2544_v49 = vand.u32 65535, %v6862_v27  ;;  %v2504_v52 = vcvt.s32.f32 %v2502_v53 }
 0x84b   : > { %2660 = vmin.xlane.f32.xlu1 %v7012_v24 }
 0x84c   : > { %2646 = vmin.xlane.f32.xlu0 %v7014_v55 }
 0x8b8   : > { %v7020_v18 = vpop.xlane.xlu1 %2464 }
 0x8b9   : > { %vm2466_vm15 = vcmp.eq.f32.partialorder %v6788_v45, %v7020_v18  ;;  %v7025_v40 = vpop.xlane.xlu0 %2450 }
 0x8ba   : > { %vm2452_vm5 = vcmp.eq.f32.partialorder %v6802_v10, %v7025_v40  ;;  %v2467_v0 = vsel %vm2466_vm15, %v2462_v1, inf }
 0x8bb   : > { %2468 = vmin.xlane.f32.xlu1 %v2467_v0  ;;  %v2453_v35 = vsel %vm2452_vm5, %v2448_v12, inf  ;;  %v2530_v12 = vand.u32 65535, %v6876_v7 }
 0x8bc   : > { %v7030_v36 = vpop.xlane.xlu1 %2492  ;;  %2454 = vmin.xlane.f32.xlu0 %v2453_v35  ;;  %v2518_v35 = vcvt.s32.f32 %v2516_v16  ;;  %v2546_v16 = vcvt.s32.f32 %v2544_v49 }
 0x8bd   : > { %vm2494_vm0 = vcmp.eq.f32.partialorder %v6822_v57, %v7030_v36  ;;  %v7035_v45 = vpop.xlane.xlu0 %2478  ;;  %v2532_v53 = vcvt.s32.f32 %v2530_v12 }
 0x8be   : > { %vm2480_vm14 = vcmp.eq.f32.partialorder %v6835_v2, %v7035_v45  ;;  %v2495_v10 = vsel %vm2494_vm0, %v2490_v33, inf }
 0x8bf   : > { %2496 = vmin.xlane.f32.xlu1 %v2495_v10  ;;  %v2481_v0 = vsel %vm2480_vm14, %v2476_v19, inf  ;;  %v2572_v10 = vand.u32 65535, %v6895_v59 }
 0x8c0   : > { %2482 = vmin.xlane.f32.xlu0 %v2481_v0  ;;  %v2558_v0 = vand.u32 65535, %v6908_v3 }
 0x8c1   : > { %v7040_v1 = vpop.xlane.xlu1 %2520  ;;  %v2574_v49 = vcvt.s32.f32 %v2572_v10 }
 0x8c2   : > { %vm2522_vm15 = vcmp.eq.f32.partialorder %v6856_v42, %v7040_v1  ;;  %v7045_v57 = vpop.xlane.xlu0 %2506  ;;  %v2560_v12 = vcvt.s32.f32 %v2558_v0 }
 0x8c3   : > { %vm2508_vm5 = vcmp.eq.f32.partialorder %v6870_v56, %v7045_v57  ;;  %v2523_v2 = vsel %vm2522_vm15, %v2518_v35, inf }
 0x8c4   : > { %2524 = vmin.xlane.f32.xlu1 %v2523_v2  ;;  %v2509_v33 = vsel %vm2508_vm5, %v2504_v52, inf  ;;  %v2600_v2 = vand.u32 65535, %v6929_v31 }
 0x8c5   : > { %2510 = vmin.xlane.f32.xlu0 %v2509_v33  ;;  %v2586_v33 = vand.u32 65535, %v6942_v23 }
 0x8c6   : > { %v7050_v19 = vpop.xlane.xlu1 %2548  ;;  %v2602_v10 = vcvt.s32.f32 %v2600_v2 }
 0x8c7   : > { %vm2550_vm0 = vcmp.eq.f32.partialorder %v6890_v48, %v7050_v19  ;;  %v7055_v42 = vpop.xlane.xlu0 %2534  ;;  %v2588_v0 = vcvt.s32.f32 %v2586_v33 }
 0x8c8   : > { %vm2536_vm14 = vcmp.eq.f32.partialorder %v6903_v13, %v7055_v42  ;;  %v2551_v56 = vsel %vm2550_vm0, %v2546_v16, inf }
 0x8c9   : > { %2552 = vmin.xlane.f32.xlu1 %v2551_v56  ;;  %v2537_v35 = vsel %vm2536_vm14, %v2532_v53, inf  ;;  %v2628_v56 = vand.u32 65535, %v6961_v25 }
 0x8ca   : > { %v7060_v52 = vpop.xlane.xlu1 %2576  ;;  %2538 = vmin.xlane.f32.xlu0 %v2537_v35  ;;  %v2614_v35 = vand.u32 65535, %v6974_v38 }
 0x8cb   : > { %vm2578_vm15 = vcmp.eq.f32.partialorder %v6924_v5, %v7060_v52  ;;  %v2630_v2 = vcvt.s32.f32 %v2628_v56 }
 0x8cc   : > { %v7065_v48 = vpop.xlane.xlu0 %2562  ;;  %v2579_v13 = vsel %vm2578_vm15, %v2574_v49, inf  ;;  %v2616_v33 = vcvt.s32.f32 %v2614_v35 }
 0x8cd   : > { %vm2564_vm5 = vcmp.eq.f32.partialorder %v6937_v51, %v7065_v48  ;;  %2580 = vmin.xlane.f32.xlu1 %v2579_v13  ;;  %v2656_v13 = vand.u32 65535, %v6993_v46 }
 0x8ce   : > { %v2565_v16 = vsel %vm2564_vm5, %v2560_v12, inf }
 0x8cf   : > { %v7070_v53 = vpop.xlane.xlu1 %2604  ;;  %2566 = vmin.xlane.f32.xlu0 %v2565_v16  ;;  %v2642_v16 = vand.u32 65535, %v7006_v15  ;;  %v2658_v56 = vcvt.s32.f32 %v2656_v13  ;;  %v2499_v13 = vcvt.f32.s32 %v7030_v36  ;;  %v8214_v36 = vmov 0 }
 0x8d0   : > { %vm2606_vm0 = vcmp.eq.f32.partialorder %v6956_v63, %v7070_v53 }
 0x8d1   : > { %v7075_v5 = vpop.xlane.xlu0 %2590  ;;  %v2607_v51 = vsel %vm2606_vm0, %v2602_v10, inf }
 0x8d2   : > { %vm2592_vm14 = vcmp.eq.f32.partialorder %v6969_v14, %v7075_v5  ;;  %2608 = vmin.xlane.f32.xlu1 %v2607_v51 }
 0x8d3   : > { %v2593_v49 = vsel %vm2592_vm14, %v2588_v0, inf }
 0x8d4   : > { %v7080_v12 = vpop.xlane.xlu1 %2632  ;;  %2594 = vmin.xlane.f32.xlu0 %v2593_v49 }
 0x8d5   : > { %vm2634_vm15 = vcmp.eq.f32.partialorder %v6988_v17, %v7080_v12  ;;  %v7085_v63 = vpop.xlane.xlu0 %2618  ;;  %v2644_v17 = vcvt.s32.f32 %v2642_v16  ;;  %v2485_v16 = vcvt.f32.s32 %v7035_v45 }
 0x8d6   : > { %vm2620_vm5 = vcmp.eq.f32.partialorder %v7001_v11, %v7085_v63  ;;  %v2635_v14 = vsel %vm2634_vm15, %v2630_v2, inf  ;;  %v2471_v11 = vcvt.f32.s32 %v7020_v18  ;;  %v2457_v2 = vcvt.f32.s32 %v7025_v40 }
 0x8d7   : > { %2636 = vmin.xlane.f32.xlu1 %v2635_v14  ;;  %v2621_v10 = vsel %vm2620_vm5, %v2616_v33, inf  ;;  %v2500_v18 = vshll.u32 %v2499_v13, 16  ;;  %v2486_v38 = vshll.u32 %v2485_v16, 16 }
 0x8d8   : > { %v7090_v0 = vpop.xlane.xlu1 %2660  ;;  %2622 = vmin.xlane.f32.xlu0 %v2621_v10  ;;  %v2472_v14 = vshll.u32 %v2471_v11, 16  ;;  %v2458_v15 = vshll.u32 %v2457_v2, 16 }
 0x8d9   : > { %vm2662_vm0 = vcmp.eq.f32.partialorder %v7012_v24, %v7090_v0  ;;  %v7094_v51 = vpop.xlane.xlu0 %2646  ;;  %v2667_v44 = vcvt.f32.s32 %v7090_v0 }
 0x8da   : > { %vm2648_vm14 = vcmp.eq.f32.partialorder %v7014_v55, %v7094_v51  ;;  %v2663_v35 = vsel %vm2662_vm0, %v2658_v56, inf  ;;  %v2527_v55 = vcvt.f32.s32 %v7040_v1 }
 0x8db   : > { %2664 = vmin.xlane.f32.xlu1 %v2663_v35  ;;  %v2649_v49 = vsel %vm2648_vm14, %v2644_v17, inf  ;;  %v2513_v17 = vcvt.f32.s32 %v7045_v57 }
 0x8dc   : > { %2650 = vmin.xlane.f32.xlu0 %v2649_v49  ;;  %v2528_v1 = vshll.u32 %v2527_v55, 16 }
 0x948   : > { %v2469_v33 = vpop.xlane.xlu1 %2468 }
 0x949   : > { %v2470_v10 = vcvt.f32.s32 %v2469_v33  ;;  %v2455_v24 = vpop.xlane.xlu0 %2454 }
 0x94a   : > { %v2456_v46 = vcvt.f32.s32 %v2455_v24  ;;  %v8219_v24 = vmov 0 }
 0x94b   : > { %v2473_v56 = vadd.s32 %v2472_v14, %v2470_v10  ;;  %v2541_v10 = vcvt.f32.s32 %v7055_v42 }
 0x94c   : > { %v2459_v35 = vadd.s32 %v2458_v15, %v2456_v46  ;;  %v2497_v49 = vpop.xlane.xlu1 %2496  ;;  %v2514_v46 = vshll.u32 %v2513_v17, 16 }
 0x94d   : > { %vm2671_vm15 = vcmp.eq.s32.totalorder %v6763_v62, %v2473_v56  ;;  %v2498_v40 = vcvt.f32.s32 %v2497_v49  ;;  %v2483_v11 = vpop.xlane.xlu0 %2482  ;;  %v8216_v62 = vmov 0  ;;  %v2542_v49 = vshll.u32 %v2541_v10, 16 }
 0x94e   : > { %vm7107_vm5 = vmor %vm6755_vm3, %vm2671_vm15  ;;  %vm2670_vm0 = vcmp.eq.s32.totalorder %v6774_v47, %v2459_v35  ;;  %v2484_v45 = vcvt.f32.s32 %v2483_v11 }
 0x94f   : > { %v8215_v36 = vsel %vm7107_vm5, 4294967295, %v8214_v36  ;;  %v7115_v15 = vsel %vm7107_vm5, 2147483647, %v4745_v39  ;;  %vm7119_vm14 = vmor %vm6767_vm1, %vm2670_vm0  ;;  %v2501_v20 = vadd.s32 %v2500_v18, %v2498_v40  ;;  %v2555_v39 = vcvt.f32.s32 %v7050_v19 }
 0x950   : > { %v8217_v62 = vsel %vm7119_vm14, 4294967295, %v8216_v62  ;;  %v7126_v57 = vsel %vm7119_vm14, 2147483647, %v4749_v41  ;;  %v2487_v47 = vadd.s32 %v2486_v38, %v2484_v45  ;;  %v2733_v33 = vshra.s32 %v7115_v15, 16 }
 0x951   : > { %v2525_v2 = vpop.xlane.xlu1 %2524  ;;  %vm2673_vm3 = vcmp.eq.s32.totalorder %v6794_v37, %v2501_v20  ;;  %v2719_v13 = vshra.s32 %v7126_v57, 16  ;;  %vm8218_vm1 = vnez %v8158_v22  ;;  %v2583_v19 = vcvt.f32.s32 %v7060_v52 }
 0x952   : > { %v2526_v50 = vcvt.f32.s32 %v2525_v2  ;;  %v2511_v14 = vpop.xlane.xlu0 %2510  ;;  %vm7135_vm15 = vmor %vm8218_vm1, %vm2673_vm3  ;;  %vm2672_vm0 = vcmp.eq.s32.totalorder %v6808_v61, %v2487_v47  ;;  %v7140_v38 = vcvt.s32.f32 %v2733_v33  ;;  %vm8221_vm14 = vnez %v8160_v26 }
 0x953   : > { %v8220_v24 = vsel %vm7135_vm15, 4294967295, %v8219_v24  ;;  %v2512_v41 = vcvt.f32.s32 %v2511_v14  ;;  %v7146_v37 = vsel %vm7135_vm15, 2147483647, %v4763_v54  ;;  %vm7150_vm5 = vmor %vm8221_vm14, %vm2672_vm0  ;;  %v8222_v22 = vmov 0 }
 0x954   : > { %v8223_v22 = vsel %vm7150_vm5, 4294967295, %v8222_v22  ;;  %v2529_v42 = vadd.s32 %v2528_v1, %v2526_v50  ;;  %v7154_v16 = vcvt.s32.f32 %v2719_v13  ;;  %v2569_v61 = vcvt.f32.s32 %v7065_v48  ;;  %2736 = vmin.xlane.f32.xlu1 %v7140_v38 }
 0x955   : > { %v7160_v52 = vsel %vm7150_vm5, 2147483647, %v4769_v58  ;;  %v2515_v55 = vadd.s32 %v2514_v46, %v2512_v41  ;;  %v2761_v26 = vshra.s32 %v7146_v37, 16  ;;  %v2556_v56 = vshll.u32 %v2555_v39, 16 }
 0x956   : > { %v2553_v54 = vpop.xlane.xlu1 %2552  ;;  %vm2675_vm14 = vcmp.eq.s32.totalorder %v6827_v29, %v2529_v42  ;;  %2722 = vmin.xlane.f32.xlu0 %v7154_v16  ;;  %v2747_v48 = vshra.s32 %v7160_v52, 16  ;;  %vm8224_vm3 = vnez %v8163_v4  ;;  %v2584_v11 = vshll.u32 %v2583_v19, 16 }
 0x957   : > { %v2554_v17 = vcvt.f32.s32 %v2553_v54  ;;  %v2539_v35 = vpop.xlane.xlu0 %2538  ;;  %vm7169_vm1 = vmor %vm8224_vm3, %vm2675_vm14  ;;  %vm2674_vm0 = vcmp.eq.s32.totalorder %v6840_v43, %v2515_v55  ;;  %v7174_v40 = vcvt.s32.f32 %v2761_v26  ;;  %vm8227_vm5 = vnez %v8166_v21 }
 0x958   : > { %v2540_v18 = vcvt.f32.s32 %v2539_v35  ;;  %v7179_v29 = vsel %vm7169_vm1, 2147483647, %v4787_v8  ;;  %vm7183_vm15 = vmor %vm8227_vm5, %vm2674_vm0  ;;  %v7187_v1 = vcvt.s32.f32 %v2747_v48  ;;  %v2570_v20 = vshll.u32 %v2569_v61, 16 }
 0x959   : > { %v2557_v4 = vadd.s32 %v2556_v56, %v2554_v17  ;;  %v7192_v43 = vsel %vm7183_vm15, 2147483647, %v4793_v9  ;;  %2764 = vmin.xlane.f32.xlu1 %v7174_v40  ;;  %v2789_v47 = vshra.s32 %v7179_v29, 16  ;;  %v2611_v21 = vcvt.f32.s32 %v7070_v53 }
 0x95a   : > { %v2543_v46 = vadd.s32 %v2542_v49, %v2540_v18  ;;  %v2581_v8 = vpop.xlane.xlu1 %2580  ;;  %2750 = vmin.xlane.f32.xlu0 %v7187_v1  ;;  %v2775_v39 = vshra.s32 %v7192_v43, 16  ;;  %v2597_v50 = vcvt.f32.s32 %v7075_v5 }
 0x95b   : > { %vm2677_vm5 = vcmp.eq.s32.totalorder %v6862_v27, %v2557_v4  ;;  %v2582_v2 = vcvt.f32.s32 %v2581_v8  ;;  %v7208_v53 = vcvt.s32.f32 %v2789_v47  ;;  %v2639_v27 = vcvt.f32.s32 %v7080_v12 }
 0x95c   : > { %v2567_v33 = vpop.xlane.xlu0 %2566  ;;  %vm7203_vm14 = vmor %vm6851_vm4, %vm2677_vm5  ;;  %vm2676_vm3 = vcmp.eq.s32.totalorder %v6876_v7, %v2543_v46  ;;  %v7222_v10 = vcvt.s32.f32 %v2775_v39  ;;  %v2625_v7 = vcvt.f32.s32 %v7085_v63  ;;  %v2612_v19 = vshll.u32 %v2611_v21, 16  ;;  %v8261_v39 = vld [vmem:[#allocation30_spill] sm:$0xff] }
 0x95d   : > { %v2568_v14 = vcvt.f32.s32 %v2567_v33  ;;  %v7214_v13 = vsel %vm7203_vm14, 2147483647, %v4811_v30  ;;  %vm7218_vm0 = vmor %vm6866_vm2, %vm2676_vm3  ;;  %v2585_v5 = vadd.s32 %v2584_v11, %v2582_v2  ;;  %2792 = vmin.xlane.f32.xlu1 %v7208_v53  ;;  %v2598_v55 = vshll.u32 %v2597_v50, 16 }
 0x95e   : > { %v7228_v12 = vsel %vm7218_vm0, 2147483647, %v4817_v34  ;;  %v2817_v6 = vshra.s32 %v7214_v13, 16  ;;  %2778 = vmin.xlane.f32.xlu0 %v7222_v10  ;;  %v2640_v56 = vshll.u32 %v2639_v27, 16  ;;  %v2626_v48 = vshll.u32 %v2625_v7, 16  ;;  %v8246_v27 = vld [vmem:[#allocation18_spill] sm:$0xff] }
 0x95f   : > { %v2571_v41 = vadd.s32 %v2570_v20, %v2568_v14  ;;  %v2609_v30 = vpop.xlane.xlu1 %2608  ;;  %vm2679_vm2 = vcmp.eq.s32.totalorder %v6895_v59, %v2585_v5  ;;  %v2803_v63 = vshra.s32 %v7228_v12, 16  ;;  %v2653_v8 = vcvt.f32.s32 %v7094_v51 }
 0x960   : > { %v2610_v42 = vcvt.f32.s32 %v2609_v30  ;;  %vm7237_vm4 = vmor %vm6885_vm12, %vm2679_vm2  ;;  %v7242_v26 = vcvt.s32.f32 %v2817_v6  ;;  %v2668_v30 = vshll.u32 %v2667_v44, 16  ;;  %v8255_v44 = vld [vmem:[#allocation22_spill] sm:$0xff] }
 0x961   : > { %v2595_v61 = vpop.xlane.xlu0 %2594  ;;  %vm2678_vm5 = vcmp.eq.s32.totalorder %v6908_v3, %v2571_v41  ;;  %v7247_v59 = vsel %vm7237_vm4, 2147483647, %v4835_v60  ;;  %v7255_v35 = vcvt.s32.f32 %v2803_v63  ;;  %v8238_v3 = vld [vmem:[#allocation14_spill] sm:$0xff] }
 0x962   : > { %v2596_v54 = vcvt.f32.s32 %v2595_v61  ;;  %vm7251_vm3 = vmor %vm6899_vm7, %vm2678_vm5  ;;  %v2613_v32 = vadd.s32 %v2612_v19, %v2610_v42  ;;  %2820 = vmin.xlane.f32.xlu1 %v7242_v26  ;;  %v2845_v11 = vshra.s32 %v7247_v59, 16  ;;  %v2654_v61 = vshll.u32 %v2653_v8, 16  ;;  %v8256_v8 = vld [vmem:[#allocation27_spill] sm:$0xff] }
 0x963   : > { %v7260_v49 = vsel %vm7251_vm3, 2147483647, %v8238_v3  ;;  %2806 = vmin.xlane.f32.xlu0 %v7255_v35 }
 0x964   : > { %v2599_v18 = vadd.s32 %v2598_v55, %v2596_v54  ;;  %v2637_v60 = vpop.xlane.xlu1 %2636  ;;  %vm2681_vm12 = vcmp.eq.s32.totalorder %v6929_v31, %v2613_v32  ;;  %v2831_v46 = vshra.s32 %v7260_v49, 16  ;;  %v7276_v0 = vcvt.s32.f32 %v2845_v11  ;;  %v8242_v31 = vld [vmem:[#allocation17_spill] sm:$0xff]  ;;  %v8250_v54 = vld [vmem:[#allocation28_spill] sm:$0xff] }
 0x965   : > { %v2638_v4 = vcvt.f32.s32 %v2637_v60  ;;  %v2623_v20 = vpop.xlane.xlu0 %2622  ;;  %vm7271_vm7 = vmor %vm6919_vm11, %vm2681_vm12 }
 0x966   : > { %vm2680_vm2 = vcmp.eq.s32.totalorder %v6942_v23, %v2599_v18  ;;  %v2624_v2 = vcvt.f32.s32 %v2623_v20  ;;  %v7281_v33 = vsel %vm7271_vm7, 2147483647, %v8242_v31  ;;  %v7289_v14 = vcvt.s32.f32 %v2831_v46  ;;  %2848 = vmin.xlane.f32.xlu1 %v7276_v0 }
 0x967   : > { %vm7285_vm5 = vmor %vm6933_vm6, %vm2680_vm2  ;;  %v2641_v50 = vadd.s32 %v2640_v56, %v2638_v4  ;;  %v2873_v41 = vshra.s32 %v7281_v33, 16  ;;  %v8258_v31 = vmov 0 }
 0x968   : > { %v7294_v23 = vsel %vm7285_vm5, 2147483647, %v8246_v27  ;;  %v2627_v5 = vadd.s32 %v2626_v48, %v2624_v2  ;;  %v2665_v7 = vpop.xlane.xlu1 %2664  ;;  %2834 = vmin.xlane.f32.xlu0 %v7289_v14  ;;  %v8251_v48 = vld [vmem:[#allocation21_spill] sm:$0xff]  ;;  %v8262_v27 = vld [vmem:[#allocation23_spill] sm:$0xff] }
 0x969   : > { %vm2683_vm11 = vcmp.eq.s32.totalorder %v6961_v25, %v2641_v50  ;;  %v2666_v6 = vcvt.f32.s32 %v2665_v7  ;;  %v2651_v19 = vpop.xlane.xlu0 %2650  ;;  %v2859_v42 = vshra.s32 %v7294_v23, 16  ;;  %v7308_v32 = vcvt.s32.f32 %v2873_v41 }
 0x96a   : > { %vm7303_vm6 = vmor %vm6951_vm10, %vm2683_vm11  ;;  %vm2682_vm12 = vcmp.eq.s32.totalorder %v8250_v54, %v2627_v5  ;;  %v2652_v56 = vcvt.f32.s32 %v2651_v19  ;;  %v8265_v41 = vmov 0  ;;  %v2788_v7 = vand.u32 65535, %v7179_v29 }
 0x96b   : > { %v7313_v25 = vsel %vm7303_vm6, 2147483647, %v8251_v48  ;;  %vm7317_vm2 = vmor %vm6965_vm8, %vm2682_vm12  ;;  %v2669_v60 = vadd.s32 %v2668_v30, %v2666_v6  ;;  %v7321_v11 = vcvt.s32.f32 %v2859_v42  ;;  %2876 = vmin.xlane.f32.xlu1 %v7308_v32  ;;  %v8268_v6 = vld [vmem:[#allocation24_spill] sm:$0xff]  ;;  %v2718_v48 = vand.u32 65535, %v7126_v57 }
 0x96c   : > { %v7326_v4 = vsel %vm7317_vm2, 2147483647, %v8255_v44  ;;  %v2655_v20 = vadd.s32 %v2654_v61, %v2652_v56  ;;  %v2901_v46 = vshra.s32 %v7313_v25, 16  ;;  %v2732_v56 = vand.u32 65535, %v7115_v15 }
 0x96d   : > { %vm2685_vm10 = vcmp.eq.s32.totalorder %v8256_v8, %v2669_v60  ;;  %2862 = vmin.xlane.f32.xlu0 %v7321_v11  ;;  %v2887_v47 = vshra.s32 %v7326_v4, 16  ;;  %v2760_v44 = vand.u32 65535, %v7146_v37  ;;  %v2746_v8 = vand.u32 65535, %v7160_v52 }
 0x96e   : > { %vm7335_vm8 = vmor %vm6983_vm9, %vm2685_vm10  ;;  %vm2684_vm11 = vcmp.eq.s32.totalorder %v8261_v39, %v2655_v20  ;;  %v7340_v50 = vcvt.s32.f32 %v2901_v46  ;;  %v2734_v60 = vcvt.s32.f32 %v2732_v56  ;;  %v2720_v46 = vcvt.s32.f32 %v2718_v48 }
 0x96f   : > { %v8259_v31 = vsel %vm7335_vm8, 4294967295, %v8258_v31  ;;  %v7345_v5 = vsel %vm7335_vm8, 2147483647, %v8262_v27  ;;  %vm7349_vm12 = vmor %vm6997_vm13, %vm2684_vm11  ;;  %v7353_v30 = vcvt.s32.f32 %v2887_v47  ;;  %v2762_v27 = vcvt.s32.f32 %v2760_v44 }
 0x970   : > { %8260 = vst [vmem:[#allocation31_spill] sm:$0xff] %v8259_v31  ;;  %8263 = vst [vmem:[#allocation14_spill] sm:$0xff] %v7345_v5  ;;  %v8266_v41 = vsel %vm7349_vm12, 4294967295, %v8265_v41  ;;  %v7358_v19 = vsel %vm7349_vm12, 2147483647, %v8268_v6  ;;  %2904 = vmin.xlane.f32.xlu1 %v7340_v50  ;;  %v2929_v42 = vshra.s32 %v7345_v5, 16  ;;  %v2748_v6 = vcvt.s32.f32 %v2746_v8 }
 0x971   : > { %8267 = vst [vmem:[#allocation29_spill] sm:$0xff] %v8266_v41  ;;  %8269 = vst [vmem:[#allocation17_spill] sm:$0xff] %v7358_v19  ;;  %2890 = vmin.xlane.f32.xlu0 %v7353_v30  ;;  %v2915_v61 = vshra.s32 %v7358_v19, 16  ;;  %v2790_v48 = vcvt.s32.f32 %v2788_v7  ;;  %vm8289_vm12 = vnez %v8217_v62 }
 0x972   : > { %v7364_v63 = vcvt.s32.f32 %v2929_v42  ;;  %v2774_v42 = vand.u32 65535, %v7192_v43 }
 0x973   : > { %v7366_v54 = vcvt.s32.f32 %v2915_v61 }
 0x974   : > { %2932 = vmin.xlane.f32.xlu1 %v7364_v63  ;;  %v2776_v44 = vcvt.s32.f32 %v2774_v42 }
 0x975   : > { %2918 = vmin.xlane.f32.xlu0 %v7366_v54 }
 0x978   : > { %v8310_v18 = vld [vmem:[#allocation29_spill] sm:$0xff] }
 0x9e1   : > { %v7372_v3 = vpop.xlane.xlu1 %2736 }
 0x9e2   : > { %vm2738_vm9 = vcmp.eq.f32.partialorder %v7140_v38, %v7372_v3 }
 0x9e3   : > { %v7377_v20 = vpop.xlane.xlu0 %2722  ;;  %v2739_v47 = vsel %vm2738_vm9, %v2734_v60, inf  ;;  %v2816_v60 = vand.u32 65535, %v7214_v13 }
 0x9e4   : > { %vm2724_vm13 = vcmp.eq.f32.partialorder %v7154_v16, %v7377_v20  ;;  %2740 = vmin.xlane.f32.xlu1 %v2739_v47 }
 0x9e5   : > { %v2725_v2 = vsel %vm2724_vm13, %v2720_v46, inf  ;;  %v2802_v46 = vand.u32 65535, %v7228_v12 }
 0x9e6   : > { %v7382_v39 = vpop.xlane.xlu1 %2764  ;;  %2726 = vmin.xlane.f32.xlu0 %v2725_v2  ;;  %v2818_v2 = vcvt.s32.f32 %v2816_v60 }
 0x9e7   : > { %vm2766_vm10 = vcmp.eq.f32.partialorder %v7174_v40, %v7382_v39  ;;  %v7387_v38 = vpop.xlane.xlu0 %2750  ;;  %v2804_v7 = vcvt.s32.f32 %v2802_v46 }
 0x9e8   : > { %vm2752_vm11 = vcmp.eq.f32.partialorder %v7187_v1, %v7387_v38  ;;  %v2767_v16 = vsel %vm2766_vm10, %v2762_v27, inf  ;;  %v2844_v27 = vand.u32 65535, %v7247_v59 }
 0x9e9   : > { %2768 = vmin.xlane.f32.xlu1 %v2767_v16  ;;  %v2753_v61 = vsel %vm2752_vm11, %v2748_v6, inf  ;;  %v2830_v6 = vand.u32 65535, %v7260_v49 }
 0x9ea   : > { %v7392_v56 = vpop.xlane.xlu1 %2792  ;;  %2754 = vmin.xlane.f32.xlu0 %v2753_v61  ;;  %v2846_v61 = vcvt.s32.f32 %v2844_v27 }
 0x9eb   : > { %vm2794_vm9 = vcmp.eq.f32.partialorder %v7208_v53, %v7392_v56  ;;  %v7397_v40 = vpop.xlane.xlu0 %2778  ;;  %v2832_v60 = vcvt.s32.f32 %v2830_v6 }
 0x9ec   : > { %vm2780_vm13 = vcmp.eq.f32.partialorder %v7222_v10, %v7397_v40  ;;  %v2795_v1 = vsel %vm2794_vm9, %v2790_v48, inf  ;;  %v2872_v48 = vand.u32 65535, %v7281_v33 }
 0x9ed   : > { %2796 = vmin.xlane.f32.xlu1 %v2795_v1  ;;  %v2781_v8 = vsel %vm2780_vm13, %v2776_v44, inf  ;;  %v2858_v44 = vand.u32 65535, %v7294_v23 }
 0x9ee   : > { %2782 = vmin.xlane.f32.xlu0 %v2781_v8  ;;  %v2874_v8 = vcvt.s32.f32 %v2872_v48 }
 0x9ef   : > { %v7402_v47 = vpop.xlane.xlu1 %2820  ;;  %v2860_v27 = vcvt.s32.f32 %v2858_v44 }
 0x9f0   : > { %vm2822_vm10 = vcmp.eq.f32.partialorder %v7242_v26, %v7402_v47  ;;  %v7407_v53 = vpop.xlane.xlu0 %2806 }
 0x9f1   : > { %vm2808_vm11 = vcmp.eq.f32.partialorder %v7255_v35, %v7407_v53  ;;  %v2823_v10 = vsel %vm2822_vm10, %v2818_v2, inf  ;;  %v2900_v2 = vand.u32 65535, %v7313_v25 }
 0x9f2   : > { %2824 = vmin.xlane.f32.xlu1 %v2823_v10  ;;  %v2809_v42 = vsel %vm2808_vm11, %v2804_v7, inf  ;;  %v2886_v7 = vand.u32 65535, %v7326_v4 }
 0x9f3   : > { %v7412_v16 = vpop.xlane.xlu1 %2848  ;;  %2810 = vmin.xlane.f32.xlu0 %v2809_v42  ;;  %v2902_v42 = vcvt.s32.f32 %v2900_v2 }
 0x9f4   : > { %vm2850_vm9 = vcmp.eq.f32.partialorder %v7276_v0, %v7412_v16  ;;  %v2888_v48 = vcvt.s32.f32 %v2886_v7 }
 0x9f5   : > { %v7417_v26 = vpop.xlane.xlu0 %2834  ;;  %v2851_v35 = vsel %vm2850_vm9, %v2846_v61, inf  ;;  %v2928_v61 = vand.u32 65535, %v7345_v5 }
 0x9f6   : > { %vm2836_vm13 = vcmp.eq.f32.partialorder %v7289_v14, %v7417_v26  ;;  %2852 = vmin.xlane.f32.xlu1 %v2851_v35 }
 0x9f7   : > { %v2837_v46 = vsel %vm2836_vm13, %v2832_v60, inf  ;;  %v2914_v60 = vand.u32 65535, %v7358_v19 }
 0x9f8   : > { %v7422_v1 = vpop.xlane.xlu1 %2876  ;;  %2838 = vmin.xlane.f32.xlu0 %v2837_v46  ;;  %v2930_v46 = vcvt.s32.f32 %v2928_v61  ;;  %v8274_v61 = vld [vmem:[#allocation4_spill] sm:$0xff] }
 0x9f9   : > { %vm2878_vm10 = vcmp.eq.f32.partialorder %v7308_v32, %v7422_v1 }
 0x9fa   : > { %v7427_v0 = vpop.xlane.xlu0 %2862  ;;  %v2879_v14 = vsel %vm2878_vm10, %v2874_v8, inf }
 0x9fb   : > { %vm2864_vm11 = vcmp.eq.f32.partialorder %v7321_v11, %v7427_v0  ;;  %2880 = vmin.xlane.f32.xlu1 %v2879_v14 }
 0x9fc   : > { %v2865_v6 = vsel %vm2864_vm11, %v2860_v27, inf }
 0x9fd   : > { %v7432_v10 = vpop.xlane.xlu1 %2904  ;;  %2866 = vmin.xlane.f32.xlu0 %v2865_v6  ;;  %v8272_v6 = vld [vmem:[#allocation3_spill] sm:$0xff] }
 0x9fe   : > { %vm2906_vm9 = vcmp.eq.f32.partialorder %v7340_v50, %v7432_v10  ;;  %v7437_v32 = vpop.xlane.xlu0 %2890  ;;  %v2916_v50 = vcvt.s32.f32 %v2914_v60 }
 0x9ff   : > { %vm2892_vm13 = vcmp.eq.f32.partialorder %v7353_v30, %v7437_v32  ;;  %v2907_v11 = vsel %vm2906_vm9, %v2902_v42, inf  ;;  %v8270_v30 = vld [vmem:[#allocation2_spill] sm:$0xff]  ;;  %v8273_v42 = vmax.f32 %v8272_v6, 0.0 }
 0xa00   : > { %2908 = vmin.xlane.f32.xlu1 %v2907_v11  ;;  %v2893_v44 = vsel %vm2892_vm13, %v2888_v48, inf  ;;  %v8271_v7 = vmax.f32 %v8270_v30, 0.0  ;;  %v8275_v11 = vmax.f32 %v8274_v61, 0.0  ;;  %v8280_v30 = vld [vmem:[#allocation7_spill] sm:$0xff]  ;;  %v2771_v61 = vcvt.f32.s32 %v7382_v39 }
 0xa01   : > { %v7442_v35 = vpop.xlane.xlu1 %2932  ;;  %2894 = vmin.xlane.f32.xlu0 %v2893_v44  ;;  %v2974_v48 = vadd.f32 1e-08, %v8273_v42  ;;  %v8276_v44 = vld [vmem:[#allocation5_spill] sm:$0xff]  ;;  %v2799_v39 = vcvt.f32.s32 %v7392_v56  ;;  %vm8286_vm13 = vnez %v8215_v36 }
 0xa02   : > { %vm2934_vm10 = vcmp.eq.f32.partialorder %v7364_v63, %v7442_v35  ;;  %v7446_v8 = vpop.xlane.xlu0 %2918  ;;  %v2975_v14 = vadd.f32 1e-08, %v8271_v7  ;;  %v2977_v63 = vadd.f32 1e-08, %v8275_v11  ;;  %v8277_v60 = vmax.f32 %v8276_v44, 0.0 }
 0xa03   : > { %vm2920_vm11 = vcmp.eq.f32.partialorder %v7366_v54, %v7446_v8  ;;  %v2935_v2 = vsel %vm2934_vm10, %v2930_v46, inf  ;;  %v2743_v54 = vcvt.f32.s32 %v7372_v3  ;;  %v2729_v46 = vcvt.f32.s32 %v7377_v20  ;;  %v8282_v20 = vld [vmem:[#allocation8_spill] sm:$0xff] }
 0xa04   : > { %2936 = vmin.xlane.f32.xlu1 %v2935_v2  ;;  %v2921_v27 = vsel %vm2920_vm11, %v2916_v50, inf  ;;  %4406 = vrcp.f32 %v2975_v14  ;;  %v2976_v41 = vadd.f32 1e-08, %v8277_v60  ;;  %v8278_v50 = vld [vmem:[#allocation6_spill] sm:$0xff]  ;;  %v8281_v7 = vmax.f32 %v8280_v30, 0.0 }
 0xa05   : > { %2922 = vmin.xlane.f32.xlu0 %v2921_v27  ;;  %4408 = vrcp.f32 %v2974_v48  ;;  %v8279_v2 = vmax.f32 %v8278_v50, 0.0  ;;  %v2744_v14 = vshll.u32 %v2743_v54, 16  ;;  %v2730_v44 = vshll.u32 %v2729_v46, 16 }
 0xa06   : > { %4410 = vrcp.f32 %v2977_v63  ;;  %v2978_v6 = vadd.f32 1e-08, %v8281_v7  ;;  %v2757_v60 = vcvt.f32.s32 %v7387_v38  ;;  %v8283_v19 = vmax.f32 %v8282_v20, 0.0  ;;  %v8284_v63 = vld [vmem:[#allocation9_spill] sm:$0xff] }
 0xa07   : > { %v2979_v27 = vadd.f32 1e-08, %v8279_v2  ;;  %4412 = vrcp.f32 %v2976_v41  ;;  %v8285_v30 = vmax.f32 %v8284_v63, 0.0  ;;  %v2772_v54 = vshll.u32 %v2771_v61, 16 }
 0xa08   : > { %v2981_v50 = vadd.f32 1e-08, %v8283_v19  ;;  %v2758_v46 = vshll.u32 %v2757_v60, 16  ;;  %v2827_v60 = vcvt.f32.s32 %v7402_v47  ;;  %v2939_v34 = vcvt.f32.s32 %v7442_v35 }
 0xa09   : > { %4414 = vrcp.f32 %v2979_v27  ;;  %v2980_v7 = vadd.f32 1e-08, %v8285_v30  ;;  %v2785_v27 = vcvt.f32.s32 %v7397_v40 }
 0xa0a   : > { %4416 = vrcp.f32 %v2978_v6  ;;  %v8287_v6 = vld [vmem:[#allocation10_spill] sm:$0xff] }
 0xa0b   : > { %4418 = vrcp.f32 %v2981_v50  ;;  %v2786_v50 = vshll.u32 %v2785_v27, 16  ;;  %v2828_v27 = vshll.u32 %v2827_v60, 16 }
 0xa0c   : > { %4420 = vrcp.f32 %v2980_v7  ;;  %v8293_v7 = vld [vmem:[#allocation12_spill] sm:$0xff] }
 0xa0d   : > { %v8294_v47 = vmax.f32 %v8293_v7, 0.0  ;;  %v8302_v7 = vld [vmem:[#allocation19_spill] sm:$0xff] }
 0xa0e   : > { %v4407_v38 = vpop.eup %4406 }
 0xa0f   : > { %v4409_v19 = vpop.eup %4408 }
 0xa10   : > { %v4411_v62 = vpop.eup %4410 }
 0xa11   : > { %v4413_v30 = vpop.eup %4412 }
 0xa71   : > { %v2741_v42 = vpop.xlane.xlu1 %2740 }
 0xa72   : > { %v2742_v48 = vcvt.f32.s32 %v2741_v42 }
 0xa73   : > { %v2727_v11 = vpop.xlane.xlu0 %2726 }
 0xa74   : > { %v2728_v3 = vcvt.f32.s32 %v2727_v11  ;;  %v2745_v2 = vadd.s32 %v2744_v14, %v2742_v48  ;;  %v8288_v14 = vmax.f32 %v8287_v6, 0.0 }
 0xa76   : > { %v2731_v31 = vadd.s32 %v2730_v44, %v2728_v3  ;;  %v2769_v41 = vpop.xlane.xlu1 %2768  ;;  %vm2943_vm9 = vcmp.eq.s32.totalorder %v7115_v15, %v2745_v2  ;;  %v2983_v61 = vadd.f32 1e-08, %v8288_v14  ;;  %v8290_v15 = vld [vmem:[#allocation11_spill] sm:$0xff]  ;;  %v2813_v2 = vcvt.f32.s32 %v7407_v53 }
 0xa77   : > { %v2770_v42 = vcvt.f32.s32 %v2769_v41  ;;  %v2755_v5 = vpop.xlane.xlu0 %2754  ;;  %vm2959_vm10 = vmor %vm8286_vm13, %vm2943_vm9  ;;  %v8291_v40 = vmax.f32 %v8290_v15, 0.0  ;;  %v2985_v41 = vadd.f32 1e-08, %v8294_v47  ;;  %v8298_v15 = vld [vmem:[#allocation15_spill] sm:$0xff]  ;;  %v8303_v47 = vmax.f32 %v8302_v7, 0.0  ;;  %v4405_v7 = vld [vmem:[%s384_s23] sm:$0xff]  }
 0xa78   : > { %v2756_v11 = vcvt.f32.s32 %v2755_v5  ;;  %vm2942_vm11 = vcmp.eq.s32.totalorder %v7126_v57, %v2731_v31  ;;  %v7478_v48 = vsel %vm2959_vm10, %v4407_v38, 0.0  ;;  %v2800_v31 = vshll.u32 %v2799_v39, 16  ;;  %4170 = vmatprep.subr.bf16.mxu1 %v4405_v7 }
 0xa79   : > { %v2773_v56 = vadd.s32 %v2772_v54, %v2770_v42  ;;  %vm2958_vm8 = vmor %vm8289_vm12, %vm2942_vm11  ;;  %v2982_v5 = vadd.f32 1e-08, %v8291_v40  ;;  %3024 = vadd.xlane.f32.xlu1 %v7478_v48  ;;  %vm8292_vm12 = vnez %v8220_v24  ;;  %4422 = vrcp.f32 %v2983_v61  ;;  %4171 = vmatpush3.bf16.xpose.msra.mxu1 %v4405_v7 }
 0xa7a   : > { %v2759_v44 = vadd.s32 %v2758_v46, %v2756_v11  ;;  %v2797_v36 = vpop.xlane.xlu1 %2796  ;;  %v7485_v57 = vsel %vm2958_vm8, %v4409_v19, 0.0  ;;  %vm8295_vm10 = vnez %v8223_v22  ;;  %v4415_v46 = vpop.eup %4414  ;;  %v2855_v11 = vcvt.f32.s32 %v7412_v16 }
 0xa7b   : > { %v2798_v3 = vcvt.f32.s32 %v2797_v36  ;;  %3022 = vadd.xlane.f32.xlu0 %v7485_v57  ;;  %v2783_v20 = vpop.xlane.xlu0 %2782  ;;  %vm2945_vm9 = vcmp.eq.s32.totalorder %v7146_v37, %v2773_v56  ;;  %4424 = vrcp.f32 %v2982_v5  ;;  %v8296_v37 = vld [vmem:[#allocation13_spill] sm:$0xff]  ;;  %v4417_v22 = vpop.eup %4416  ;;  %v2814_v14 = vshll.u32 %v2813_v2, 16 }
 0xa7c   : > { %v2784_v63 = vcvt.f32.s32 %v2783_v20  ;;  %vm2961_vm13 = vmor %vm8292_vm12, %vm2945_vm9  ;;  %vm2944_vm8 = vcmp.eq.s32.totalorder %v7160_v52, %v2759_v44  ;;  %v8297_v53 = vmax.f32 %v8296_v37, 0.0  ;;  %v2841_v61 = vcvt.f32.s32 %v7417_v26 }
 0xa7d   : > { %v2801_v54 = vadd.s32 %v2800_v31, %v2798_v3  ;;  %v7496_v39 = vsel %vm2961_vm13, %v4411_v62, 0.0  ;;  %vm2960_vm11 = vmor %vm8295_vm10, %vm2944_vm8  ;;  %4426 = vrcp.f32 %v2985_v41  ;;  %v8299_v40 = vmax.f32 %v8298_v15, 0.0 }
 0xa7e   : > { %v2984_v42 = vadd.f32 1e-08, %v8297_v53  ;;  %v2787_v38 = vadd.s32 %v2786_v50, %v2784_v63  ;;  %3028 = vadd.xlane.f32.xlu1 %v7496_v39  ;;  %v7503_v52 = vsel %vm2960_vm11, %v4413_v30, 0.0  ;;  %v2856_v3 = vshll.u32 %v2855_v11, 16 }
 0xa7f   : > { %v2825_v24 = vpop.xlane.xlu1 %2824  ;;  %3026 = vadd.xlane.f32.xlu0 %v7503_v52  ;;  %vm2947_vm9 = vcmp.eq.s32.totalorder %v7179_v29, %v2801_v54  ;;  %v2987_v16 = vadd.f32 1e-08, %v8299_v40  ;;  %v8300_v29 = vld [vmem:[#allocation16_spill] sm:$0xff]  ;;  %v2883_v20 = vcvt.f32.s32 %v7422_v1  ;;  %v2842_v2 = vshll.u32 %v2841_v61, 16 }
 0xa80   : > { %v2826_v19 = vcvt.f32.s32 %v2825_v24  ;;  %v2811_v6 = vpop.xlane.xlu0 %2810  ;;  %vm2963_vm12 = vmor %vm7169_vm1, %vm2947_vm9  ;;  %vm2946_vm13 = vcmp.eq.s32.totalorder %v7192_v43, %v2787_v38  ;;  %4428 = vrcp.f32 %v2984_v42  ;;  %v8301_v36 = vmax.f32 %v8300_v29, 0.0  ;;  %v4419_v43 = vpop.eup %4418 }
 0xa81   : > { %v2812_v56 = vcvt.f32.s32 %v2811_v6  ;;  %v7514_v44 = vsel %vm2963_vm12, %v4415_v46, 0.0  ;;  %vm2962_vm8 = vmor %vm7183_vm15, %vm2946_vm13  ;;  %v4421_v45 = vpop.eup %4420  ;;  %v2869_v63 = vcvt.f32.s32 %v7427_v0  ;;  %4430 = vrcp.f32 %v2987_v16 }
 0xa82   : > { %v2829_v5 = vadd.s32 %v2828_v27, %v2826_v19  ;;  %v2986_v26 = vadd.f32 1e-08, %v8301_v36  ;;  %3032 = vadd.xlane.f32.xlu1 %v7514_v44  ;;  %v7521_v60 = vsel %vm2962_vm8, %v4417_v22, 0.0  ;;  %v2989_v1 = vadd.f32 1e-08, %v8303_v47  ;;  %v3197_v47 = vld [vmem:[%s7726_s3] sm:$0xff] }
 0xa83   : > { %v2815_v31 = vadd.s32 %v2814_v14, %v2812_v56  ;;  %v2853_v58 = vpop.xlane.xlu1 %2852  ;;  %3030 = vadd.xlane.f32.xlu0 %v7521_v60  ;;  %v2884_v38 = vshll.u32 %v2883_v20, 16  ;;  %v2911_v24 = vcvt.f32.s32 %v7432_v10  ;;  %v2870_v11 = vshll.u32 %v2869_v63, 16 }
 0xa84   : > { %v2854_v62 = vcvt.f32.s32 %v2853_v58  ;;  %vm2949_vm15 = vcmp.eq.s32.totalorder %v7214_v13, %v2829_v5  ;;  %4432 = vrcp.f32 %v2986_v26  ;;  %v8304_v13 = vld [vmem:[#allocation20_spill] sm:$0xff]  ;;  %v2897_v19 = vcvt.f32.s32 %v7437_v32 }
 0xa85   : > { %v2839_v50 = vpop.xlane.xlu0 %2838  ;;  %vm2965_vm1 = vmor %vm7203_vm14, %vm2949_vm15  ;;  %vm2948_vm10 = vcmp.eq.s32.totalorder %v7228_v12, %v2815_v31  ;;  %v8305_v37 = vmax.f32 %v8304_v13, 0.0  ;;  %v4423_v12 = vpop.eup %4422  ;;  %4434 = vrcp.f32 %v2989_v1  ;;  %v2912_v56 = vshll.u32 %v2911_v24, 16  ;;  %v3198_v1 = vld [vmem:[%s7726_s3 + $0x8] sm:$0xff] }
 0xa86   : > { %v2840_v30 = vcvt.f32.s32 %v2839_v50  ;;  %v2857_v41 = vadd.s32 %v2856_v3, %v2854_v62  ;;  %v7532_v54 = vsel %vm2965_vm1, %v4419_v43, 0.0  ;;  %vm2964_vm11 = vmor %vm7218_vm0, %vm2948_vm10  ;;  %v4425_v28 = vpop.eup %4424  ;;  %v2898_v17 = vshll.u32 %v2897_v19, 16 }
 0xa87   : > { %v2988_v0 = vadd.f32 1e-08, %v8305_v37  ;;  %3036 = vadd.xlane.f32.xlu1 %v7532_v54  ;;  %v7539_v42 = vsel %vm2964_vm11, %v4421_v45, 0.0  ;;  %v4427_v32 = vpop.eup %4426  ;;  %v2925_v16 = vcvt.f32.s32 %v7446_v8  ;;  %v2940_v8 = vshll.u32 %v2939_v34, 16  ;;  %v8306_v45 = vld [vmem:[#allocation14_spill] sm:$0xff] }
 0xa88   : > { %v2843_v53 = vadd.s32 %v2842_v2, %v2840_v30  ;;  %v2881_v9 = vpop.xlane.xlu1 %2880  ;;  %3034 = vadd.xlane.f32.xlu0 %v7539_v42  ;;  %vm2951_vm14 = vcmp.eq.s32.totalorder %v7247_v59, %v2857_v41  ;;  %v8307_v2 = vld [vmem:[#allocation31_spill] sm:$0xff]  ;;  %v4331_v41 = vpack.c.bf16 %v3198_v1, %v3197_v47 }
 0xa89   : > { %v2882_v46 = vcvt.f32.s32 %v2881_v9  ;;  %vm2967_vm0 = vmor %vm7237_vm4, %vm2951_vm14  ;;  %4436 = vrcp.f32 %v2988_v0  ;;  %v2926_v43 = vshll.u32 %v2925_v16, 16 }
 0xa8a   : > { %v2867_v27 = vpop.xlane.xlu0 %2866  ;;  %vm2950_vm9 = vcmp.eq.s32.totalorder %v7260_v49, %v2843_v53  ;;  %v7548_v14 = vsel %vm2967_vm0, %v4423_v12, 0.0  ;;  %v4429_v40 = vpop.eup %4428  ;;  %4332 = vmatprep.subr.bf16.mxu1 %v4331_v41 }
 0xa8b   : > { %v2868_v6 = vcvt.f32.s32 %v2867_v27  ;;  %v2885_v22 = vadd.s32 %v2884_v38, %v2882_v46  ;;  %vm2966_vm12 = vmor %vm7251_vm3, %vm2950_vm9  ;;  %3040 = vadd.xlane.f32.xlu1 %v7548_v14  ;;  %v4431_v31 = vpop.eup %4430  ;;  %vm3206_vm9 = vcmask 130048  }
 0xa8c   : > { %v7553_v61 = vsel %vm2966_vm12, %v4425_v28, 0.0  ;;  %vm3427_vm12 = vcmask 261120  }
 0xa8d   : > { %v2871_v10 = vadd.s32 %v2870_v11, %v2868_v6  ;;  %v2909_v59 = vpop.xlane.xlu1 %2908  ;;  %3038 = vadd.xlane.f32.xlu0 %v7553_v61  ;;  %vm2953_vm4 = vcmp.eq.s32.totalorder %v7281_v33, %v2885_v22 }
 0xa8e   : > { %v2910_v15 = vcvt.f32.s32 %v2909_v59  ;;  %v2895_v49 = vpop.xlane.xlu0 %2894  ;;  %vm2969_vm3 = vmor %vm7271_vm7, %vm2953_vm4  ;;  %vm4497_vm4 = vmmov 0  }
 0xa8f   : > { %v2896_v5 = vcvt.f32.s32 %v2895_v49  ;;  %vm2952_vm13 = vcmp.eq.s32.totalorder %v7294_v23, %v2871_v10  ;;  %v7562_v36 = vsel %vm2969_vm3, %v4427_v32, 0.0  ;;  %v4433_v23 = vpop.eup %4432  ;;  %vm7682_vm3 = vmpackc.low %vm3206_vm9, %vm3206_vm9 }
 0xa90   : > { %v2913_v29 = vadd.s32 %v2912_v56, %v2910_v15  ;;  %vm2968_vm8 = vmor %vm7285_vm5, %vm2952_vm13  ;;  %3044 = vadd.xlane.f32.xlu1 %v7562_v36 }
 0xa91   : > { %v2899_v35 = vadd.s32 %v2898_v17, %v2896_v5  ;;  %v2937_v33 = vpop.xlane.xlu1 %2936  ;;  %v7567_v26 = vsel %vm2968_vm8, %v4429_v40, 0.0 }
 0xa92   : > { %v2938_v58 = vcvt.f32.s32 %v2937_v33  ;;  %3042 = vadd.xlane.f32.xlu0 %v7567_v26  ;;  %v2923_v21 = vpop.xlane.xlu0 %2922  ;;  %vm2955_vm7 = vcmp.eq.s32.totalorder %v7313_v25, %v2913_v29  ;;  %v4435_v25 = vpop.eup %4434 }
 0xa93   : > { %v2924_v3 = vcvt.f32.s32 %v2923_v21  ;;  %vm2971_vm5 = vmor %vm7303_vm6, %vm2955_vm7  ;;  %vm2954_vm15 = vcmp.eq.s32.totalorder %v7326_v4, %v2899_v35  ;;  %v4437_v55 = vpop.eup %4436  ;;  %vm8308_vm6 = vnez %v8307_v2  ;;  %v8309_v4 = vld [vmem:[#allocation17_spill] sm:$0xff] }
 0xa94   : > { %v2941_v51 = vadd.s32 %v2940_v8, %v2938_v58  ;;  %v7574_v20 = vsel %vm2971_vm5, %v4431_v31, 0.0  ;;  %vm2970_vm1 = vmor %vm7317_vm2, %vm2954_vm15  ;;  %vm8311_vm2 = vnez %v8310_v18 }
 0xa95   : > { %v2927_v62 = vadd.s32 %v2926_v43, %v2924_v3  ;;  %3048 = vadd.xlane.f32.xlu1 %v7574_v20  ;;  %v7579_v50 = vsel %vm2970_vm1, %v4433_v23, 0.0 }
 0xa96   : > { %3046 = vadd.xlane.f32.xlu0 %v7579_v50  ;;  %vm2957_vm10 = vcmp.eq.s32.totalorder %v8306_v45, %v2941_v51 }
 0xa97   : > { %vm2973_vm11 = vmor %vm8308_vm6, %vm2957_vm10  ;;  %vm2956_vm14 = vcmp.eq.s32.totalorder %v8309_v4, %v2927_v62 }
 0xa98   : > { %v7586_v63 = vsel %vm2973_vm11, %v4435_v25, 0.0  ;;  %vm2972_vm0 = vmor %vm8311_vm2, %vm2956_vm14 }
 0xa99   : > { %3052 = vadd.xlane.f32.xlu1 %v7586_v63  ;;  %v7592_v30 = vsel %vm2972_vm0, %v4437_v55, 0.0 }
 0xa9a   : > { %3050 = vadd.xlane.f32.xlu0 %v7592_v30 }
 0xb06   : > { %v3025_v13 = vpop.xlane.xlu1 %3024 }
 0xb07   : > { %4438 = vrcp.f32 %v3025_v13 }
 0xb08   : > { %v3023_v37 = vpop.xlane.xlu0 %3022 }
 0xb09   : > { %4440 = vrcp.f32 %v3023_v37 }
 0xb0b   : > { %v3029_v0 = vpop.xlane.xlu1 %3028 }
 0xb0c   : > { %4442 = vrcp.f32 %v3029_v0  ;;  %v3027_v53 = vpop.xlane.xlu0 %3026 }
 0xb0d   : > { %4444 = vrcp.f32 %v3027_v53 }
 0xb0f   : > { %v3033_v9 = vpop.xlane.xlu1 %3032 }
 0xb10   : > { %4446 = vrcp.f32 %v3033_v9  ;;  %v3031_v12 = vpop.xlane.xlu0 %3030 }
 0xb11   : > { %4448 = vrcp.f32 %v3031_v12  ;;  %v4439_v38 = vpop.eup %4438 }
 0xb12   : > { %v3071_v27 = vmul.f32 %v4439_v38, %v7478_v48 }
 0xb13   : > { %v4441_v24 = vpop.eup %4440 }
 0xb14   : > { %v3037_v46 = vpop.xlane.xlu1 %3036  ;;  %v3070_v11 = vmul.f32 %v4441_v24, %v7485_v57 }
 0xb15   : > { %4450 = vrcp.f32 %v3037_v46  ;;  %v3035_v28 = vpop.xlane.xlu0 %3034 }
 0xb16   : > { %4452 = vrcp.f32 %v3035_v28  ;;  %v4443_v19 = vpop.eup %4442  ;;  %v3086_v6 = vpack.c.bf16 %v3071_v27, %v3070_v11 }
 0xb17   : > { %v4445_v22 = vpop.eup %4444  ;;  %v3073_v59 = vmul.f32 %v4443_v19, %v7496_v39 }
 0xb18   : > { %v3041_v10 = vpop.xlane.xlu1 %3040  ;;  %4172 = vmatprep.mubr.bf16.mxu1 %v3086_v6  ;;  %v3072_v56 = vmul.f32 %v4445_v22, %v7503_v52  ;;  %v3637_v22 = vld [vmem:[%s7730_s7] sm:$0xff] }
 0xb19   : > { %4454 = vrcp.f32 %v3041_v10  ;;  %3645 = vxpose.xlu0.b32.start [1/2] (short) (narrow) %v3637_v22, 8  ;;  %v3638_v10 = vld [vmem:[%s7730_s7 + $0x8] sm:$0xff] }
 0xb1a   : > { %v3039_v32 = vpop.xlane.xlu0 %3038  ;;  %v4447_v34 = vpop.eup %4446  ;;  %v3087_v15 = vpack.c.bf16 %v3073_v59, %v3072_v56  ;;  %v3962_v59 = vld [vmem:[%s7727_s4] ss:$0 sm:$0xff] }
 0xb1b   : > { %4456 = vrcp.f32 %v3039_v32  ;;  %v4449_v48 = vpop.eup %4448  ;;  %v3075_v40 = vmul.f32 %v4447_v34, %v7514_v44 }
 0xb1c   : > { %4173 = vmatmul.mubr.bf16.vlgmr.msra.gmra.mrb[0].mxu1 %v3087_v15  ;;  %v3074_v17 = vmul.f32 %v4449_v48, %v7521_v60 }
 0xb1d   : > { %v3045_v49 = vpop.xlane.xlu1 %3044  ;;  %4334 = vmatpush3.bf16.msra.mxu1 %v4331_v41  ;;  %3646 = vxpose.xlu0.b32.end [2/2] (short) (narrow) %v3638_v10, 8 }
 0xb1e   : > { %4458 = vrcp.f32 %v3045_v49  ;;  %v3088_v16 = vpack.c.bf16 %v3075_v40, %v3074_v17 }
 0xb1f   : > { %v3043_v57 = vpop.xlane.xlu0 %3042  ;;  %v4451_v39 = vpop.eup %4450 }
 0xb20   : > { %4460 = vrcp.f32 %v3043_v57  ;;  %v4453_v5 = vpop.eup %4452  ;;  %v3077_v52 = vmul.f32 %v4451_v39, %v7532_v54  ;;  %4176 = vmatprep.mubr.bf16.mxu1 %v3088_v16 }
 0xb21   : > { %v3076_v33 = vmul.f32 %v4453_v5, %v7539_v42 }
 0xb22   : > { %v3049_v29 = vpop.xlane.xlu1 %3048 }
 0xb23   : > { %4462 = vrcp.f32 %v3049_v29  ;;  %v3047_v35 = vpop.xlane.xlu0 %3046  ;;  %v4455_v44 = vpop.eup %4454  ;;  %v3089_v31 = vpack.c.bf16 %v3077_v52, %v3076_v33 }
 0xb24   : > { %4464 = vrcp.f32 %v3047_v35  ;;  %v3079_v60 = vmul.f32 %v4455_v44, %v7548_v14 }
 0xb25   : > { %v4457_v8 = vpop.eup %4456  ;;  %4177 = vmatmul.mubr.bf16.gmra.mrb[4].mxu1 %v3089_v31 }
 0xb26   : > { %v3053_v58 = vpop.xlane.xlu1 %3052  ;;  %v3078_v23 = vmul.f32 %v4457_v8, %v7553_v61 }
 0xb27   : > { %4466 = vrcp.f32 %v3053_v58  ;;  %v3051_v21 = vpop.xlane.xlu0 %3050 }
 0xb28   : > { %4468 = vrcp.f32 %v3051_v21  ;;  %v4459_v43 = vpop.eup %4458  ;;  %v3090_v54 = vpack.c.bf16 %v3079_v60, %v3078_v23 }
 0xb29   : > { %v3081_v51 = vmul.f32 %v4459_v43, %v7562_v36 }
 0xb2a   : > { %v4461_v3 = vpop.eup %4460  ;;  %4180 = vmatprep.mubr.bf16.mxu1 %v3090_v54 }
 0xb2b   : > { %v3080_v42 = vmul.f32 %v4461_v3, %v7567_v26  ;;  %v3416_v26 = vld [vmem:[%s7728_s5] sm:$0xff] }
 0xb2d   : > { %v4463_v62 = vpop.eup %4462  ;;  %v3091_v25 = vpack.c.bf16 %v3081_v51, %v3080_v42 }
 0xb2e   : > { %v4465_v45 = vpop.eup %4464  ;;  %v3083_v55 = vmul.f32 %v4463_v62, %v7574_v20  ;;  %v3417_v20 = vld [vmem:[%s7728_s5 + $0x8] sm:$0xff] }
 0xb2f   : > { %4181 = vmatmul.mubr.bf16.gmra.mrb[8].mxu1 %v3091_v25  ;;  %v3082_v14 = vmul.f32 %v4465_v45, %v7579_v50  ;;  %v4335_v47 = vpack.c.bf16 %v3417_v20, %v3416_v26  ;;  %v3418_v50 = vld [vmem:[%s7728_s5 + $0x10] sm:$0xff] }
 0xb31   : > { %v4467_v2 = vpop.eup %4466  ;;  %v3092_v4 = vpack.c.bf16 %v3083_v55, %v3082_v14  ;;  %4336 = vmatprep.subr.bf16.mxu1 %v4335_v47 }
 0xb32   : > { %v4469_v61 = vpop.eup %4468  ;;  %v3085_v18 = vmul.f32 %v4467_v2, %v7586_v63  ;;  %v3419_v63 = vld [vmem:[%s7728_s5 + $0x18] sm:$0xff] }
 0xb33   : > { %4184 = vmatprep.mubr.bf16.mxu1 %v3092_v4  ;;  %v3084_v7 = vmul.f32 %v4469_v61, %v7592_v30  ;;  %v4339_v13 = vpack.c.bf16 %v3419_v63, %v3418_v50 }
 0xb35   : > { %v3093_v36 = vpack.c.bf16 %v3085_v18, %v3084_v7 }
 0xb37   : > { %4185 = vmatmul.mubr.bf16.gmra.mrb[12].mxu1 %v3093_v36 }
 0xbef   : > { %v4174_v30 = vpop.f32.mrb[0].mxu1 }
 0xbf0   : > { %v3134_v1 = vpop.f32.mrb[1].mxu1 }
 0xbf1   : > { %v4175_v41 = vpop.f32.mrb[2].mxu1  ;;  %4192 = vmatprep.mubr.msk.f32.mxu1 %vm3206_vm9, %v3134_v1 }
 0xbf2   : > { %v3137_v37 = vpop.f32.mrb[3].mxu1 }
 0xbf3   : > { %4193 = vmatmul.mubr.msk.f32.vlgmr.msra.gmra.mrb[16].mxu1 %vm3206_vm9, %v3137_v37  ;;  %v4496_v37 = vmov 0.0|0.0  }
 0xbf4   : > { %4195 = vmatprep.mubr.msk.f32.mxu1 %vm3206_vm9, %v4174_v30  ;;  %4338 = vmatpush3.bf16.msra.mxu1 %v4335_v47 }
 0xbf5   : > { %4340 = vmatprep.subr.bf16.mxu1 %v4339_v13  ;;  %4343 = vmatprep.subr.bf16.mxu0 %v4496_v37 }
 0xbf7   : > { %4196 = vmatmul.mubr.msk.f32.gmra.mrb[18].mxu1 %vm3206_vm9, %v4175_v41 }
 0xbf8   : > { %v4178_v0 = vpop.f32.mrb[4].mxu1  ;;  %4342 = vmatpush3.bf16.msra.mxu1 %v4339_v13 }
 0xbf9   : > { %v3150_v53 = vpop.f32.mrb[5].mxu1 }
 0xbfa   : > { %v4179_v9 = vpop.f32.mrb[6].mxu1  ;;  %4198 = vmatprep.mubr.msk.f32.mxu1 %vm3206_vm9, %v3150_v53  ;;  %v3639_v53 = vld [vmem:[%s7731_s8] sm:$0x7] }
 0xbfb   : > { %v3153_v12 = vpop.f32.mrb[7].mxu1 }
 0xbfc   : > { %4199 = vmatmul.mubr.msk.f32.gmra.mrb[20].mxu1 %vm3206_vm9, %v3153_v12  ;;  %v3979_v12 = vld [vmem:[%s7729_s6] ss:$0 sm:$0xff] }
 0xbfd   : > { %4201 = vmatprep.mubr.msk.f32.mxu1 %vm3206_vm9, %v4178_v0  ;;  %v4498_v0 = vmov 0.0  }
 0xbfe   : > { %4280 = vmatprep.mubr.msk.f32.mxu0 %vm4497_vm4, %v4498_v0 }
 0xc00   : > { %4202 = vmatmul.mubr.msk.f32.gmra.mrb[22].mxu1 %vm3206_vm9, %v4179_v9  ;;  %v4499_v9 = vmov 0  }
 0xc01   : > { %4403 = vset.pattern.permute.xlu1 %v4499_v9  ;;  %4404 = vset.pattern.permute.xlu0 %v4499_v9 }
 0xc02   : > { %v4182_v38 = vpop.f32.mrb[8].mxu1  ;;  %3642 = vperm.xlu1 %4403, %v3639_v53  }
 0xc03   : > { %v3166_v24 = vpop.f32.mrb[9].mxu1 }
 0xc04   : > { %v4183_v46 = vpop.f32.mrb[10].mxu1  ;;  %4204 = vmatprep.mubr.msk.f32.mxu1 %vm3206_vm9, %v3166_v24 }
 0xc05   : > { %v3169_v27 = vpop.f32.mrb[11].mxu1 }
 0xc06   : > { %4205 = vmatmul.mubr.msk.f32.gmra.mrb[24].mxu1 %vm3206_vm9, %v3169_v27 }
 0xc07   : > { %4207 = vmatprep.mubr.msk.f32.mxu1 %vm3206_vm9, %v4182_v38 }
 0xc0a   : > { %v4186_v28 = vpop.f32.mrb[12].mxu1  ;;  %4208 = vmatmul.mubr.msk.f32.gmra.mrb[26].mxu1 %vm3206_vm9, %v4183_v46 }
 0xc0b   : > { %v3182_v11 = vpop.f32.mrb[13].mxu1 }
 0xc0c   : > { %v4187_v19 = vpop.f32.mrb[14].mxu1  ;;  %4210 = vmatprep.mubr.msk.f32.mxu1 %vm3206_vm9, %v3182_v11 }
 0xc0d   : > { %v3185_v6 = vpop.f32.mrb[15].mxu1 }
 0xc0e   : > { %4211 = vmatmul.mubr.msk.f32.gmra.mrb[28].mxu1 %vm3206_vm9, %v3185_v6 }
 0xc0f   : > { %4213 = vmatprep.mubr.msk.f32.mxu1 %vm3206_vm9, %v4186_v28 }
 0xc12   : > { %4214 = vmatmul.mubr.msk.f32.gmra.mrb[30].mxu1 %vm3206_vm9, %v4187_v19 }
 0xcc6   : > { %v4194_v32 = vpop.f32.mrb[16].mxu1 }
 0xcc7   : > { %v3327_v56 = vadd.f32 %v4194_v32, %v3962_v59  ;;  %v3321_v34 = vpop.f32.mrb[17].mxu1 }
 0xcc8   : > { %v3322_v15 = vadd.f32 %v3962_v59, %v3321_v34 }
 0xcc9   : > { %v3401_v40 = vmax.f32 %v3327_v56, 0.0 }
 0xcca   : > { %v3400_v48 = vmax.f32 %v3322_v15, 0.0  ;;  %v4197_v49 = vpop.f32.mrb[18].mxu1 }
 0xccb   : > { %v3337_v57 = vadd.f32 %v4197_v49, %v3962_v59  ;;  %v3331_v17 = vpop.f32.mrb[19].mxu1 }
 0xccc   : > { %v3332_v39 = vadd.f32 %v3962_v59, %v3331_v17  ;;  %4224 = vmatprep.mubr.msk.f32.mxu1 %vm3427_vm12, %v3400_v48 }
 0xccd   : > { %4225 = vmatmul.mubr.msk.f32.vlgmr.msra.gmra.mrb[32].mxu1 %vm3427_vm12, %v3401_v40  ;;  %v3403_v29 = vmax.f32 %v3337_v57, 0.0 }
 0xcce   : > { %v3402_v16 = vmax.f32 %v3332_v39, 0.0 }
 0xccf   : > { %v4200_v5 = vpop.f32.mrb[20].mxu1 }
 0xcd0   : > { %v3347_v52 = vadd.f32 %v4200_v5, %v3962_v59  ;;  %v3341_v35 = vpop.f32.mrb[21].mxu1  ;;  %4227 = vmatprep.mubr.msk.f32.mxu1 %vm3427_vm12, %v3402_v16 }
 0xcd1   : > { %v3342_v33 = vadd.f32 %v3962_v59, %v3341_v35  ;;  %4228 = vmatmul.mubr.msk.f32.gmra.mrb[34].mxu1 %vm3427_vm12, %v3403_v29 }
 0xcd2   : > { %v3405_v8 = vmax.f32 %v3347_v52, 0.0 }
 0xcd3   : > { %v3404_v44 = vmax.f32 %v3342_v33, 0.0  ;;  %v4203_v31 = vpop.f32.mrb[22].mxu1 }
 0xcd4   : > { %v3357_v58 = vadd.f32 %v4203_v31, %v3962_v59  ;;  %v3351_v60 = vpop.f32.mrb[23].mxu1 }
 0xcd5   : > { %v3352_v21 = vadd.f32 %v3962_v59, %v3351_v60  ;;  %4230 = vmatprep.mubr.msk.f32.mxu1 %vm3427_vm12, %v3404_v44 }
 0xcd6   : > { %4231 = vmatmul.mubr.msk.f32.gmra.mrb[36].mxu1 %vm3427_vm12, %v3405_v8  ;;  %v3407_v54 = vmax.f32 %v3357_v58, 0.0 }
 0xcd7   : > { %v3406_v23 = vmax.f32 %v3352_v21, 0.0 }
 0xcd9   : > { %v4206_v43 = vpop.f32.mrb[24].mxu1  ;;  %4233 = vmatprep.mubr.msk.f32.mxu1 %vm3427_vm12, %v3406_v23 }
 0xcda   : > { %v3367_v3 = vadd.f32 %v4206_v43, %v3962_v59  ;;  %v3361_v51 = vpop.f32.mrb[25].mxu1  ;;  %4234 = vmatmul.mubr.msk.f32.gmra.mrb[38].mxu1 %vm3427_vm12, %v3407_v54 }
 0xcdb   : > { %v3362_v42 = vadd.f32 %v3962_v59, %v3361_v51 }
 0xcdc   : > { %v3409_v45 = vmax.f32 %v3367_v3, 0.0 }
 0xcdd   : > { %v3408_v62 = vmax.f32 %v3362_v42, 0.0  ;;  %v4209_v25 = vpop.f32.mrb[26].mxu1 }
 0xcde   : > { %v3377_v55 = vadd.f32 %v4209_v25, %v3962_v59  ;;  %v3371_v14 = vpop.f32.mrb[27].mxu1 }
 0xcdf   : > { %v3372_v2 = vadd.f32 %v3962_v59, %v3371_v14  ;;  %4236 = vmatprep.mubr.msk.f32.mxu1 %vm3427_vm12, %v3408_v62 }
 0xce0   : > { %4237 = vmatmul.mubr.msk.f32.gmra.mrb[40].mxu1 %vm3427_vm12, %v3409_v45  ;;  %v3411_v18 = vmax.f32 %v3377_v55, 0.0 }
 0xce1   : > { %v3410_v4 = vmax.f32 %v3372_v2, 0.0  ;;  %v4212_v61 = vpop.f32.mrb[28].mxu1 }
 0xce2   : > { %v3387_v7 = vadd.f32 %v4212_v61, %v3962_v59  ;;  %v3381_v36 = vpop.f32.mrb[29].mxu1 }
 0xce3   : > { %v3382_v26 = vadd.f32 %v3962_v59, %v3381_v36  ;;  %4239 = vmatprep.mubr.msk.f32.mxu1 %vm3427_vm12, %v3410_v4 }
 0xce4   : > { %4240 = vmatmul.mubr.msk.f32.gmra.mrb[42].mxu1 %vm3427_vm12, %v3411_v18  ;;  %v3413_v50 = vmax.f32 %v3387_v7, 0.0 }
 0xce5   : > { %v3412_v20 = vmax.f32 %v3382_v26, 0.0  ;;  %v4215_v47 = vpop.f32.mrb[30].mxu1 }
 0xce6   : > { %v3397_v63 = vadd.f32 %v4215_v47, %v3962_v59  ;;  %v3391_v30 = vpop.f32.mrb[31].mxu1 }
 0xce7   : > { %v3392_v1 = vadd.f32 %v3962_v59, %v3391_v30  ;;  %4242 = vmatprep.mubr.msk.f32.mxu1 %vm3427_vm12, %v3412_v20 }
 0xce8   : > { %4243 = vmatmul.mubr.msk.f32.gmra.mrb[44].mxu1 %vm3427_vm12, %v3413_v50  ;;  %v3415_v13 = vmax.f32 %v3397_v63, 0.0 }
 0xce9   : > { %v3414_v41 = vmax.f32 %v3392_v1, 0.0 }
 0xceb   : > { %4245 = vmatprep.mubr.msk.f32.mxu1 %vm3427_vm12, %v3414_v41  ;;  %v3661_v41 = vpop.trf.xlu0 }
 0xcec   : > { %4246 = vmatmul.mubr.msk.f32.gmra.mrb[46].mxu1 %vm3427_vm12, %v3415_v13  ;;  %v3643_v13 = vpop.permute.xlu1 %3642 }
 0xda0   : > { %v4226_v38 = vpop.f32.mrb[32].mxu1 }
 0xda1   : > { %v3548_v24 = vadd.f32 %v4226_v38, %v3979_v12  ;;  %v3542_v46 = vpop.f32.mrb[33].mxu1 }
 0xda2   : > { %v3543_v27 = vadd.f32 %v3979_v12, %v3542_v46 }
 0xda3   : > { %v3622_v28 = vmax.f32 %v3548_v24, 0.0 }
 0xda4   : > { %v3621_v11 = vmax.f32 %v3543_v27, 0.0  ;;  %v4229_v19 = vpop.f32.mrb[34].mxu1 }
 0xda5   : > { %v3558_v6 = vadd.f32 %v4229_v19, %v3979_v12  ;;  %v3552_v22 = vpop.f32.mrb[35].mxu1 }
 0xda6   : > { %v4344_v59 = vpack.c.bf16 %v3622_v28, %v3621_v11  ;;  %v3553_v32 = vadd.f32 %v3979_v12, %v3552_v22 }
 0xda7   : > { %v3624_v56 = vmax.f32 %v3558_v6, 0.0 }
 0xda8   : > { %v3623_v34 = vmax.f32 %v3553_v32, 0.0  ;;  %4346 = vmatpush3.bf16.xpose.msk.msra.mxu0 %vm7682_vm3, %v4344_v59 }
 0xda9   : > { %v4232_v15 = vpop.f32.mrb[36].mxu1  ;;  %4347 = vmatprep.subr.bf16.mxu0 %v4496_v37 }
 0xdaa   : > { %v3568_v48 = vadd.f32 %v4232_v15, %v3979_v12  ;;  %v3562_v49 = vpop.f32.mrb[37].mxu1  ;;  %v4348_v40 = vpack.c.bf16 %v3624_v56, %v3623_v34 }
 0xdab   : > { %v3563_v57 = vadd.f32 %v3979_v12, %v3562_v49 }
 0xdac   : > { %v3626_v17 = vmax.f32 %v3568_v48, 0.0 }
 0xdad   : > { %v3625_v39 = vmax.f32 %v3563_v57, 0.0  ;;  %v4235_v16 = vpop.f32.mrb[38].mxu1 }
 0xdae   : > { %v3578_v5 = vadd.f32 %v4235_v16, %v3979_v12  ;;  %v3572_v29 = vpop.f32.mrb[39].mxu1 }
 0xdaf   : > { %v4352_v52 = vpack.c.bf16 %v3626_v17, %v3625_v39  ;;  %v3573_v35 = vadd.f32 %v3979_v12, %v3572_v29 }
 0xdb0   : > { %v3628_v33 = vmax.f32 %v3578_v5, 0.0  ;;  %4350 = vmatpush3.bf16.xpose.msk.msra.mxu0 %vm7682_vm3, %v4348_v40 }
 0xdb1   : > { %v3627_v44 = vmax.f32 %v3573_v35, 0.0  ;;  %4351 = vmatprep.subr.bf16.mxu0 %v4496_v37 }
 0xdb3   : > { %v4238_v31 = vpop.f32.mrb[40].mxu1  ;;  %v4356_v60 = vpack.c.bf16 %v3628_v33, %v3627_v44 }
 0xdb4   : > { %v3588_v8 = vadd.f32 %v4238_v31, %v3979_v12  ;;  %v3582_v58 = vpop.f32.mrb[41].mxu1 }
 0xdb5   : > { %v3583_v21 = vadd.f32 %v3979_v12, %v3582_v58 }
 0xdb6   : > { %v3630_v23 = vmax.f32 %v3588_v8, 0.0 }
 0xdb7   : > { %v3629_v43 = vmax.f32 %v3583_v21, 0.0  ;;  %v4241_v54 = vpop.f32.mrb[42].mxu1 }
 0xdb8   : > { %v3598_v3 = vadd.f32 %v4241_v54, %v3979_v12  ;;  %v3592_v51 = vpop.f32.mrb[43].mxu1  ;;  %4354 = vmatpush3.bf16.xpose.msk.msra.mxu0 %vm7682_vm3, %v4352_v52 }
 0xdb9   : > { %v4360_v42 = vpack.c.bf16 %v3630_v23, %v3629_v43  ;;  %v3593_v62 = vadd.f32 %v3979_v12, %v3592_v51  ;;  %4355 = vmatprep.subr.bf16.mxu0 %v4496_v37 }
 0xdba   : > { %v3632_v25 = vmax.f32 %v3598_v3, 0.0 }
 0xdbb   : > { %v3631_v45 = vmax.f32 %v3593_v62, 0.0  ;;  %v4244_v55 = vpop.f32.mrb[44].mxu1 }
 0xdbc   : > { %v3608_v14 = vadd.f32 %v4244_v55, %v3979_v12  ;;  %v3602_v2 = vpop.f32.mrb[45].mxu1 }
 0xdbd   : > { %v4364_v4 = vpack.c.bf16 %v3632_v25, %v3631_v45  ;;  %v3603_v61 = vadd.f32 %v3979_v12, %v3602_v2 }
 0xdbe   : > { %v3634_v18 = vmax.f32 %v3608_v14, 0.0 }
 0xdbf   : > { %v3633_v7 = vmax.f32 %v3603_v61, 0.0  ;;  %v4247_v36 = vpop.f32.mrb[46].mxu1 }
 0xdc0   : > { %v3618_v26 = vadd.f32 %v4247_v36, %v3979_v12  ;;  %v3612_v20 = vpop.f32.mrb[47].mxu1  ;;  %4358 = vmatpush3.bf16.xpose.msk.msra.mxu0 %vm7682_vm3, %v4356_v60 }
 0xdc1   : > { %v4368_v47 = vpack.c.bf16 %v3634_v18, %v3633_v7  ;;  %v3613_v50 = vadd.f32 %v3979_v12, %v3612_v20  ;;  %4359 = vmatprep.subr.bf16.mxu0 %v4496_v37 }
 0xdc2   : > { %v3636_v63 = vmax.f32 %v3618_v26, 0.0 }
 0xdc3   : > { %v3635_v30 = vmax.f32 %v3613_v50, 0.0 }
 0xdc5   : > { %v4372_v1 = vpack.c.bf16 %v3636_v63, %v3635_v30 }
 0xdc8   : > { %4362 = vmatpush3.bf16.xpose.msk.msra.mxu0 %vm7682_vm3, %v4360_v42 }
 0xdc9   : > { %4363 = vmatprep.subr.bf16.mxu0 %v4496_v37 }
 0xdd0   : > { %4366 = vmatpush3.bf16.xpose.msk.msra.mxu0 %vm7682_vm3, %v4364_v4 }
 0xdd1   : > { %4367 = vmatprep.subr.bf16.mxu0 %v4496_v37 }
 0xdd8   : > { %4370 = vmatpush3.bf16.xpose.msk.msra.mxu0 %vm7682_vm3, %v4368_v47 }
 0xdd9   : > { %4371 = vmatprep.subr.bf16.mxu0 %v4496_v37 }
 0xde0   : > { %4374 = vmatpush3.bf16.xpose.msk.msra.mxu0 %vm7682_vm3, %v4372_v1 }
 0xde7   : > { %4281 = vmatmul.mubr.msk.f32.vlgmr.msra.gmra.mrb[16].mxu0 %vm3206_vm9, %v3661_v41 }
 0xeba   : > { %v3794_v0 = vpop.f32.mrb[16].mxu0 }
 0xebb   : > { %v3795_v53 = vadd.f32 %v3794_v0, %v3643_v13  ;;  %v4282_v9 = vpop.f32.mrb[17].mxu0 }
 0xebd   : > { %4470 = vtanh.f32 %v3795_v53 }
 0xec7   : > { %v4471_v12 = vpop.eup %4470 }
 0xec8   : > { %3799 = vst [vmem:[%s406_s15] sm:$0x7] %v4471_v12 }
 0xec9 PF: > { %s19_s11 = sadd.s32 1, %s4494_s11   ;;  %s8314_s30 = smov %s4490_s10 }
 0xeca   : > { %p16_p5 = scmp.ge.s32.totalorder %s19_s11, 4   ;;  %s8315_s10 = smov %s8317_s12 }
 0xecc   :  { %18 = sbr.rel (!%p16_p5) target bundleno = 2 (0x2), region = 92 }

</bundles_post_ra>
